<compile_context>
chip_gen: v7x
topology: tpu7x:2x2x1
jax: 0.10.0
libtpu: 0.0.40
codegen_flags: <defaults>
</compile_context>

<pallas_src>
import jax
import jax.numpy as jnp
import numpy as np
from jax import lax
from jax.experimental import pallas as pl
from jax.experimental.pallas import tpu as pltpu

EPS = 1e-5
NEG_SLOPE = 0.2
LANE = 128


def _round_up(x, m):
    return (x + m - 1) // m * m


# --------------------------------------------------------------------------
# Fused kernels
# --------------------------------------------------------------------------
def _adain_lrelu_to_canvas(x_ref, g_ref, b_ref, canvas_ref):
    """AdaIN + LeakyReLU(0.2) on the (H, W, C) interior only; write it into a
    lane-padded VMEM canvas whose 1-pixel ring and pad lanes are zero."""
    xi = x_ref[0]                                          # (H, W, C) f32
    H, W, C = xi.shape
    mean = jnp.mean(xi, axis=(0, 1), keepdims=True)        # (1, 1, C)
    var = jnp.mean(jnp.square(xi - mean), axis=(0, 1), keepdims=True)
    y = (1.0 + g_ref[0]) * ((xi - mean) * lax.rsqrt(var + EPS)) + b_ref[0]
    y = jnp.where(y >= 0.0, y, NEG_SLOPE * y)              # LeakyReLU(0.2)

    # Zero the whole canvas each step (cheap; megacore-safe: a core that starts
    # at grid step > 0 still gets a clean border / pad lanes), then overwrite
    # the interior's real channels.
    canvas_ref[...] = jnp.zeros_like(canvas_ref)
    canvas_ref[1:H + 1, 1:W + 1, 0:C] = y


def _conv3x3_from_canvas(canvas_ref, w_ref, acc):
    """3x3 conv (stride 1, pad 1, no bias) over the canvas as 3 MXU dots.

    dx shifts are hoisted into one lane-aligned concat (K fuses (dx, ci) ->
    3*Cp, matching w_ref's (3, 3*Cp, Cop) layout); each dy tap is a leading-dim
    slice.  Accumulation stays in registers; caller does a single store.
    The zero K-rows from lane padding are negligible MXU work at small C and
    vanish for C >= 128.
    """
    Hp, Wp, Cp = canvas_ref.shape
    H, W = Hp - 2, Wp - 2
    slab = jnp.concatenate(
        [canvas_ref[:, dx:dx + W, :] for dx in range(3)], axis=-1
    ).astype(jnp.bfloat16)                                 # (Hp, W, 3*Cp) bf16
    for dy in range(3):
        tap = slab[dy:dy + H].reshape(H * W, 3 * Cp)
        d = jnp.dot(tap, w_ref[dy], preferred_element_type=jnp.float32)
        acc = d if acc is None else acc + d
    return acc                                             # (H*W, Cop) f32


def adain_conv3x3_kernel(x_ref, g_ref, b_ref, w_ref, o_ref, canvas_ref):
    """AdaIN -> LeakyReLU -> conv3x3 for one image (one grid step)."""
    _adain_lrelu_to_canvas(x_ref, g_ref, b_ref, canvas_ref)
    acc = _conv3x3_from_canvas(canvas_ref, w_ref, None)
    o_ref[0] = acc[:, :o_ref.shape[2]].astype(o_ref.dtype)


def adain_conv3x3_res_kernel(x_ref, g_ref, b_ref, w_ref, r_ref, w1x1_ref,
                             o_ref, canvas_ref):
    """AdaIN -> LeakyReLU -> conv3x3, fused with conv1x1 residual + final add."""
    _adain_lrelu_to_canvas(x_ref, g_ref, b_ref, canvas_ref)
    # conv1x1 of the block input seeds the accumulator (no zero-init pass).
    res = jnp.dot(r_ref[0].astype(jnp.bfloat16), w1x1_ref[...],
                  preferred_element_type=jnp.float32)      # (H*W, Cop) f32
    acc = _conv3x3_from_canvas(canvas_ref, w_ref, res)
    o_ref[0] = acc[:, :o_ref.shape[2]].astype(o_ref.dtype)


# --------------------------------------------------------------------------
# pallas_call wrapper
# --------------------------------------------------------------------------
def _fused_adain_conv(x, gamma, beta, w_taps, out_c, residual=None, w1x1=None):
    """One fused pallas_call: AdaIN -> LeakyReLU -> conv3x3 (+ optional conv1x1
    residual + add).  The grid iterates over the batch axis ("parallel")."""
    N, H, W, Ci = x.shape
    Cp = w_taps.shape[1] // 3                              # lane-padded in-ch
    Cr = residual.shape[-1] if residual is not None else 0

    in_specs = [
        pl.BlockSpec((1, H, W, Ci), lambda n: (n, 0, 0, 0)),
        pl.BlockSpec((1, 1, 1, Ci), lambda n: (n, 0, 0, 0)),
        pl.BlockSpec((1, 1, 1, Ci), lambda n: (n, 0, 0, 0)),
        pl.BlockSpec(w_taps.shape, lambda n: (0, 0, 0)),   # resident weights
    ]
    args = [x, gamma, beta, w_taps]
    flops = 2 * N * H * W * 9 * Ci * out_c
    bytes_accessed = (4 * (x.size + gamma.size + beta.size)
                      + 2 * w_taps.size + 4 * N * H * W * out_c)

    if residual is not None:
        kernel = adain_conv3x3_res_kernel
        in_specs += [
            pl.BlockSpec((1, H * W, Cr), lambda n: (n, 0, 0)),
            pl.BlockSpec(w1x1.shape, lambda n: (0, 0)),
        ]
        args += [residual, w1x1]
        flops += 2 * N * H * W * Cr * out_c
        bytes_accessed += 4 * residual.size + 2 * w1x1.size
    else:
        kernel = adain_conv3x3_kernel

    return pl.pallas_call(
        kernel,
        # Output is (N, H*W, out_c) with the REAL channel count; the reshape to
        # (N, H, W, out_c) is done in XLA (free) to keep in-kernel reshapes on
        # lane-aligned shapes only.
        out_shape=jax.ShapeDtypeStruct((N, H * W, out_c), jnp.float32),
        grid_spec=pltpu.PrefetchScalarGridSpec(
            num_scalar_prefetch=0,
            grid=(N,),
            in_specs=in_specs,
            out_specs=pl.BlockSpec((1, H * W, out_c), lambda n: (n, 0, 0)),
            scratch_shapes=[pltpu.VMEM((H + 2, W + 2, Cp), jnp.float32)],
        ),
        compiler_params=pltpu.CompilerParams(
            dimension_semantics=("parallel",),
        ),
        cost_estimate=pl.CostEstimate(flops=flops, transcendentals=N * Ci,
                                      bytes_accessed=bytes_accessed),
    )(*args)


# --------------------------------------------------------------------------
# Forward pass (matches AdaINResBlock(scale_factor=1, activation='lrelu'))
# --------------------------------------------------------------------------
def adain_resblock_forward(feat_nchw, v_sid, p):
    feat = jnp.transpose(feat_nchw, (0, 2, 3, 1))          # NCHW -> NHWC
    N, H, W, Cin = feat.shape
    Cout = p["w1_hwio"].shape[-1]

    # Style FC hoisted out of the kernels (one tiny XLA matmul per AdaIN).
    def gamma_beta(w, b, C):
        h = v_sid @ w + b                                  # (N, 2C) f32
        return h[:, :C].reshape(N, 1, 1, C), h[:, C:].reshape(N, 1, 1, C)

    g1, b1 = gamma_beta(p["fc1_w"], p["fc1_b"], Cin)
    g2, b2 = gamma_beta(p["fc2_w"], p["fc2_b"], Cout)

    # Interpolate(scale_factor=1, 'bilinear', align_corners=False) == identity.
    f1 = _fused_adain_conv(feat, g1, b1, p["w1_taps"], Cout)        # (N,H*W,Co)
    out = _fused_adain_conv(f1.reshape(N, H, W, Cout), g2, b2, p["w2_taps"],
                            Cout, residual=feat.reshape(N, H * W, Cin),
                            w1x1=p["w1x1_mat"])                     # (N,H*W,Co)
    return jnp.transpose(out.reshape(N, H, W, Cout), (0, 3, 1, 2))  # NCHW


def prepare_params(fc1_w, fc1_b, fc2_w, fc2_b, w1_hwio, w2_hwio, w1x1_hwio):
    """Pack weights for the kernels: conv weights in a K-fused (3, 3*Cp, Cop)
    bf16 layout (K = dx-major, ci-minor) with exact-zero pad rows/cols.  Only
    weights are lane-padded; activations stay unpadded in HBM."""
    Cin, Cout = w1_hwio.shape[2], w1_hwio.shape[3]
    Cop = _round_up(Cout, LANE)

    def conv_taps(w_hwio):
        kh, kw, ci, co = w_hwio.shape
        cip = _round_up(ci, LANE)
        w = jnp.pad(w_hwio, ((0, 0), (0, 0), (0, cip - ci), (0, Cop - co)))
        return w.reshape(kh, kw * cip, Cop).astype(jnp.bfloat16)

    return {
        "fc1_w": fc1_w, "fc1_b": fc1_b, "fc2_w": fc2_w, "fc2_b": fc2_b,
        "w1_taps": conv_taps(w1_hwio),
        "w2_taps": conv_taps(w2_hwio),
        "w1x1_mat": jnp.pad(w1x1_hwio.reshape(Cin, Cout),
                            ((0, 0), (0, Cop - Cout))).astype(jnp.bfloat16),
        # Unpadded f32 forms for the pure-JAX reference.
        "w1_hwio": w1_hwio, "w2_hwio": w2_hwio, "w1x1_hwio": w1x1_hwio,
    }


# --------------------------------------------------------------------------
# Pure-JAX reference (correctness check)
# --------------------------------------------------------------------------
def ref_forward(feat_nchw, s, p, mxu_dtype):
    """mxu_dtype=bf16 mirrors the kernel's MXU precision (f32 accumulation);
    mxu_dtype=f32 gives the exact PyTorch-module (f32) semantics."""
    feat = jnp.transpose(feat_nchw, (0, 2, 3, 1))          # NHWC

    def adain(x, w, b):
        C = x.shape[-1]
        h = s @ w + b
        gamma = h[:, :C][:, None, None, :]
        beta = h[:, C:][:, None, None, :]
        m = x.mean(axis=(1, 2), keepdims=True)
        v = ((x - m) ** 2).mean(axis=(1, 2), keepdims=True)
        return (1.0 + gamma) * ((x - m) * lax.rsqrt(v + EPS)) + beta

    act = lambda x: jnp.where(x >= 0, x, NEG_SLOPE * x)

    def conv(x, w):
        return lax.conv_general_dilated(
            x.astype(mxu_dtype), w.astype(mxu_dtype), (1, 1), "SAME",
            dimension_numbers=("NHWC", "HWIO", "NHWC"),
            preferred_element_type=jnp.float32)

    f1 = conv(act(adain(feat, p["fc1_w"], p["fc1_b"])), p["w1_hwio"])
    f1 = conv(act(adain(f1, p["fc2_w"], p["fc2_b"])), p["w2_hwio"])
    f2 = conv(feat, p["w1x1_hwio"])
    return jnp.transpose(f1 + f2, (0, 3, 1, 2))


# --------------------------------------------------------------------------
# Main
# --------------------------------------------------------------------------
if __name__ == "__main__":
    N, Cin, Cout, H, W, S = 2, 4, 8, 16, 16, 32

    key = jax.random.PRNGKey(0)
    k = jax.random.split(key, 9)

    feat = jax.random.normal(k[0], (N, Cin, H, W), jnp.float32)     # NCHW
    v_sid = jax.random.normal(k[1], (N, S), jnp.float32)

    # Synthetic parameters (shapes per the module's __init__).
    fc1_w = 0.1 * jax.random.normal(k[2], (S, 2 * Cin), jnp.float32)
    fc1_b = 0.1 * jax.random.normal(k[3], (2 * Cin,), jnp.float32)
    fc2_w = 0.1 * jax.random.normal(k[4], (S, 2 * Cout), jnp.float32)
    fc2_b = 0.1 * jax.random.normal(k[5], (2 * Cout,), jnp.float32)
    w1_hwio = 0.1 * jax.random.normal(k[6], (3, 3, Cin, Cout), jnp.float32)
    w2_hwio = 0.1 * jax.random.normal(k[7], (3, 3, Cout, Cout), jnp.float32)
    w1x1_hwio = 0.1 * jax.random.normal(k[8], (1, 1, Cin, Cout), jnp.float32)

    params = prepare_params(fc1_w, fc1_b, fc2_w, fc2_b,
                            w1_hwio, w2_hwio, w1x1_hwio)

    fwd = jax.jit(adain_resblock_forward)
    out = jax.block_until_ready(fwd(feat, v_sid, params))

    # Tight check vs a precision-matched reference (bf16 MXU operands, f32
    # accumulation/stats -- same numerics as the kernel).
    ref_bf16 = jax.block_until_ready(
        ref_forward(feat, v_sid, params, jnp.bfloat16))
    np.testing.assert_allclose(np.asarray(out), np.asarray(ref_bf16),
                               rtol=5e-3, atol=5e-3)
    # Loose sanity check vs the exact f32 module semantics (bf16 MXU rounding
    # is the only difference).
    ref_f32 = jax.block_until_ready(
        ref_forward(feat, v_sid, params, jnp.float32))
    np.testing.assert_allclose(np.asarray(out), np.asarray(ref_f32),
                               rtol=5e-2, atol=5e-2)

    print("KERNEL_OK")
</pallas_src>

<mosaic_0001>
module attributes {stable_mosaic.version = 11 : i64} {
  func.func @adain_conv3x3_res_kernel(%arg0: i32, %arg1: memref<1x16x16x8xf32, #tpu.memory_space<vmem>>, %arg2: memref<1x1x1x8xf32, #tpu.memory_space<vmem>>, %arg3: memref<1x1x1x8xf32, #tpu.memory_space<vmem>>, %arg4: memref<3x384x128xbf16, #tpu.memory_space<vmem>>, %arg5: memref<1x256x4xf32, #tpu.memory_space<vmem>>, %arg6: memref<4x128xbf16, #tpu.memory_space<vmem>>, %arg7: memref<1x256x8xf32, #tpu.memory_space<vmem>>, %arg8: memref<18x18x128xf32, #tpu.memory_space<vmem>>) attributes {dimension_semantics = [#tpu.dimension_semantics<parallel>], iteration_bounds = array<i64: 2>, scalar_prefetch = 0 : i64, scratch_operands = 1 : i64, tpu.core_type = #tpu.core_type<tc>, window_params = [{transform_indices = @transform_0, window_bounds = array<i64: 1, 16, 16, 8>}, {transform_indices = @transform_1, window_bounds = array<i64: 1, 1, 1, 8>}, {transform_indices = @transform_2, window_bounds = array<i64: 1, 1, 1, 8>}, {pipeline_mode = #tpu.pipeline_mode<synchronous>, transform_indices = @transform_3, window_bounds = array<i64: 3, 384, 128>}, {transform_indices = @transform_4, window_bounds = array<i64: 1, 256, 4>}, {pipeline_mode = #tpu.pipeline_mode<synchronous>, transform_indices = @transform_5, window_bounds = array<i64: 4, 128>}, {transform_indices = @transform_6, window_bounds = array<i64: 1, 256, 8>}]} {
    %c0 = arith.constant 0 : index
    %c0_0 = arith.constant 0 : index
    %c0_1 = arith.constant 0 : index
    %c0_2 = arith.constant 0 : index
    %0 = vector.load %arg1[%c0, %c0_0, %c0_1, %c0_2] : memref<1x16x16x8xf32, #tpu.memory_space<vmem>>, vector<1x16x16x8xf32>
    %1 = vector.shape_cast %0 : vector<1x16x16x8xf32> to vector<16x16x8xf32>
    %cst = arith.constant dense<0.000000e+00> : vector<8xf32>
    %2 = vector.multi_reduction <add>, %1, %cst [0, 1] : vector<16x16x8xf32> to vector<8xf32>
    %3 = vector.shape_cast %2 : vector<8xf32> to vector<1x1x8xf32>
    %cst_3 = arith.constant 2.560000e+02 : f32
    %4 = vector.broadcast %cst_3 : f32 to vector<1x1x8xf32>
    %5 = arith.divf %3, %4 : vector<1x1x8xf32>
    %6 = vector.broadcast %5 : vector<1x1x8xf32> to vector<16x16x8xf32>
    %7 = arith.subf %1, %6 : vector<16x16x8xf32>
    %8 = arith.mulf %7, %7 : vector<16x16x8xf32>
    %cst_4 = arith.constant dense<0.000000e+00> : vector<8xf32>
    %9 = vector.multi_reduction <add>, %8, %cst_4 [0, 1] : vector<16x16x8xf32> to vector<8xf32>
    %10 = vector.shape_cast %9 : vector<8xf32> to vector<1x1x8xf32>
    %cst_5 = arith.constant 2.560000e+02 : f32
    %11 = vector.broadcast %cst_5 : f32 to vector<1x1x8xf32>
    %12 = arith.divf %10, %11 : vector<1x1x8xf32>
    %c0_6 = arith.constant 0 : index
    %c0_7 = arith.constant 0 : index
    %c0_8 = arith.constant 0 : index
    %c0_9 = arith.constant 0 : index
    %13 = vector.load %arg2[%c0_6, %c0_7, %c0_8, %c0_9] : memref<1x1x1x8xf32, #tpu.memory_space<vmem>>, vector<1x1x1x8xf32>
    %14 = vector.shape_cast %13 : vector<1x1x1x8xf32> to vector<1x1x8xf32>
    %cst_10 = arith.constant 1.000000e+00 : f32
    %15 = vector.broadcast %cst_10 : f32 to vector<1x1x8xf32>
    %16 = arith.addf %15, %14 : vector<1x1x8xf32>
    %17 = vector.broadcast %5 : vector<1x1x8xf32> to vector<16x16x8xf32>
    %18 = arith.subf %1, %17 : vector<16x16x8xf32>
    %cst_11 = arith.constant 9.99999974E-6 : f32
    %19 = vector.broadcast %cst_11 : f32 to vector<1x1x8xf32>
    %20 = arith.addf %12, %19 : vector<1x1x8xf32>
    %21 = math.rsqrt %20 : vector<1x1x8xf32>
    %22 = vector.broadcast %21 : vector<1x1x8xf32> to vector<16x16x8xf32>
    %23 = arith.mulf %18, %22 : vector<16x16x8xf32>
    %24 = vector.broadcast %16 : vector<1x1x8xf32> to vector<16x16x8xf32>
    %25 = arith.mulf %24, %23 : vector<16x16x8xf32>
    %c0_12 = arith.constant 0 : index
    %c0_13 = arith.constant 0 : index
    %c0_14 = arith.constant 0 : index
    %c0_15 = arith.constant 0 : index
    %26 = vector.load %arg3[%c0_12, %c0_13, %c0_14, %c0_15] : memref<1x1x1x8xf32, #tpu.memory_space<vmem>>, vector<1x1x1x8xf32>
    %27 = vector.shape_cast %26 : vector<1x1x1x8xf32> to vector<1x1x8xf32>
    %28 = vector.broadcast %27 : vector<1x1x8xf32> to vector<16x16x8xf32>
    %29 = arith.addf %25, %28 : vector<16x16x8xf32>
    %cst_16 = arith.constant 0.000000e+00 : f32
    %30 = vector.broadcast %cst_16 : f32 to vector<16x16x8xf32>
    %31 = arith.cmpf oge, %29, %30 : vector<16x16x8xf32>
    %cst_17 = arith.constant 2.000000e-01 : f32
    %32 = vector.broadcast %cst_17 : f32 to vector<16x16x8xf32>
    %33 = arith.mulf %32, %29 : vector<16x16x8xf32>
    %34 = arith.select %31, %29, %33 : vector<16x16x8xi1>, vector<16x16x8xf32>
    %cst_18 = arith.constant 0.000000e+00 : f32
    %35 = vector.broadcast %cst_18 : f32 to vector<18x18x128xf32>
    %c0_19 = arith.constant 0 : index
    %c0_20 = arith.constant 0 : index
    %c0_21 = arith.constant 0 : index
    %36 = vector.load %arg8[%c0_19, %c0_20, %c0_21] : memref<18x18x128xf32, #tpu.memory_space<vmem>>, vector<18x18x128xf32>
    tpu.vector_store %arg8[%c0_19, %c0_20, %c0_21], %35 {strides = array<i32>} : memref<18x18x128xf32, #tpu.memory_space<vmem>>, vector<18x18x128xf32>,
    %c1 = arith.constant 1 : index
    %c1_22 = arith.constant 1 : index
    %c0_23 = arith.constant 0 : index
    %37 = vector.load %arg8[%c1, %c1_22, %c0_23] : memref<18x18x128xf32, #tpu.memory_space<vmem>>, vector<16x16x8xf32>
    tpu.vector_store %arg8[%c1, %c1_22, %c0_23], %34 {strides = array<i32>} : memref<18x18x128xf32, #tpu.memory_space<vmem>>, vector<16x16x8xf32>,
    %c0_24 = arith.constant 0 : index
    %c0_25 = arith.constant 0 : index
    %c0_26 = arith.constant 0 : index
    %38 = vector.load %arg5[%c0_24, %c0_25, %c0_26] : memref<1x256x4xf32, #tpu.memory_space<vmem>>, vector<1x256x4xf32>
    %39 = vector.shape_cast %38 : vector<1x256x4xf32> to vector<256x4xf32>
    %40 = arith.truncf %39 : vector<256x4xf32> to vector<256x4xbf16>
    %c0_27 = arith.constant 0 : index
    %c0_28 = arith.constant 0 : index
    %41 = vector.load %arg6[%c0_27, %c0_28] : memref<4x128xbf16, #tpu.memory_space<vmem>>, vector<4x128xbf16>
    %cst_29 = arith.constant dense<0.000000e+00> : vector<256x128xf32>
    %42 = tpu.matmul %40, %41, %cst_29 {dimension_numbers = #tpu.dot_dimension_numbers<[1], [0], [0], [1], [0, 0, 1, 1], [], []>} : vector<256x4xbf16>, vector<4x128xbf16>, vector<256x128xf32> -> vector<256x128xf32>
    %c0_30 = arith.constant 0 : index
    %c0_31 = arith.constant 0 : index
    %c0_32 = arith.constant 0 : index
    %43 = vector.load %arg8[%c0_30, %c0_31, %c0_32] : memref<18x18x128xf32, #tpu.memory_space<vmem>>, vector<18x16x128xf32>
    %c0_33 = arith.constant 0 : index
    %c1_34 = arith.constant 1 : index
    %c0_35 = arith.constant 0 : index
    %44 = vector.load %arg8[%c0_33, %c1_34, %c0_35] : memref<18x18x128xf32, #tpu.memory_space<vmem>>, vector<18x16x128xf32>
    %c0_36 = arith.constant 0 : index
    %c2 = arith.constant 2 : index
    %c0_37 = arith.constant 0 : index
    %45 = vector.load %arg8[%c0_36, %c2, %c0_37] : memref<18x18x128xf32, #tpu.memory_space<vmem>>, vector<18x16x128xf32>
    %46 = tpu.concatenate %43, %44, %45 in 2 : vector<18x16x128xf32>, vector<18x16x128xf32>, vector<18x16x128xf32> -> vector<18x16x384xf32>
    %47 = arith.truncf %46 : vector<18x16x384xf32> to vector<18x16x384xbf16>
    %48 = vector.extract_strided_slice %47 {offsets = [0, 0, 0], sizes = [16, 16, 384], strides = [1, 1, 1]} : vector<18x16x384xbf16> to vector<16x16x384xbf16>
    %49 = vector.shape_cast %48 : vector<16x16x384xbf16> to vector<256x384xbf16>
    %c0_38 = arith.constant 0 : index
    %c0_39 = arith.constant 0 : index
    %c0_40 = arith.constant 0 : index
    %50 = vector.load %arg4[%c0_38, %c0_39, %c0_40] : memref<3x384x128xbf16, #tpu.memory_space<vmem>>, vector<1x384x128xbf16>
    %51 = vector.shape_cast %50 : vector<1x384x128xbf16> to vector<384x128xbf16>
    %cst_41 = arith.constant dense<0.000000e+00> : vector<256x128xf32>
    %52 = tpu.matmul %49, %51, %cst_41 {dimension_numbers = #tpu.dot_dimension_numbers<[1], [0], [0], [1], [0, 0, 1, 1], [], []>} : vector<256x384xbf16>, vector<384x128xbf16>, vector<256x128xf32> -> vector<256x128xf32>
    %53 = arith.addf %42, %52 : vector<256x128xf32>
    %54 = vector.extract_strided_slice %47 {offsets = [1, 0, 0], sizes = [16, 16, 384], strides = [1, 1, 1]} : vector<18x16x384xbf16> to vector<16x16x384xbf16>
    %55 = vector.shape_cast %54 : vector<16x16x384xbf16> to vector<256x384xbf16>
    %c1_42 = arith.constant 1 : index
    %c0_43 = arith.constant 0 : index
    %c0_44 = arith.constant 0 : index
    %56 = vector.load %arg4[%c1_42, %c0_43, %c0_44] : memref<3x384x128xbf16, #tpu.memory_space<vmem>>, vector<1x384x128xbf16>
    %57 = vector.shape_cast %56 : vector<1x384x128xbf16> to vector<384x128xbf16>
    %cst_45 = arith.constant dense<0.000000e+00> : vector<256x128xf32>
    %58 = tpu.matmul %55, %57, %cst_45 {dimension_numbers = #tpu.dot_dimension_numbers<[1], [0], [0], [1], [0, 0, 1, 1], [], []>} : vector<256x384xbf16>, vector<384x128xbf16>, vector<256x128xf32> -> vector<256x128xf32>
    %59 = arith.addf %53, %58 : vector<256x128xf32>
    %60 = vector.extract_strided_slice %47 {offsets = [2, 0, 0], sizes = [16, 16, 384], strides = [1, 1, 1]} : vector<18x16x384xbf16> to vector<16x16x384xbf16>
    %61 = vector.shape_cast %60 : vector<16x16x384xbf16> to vector<256x384xbf16>
    %c2_46 = arith.constant 2 : index
    %c0_47 = arith.constant 0 : index
    %c0_48 = arith.constant 0 : index
    %62 = vector.load %arg4[%c2_46, %c0_47, %c0_48] : memref<3x384x128xbf16, #tpu.memory_space<vmem>>, vector<1x384x128xbf16>
    %63 = vector.shape_cast %62 : vector<1x384x128xbf16> to vector<384x128xbf16>
    %cst_49 = arith.constant dense<0.000000e+00> : vector<256x128xf32>
    %64 = tpu.matmul %61, %63, %cst_49 {dimension_numbers = #tpu.dot_dimension_numbers<[1], [0], [0], [1], [0, 0, 1, 1], [], []>} : vector<256x384xbf16>, vector<384x128xbf16>, vector<256x128xf32> -> vector<256x128xf32>
    %65 = arith.addf %59, %64 : vector<256x128xf32>
    %66 = vector.extract_strided_slice %65 {offsets = [0, 0], sizes = [256, 8], strides = [1, 1]} : vector<256x128xf32> to vector<256x8xf32>
    %c0_50 = arith.constant 0 : index
    %c0_51 = arith.constant 0 : index
    %c0_52 = arith.constant 0 : index
    %67 = vector.load %arg7[%c0_50, %c0_51, %c0_52] : memref<1x256x8xf32, #tpu.memory_space<vmem>>, vector<1x256x8xf32>
    %68 = vector.shape_cast %67 : vector<1x256x8xf32> to vector<256x8xf32>
    %69 = vector.shape_cast %66 : vector<256x8xf32> to vector<1x256x8xf32>
    tpu.vector_store %arg7[%c0_50, %c0_51, %c0_52], %69 {strides = array<i32>} : memref<1x256x8xf32, #tpu.memory_space<vmem>>, vector<1x256x8xf32>,
    return
  }
  func.func @transform_0(%arg0: i32) -> (i32, i32, i32, i32) {
    %c0_i32 = arith.constant 0 : i32
    %c0_i32_0 = arith.constant 0 : i32
    %c0_i32_1 = arith.constant 0 : i32
    %c0_i32_2 = arith.constant 0 : i32
    return %arg0, %c0_i32, %c0_i32_0, %c0_i32_1 : i32, i32, i32, i32
  }
  func.func @transform_1(%arg0: i32) -> (i32, i32, i32, i32) {
    %c0_i32 = arith.constant 0 : i32
    %c0_i32_0 = arith.constant 0 : i32
    %c0_i32_1 = arith.constant 0 : i32
    %c0_i32_2 = arith.constant 0 : i32
    return %arg0, %c0_i32, %c0_i32_0, %c0_i32_1 : i32, i32, i32, i32
  }
  func.func @transform_2(%arg0: i32) -> (i32, i32, i32, i32) {
    %c0_i32 = arith.constant 0 : i32
    %c0_i32_0 = arith.constant 0 : i32
    %c0_i32_1 = arith.constant 0 : i32
    %c0_i32_2 = arith.constant 0 : i32
    return %arg0, %c0_i32, %c0_i32_0, %c0_i32_1 : i32, i32, i32, i32
  }
  func.func @transform_3(%arg0: i32) -> (i32, i32, i32) {
    %c0_i32 = arith.constant 0 : i32
    %c0_i32_0 = arith.constant 0 : i32
    %c0_i32_1 = arith.constant 0 : i32
    %c0_i32_2 = arith.constant 0 : i32
    return %c0_i32, %c0_i32_0, %c0_i32_1 : i32, i32, i32
  }
  func.func @transform_4(%arg0: i32) -> (i32, i32, i32) {
    %c0_i32 = arith.constant 0 : i32
    %c0_i32_0 = arith.constant 0 : i32
    %c0_i32_1 = arith.constant 0 : i32
    return %arg0, %c0_i32, %c0_i32_0 : i32, i32, i32
  }
  func.func @transform_5(%arg0: i32) -> (i32, i32) {
    %c0_i32 = arith.constant 0 : i32
    %c0_i32_0 = arith.constant 0 : i32
    %c0_i32_1 = arith.constant 0 : i32
    return %c0_i32, %c0_i32_0 : i32, i32
  }
  func.func @transform_6(%arg0: i32) -> (i32, i32, i32) {
    %c0_i32 = arith.constant 0 : i32
    %c0_i32_0 = arith.constant 0 : i32
    %c0_i32_1 = arith.constant 0 : i32
    return %arg0, %c0_i32, %c0_i32_0 : i32, i32, i32
  }
}

module attributes {stable_mosaic.version = 11 : i64} {
  func.func @adain_conv3x3_kernel(%arg0: i32, %arg1: memref<1x16x16x4xf32, #tpu.memory_space<vmem>>, %arg2: memref<1x1x1x4xf32, #tpu.memory_space<vmem>>, %arg3: memref<1x1x1x4xf32, #tpu.memory_space<vmem>>, %arg4: memref<3x384x128xbf16, #tpu.memory_space<vmem>>, %arg5: memref<1x256x8xf32, #tpu.memory_space<vmem>>, %arg6: memref<18x18x128xf32, #tpu.memory_space<vmem>>) attributes {dimension_semantics = [#tpu.dimension_semantics<parallel>], iteration_bounds = array<i64: 2>, scalar_prefetch = 0 : i64, scratch_operands = 1 : i64, tpu.core_type = #tpu.core_type<tc>, window_params = [{transform_indices = @transform_0, window_bounds = array<i64: 1, 16, 16, 4>}, {transform_indices = @transform_1, window_bounds = array<i64: 1, 1, 1, 4>}, {transform_indices = @transform_2, window_bounds = array<i64: 1, 1, 1, 4>}, {pipeline_mode = #tpu.pipeline_mode<synchronous>, transform_indices = @transform_3, window_bounds = array<i64: 3, 384, 128>}, {transform_indices = @transform_4, window_bounds = array<i64: 1, 256, 8>}]} {
    %c0 = arith.constant 0 : index
    %c0_0 = arith.constant 0 : index
    %c0_1 = arith.constant 0 : index
    %c0_2 = arith.constant 0 : index
    %0 = vector.load %arg1[%c0, %c0_0, %c0_1, %c0_2] : memref<1x16x16x4xf32, #tpu.memory_space<vmem>>, vector<1x16x16x4xf32>
    %1 = vector.shape_cast %0 : vector<1x16x16x4xf32> to vector<16x16x4xf32>
    %cst = arith.constant dense<0.000000e+00> : vector<4xf32>
    %2 = vector.multi_reduction <add>, %1, %cst [0, 1] : vector<16x16x4xf32> to vector<4xf32>
    %3 = vector.shape_cast %2 : vector<4xf32> to vector<1x1x4xf32>
    %cst_3 = arith.constant 2.560000e+02 : f32
    %4 = vector.broadcast %cst_3 : f32 to vector<1x1x4xf32>
    %5 = arith.divf %3, %4 : vector<1x1x4xf32>
    %6 = vector.broadcast %5 : vector<1x1x4xf32> to vector<16x16x4xf32>
    %7 = arith.subf %1, %6 : vector<16x16x4xf32>
    %8 = arith.mulf %7, %7 : vector<16x16x4xf32>
    %cst_4 = arith.constant dense<0.000000e+00> : vector<4xf32>
    %9 = vector.multi_reduction <add>, %8, %cst_4 [0, 1] : vector<16x16x4xf32> to vector<4xf32>
    %10 = vector.shape_cast %9 : vector<4xf32> to vector<1x1x4xf32>
    %cst_5 = arith.constant 2.560000e+02 : f32
    %11 = vector.broadcast %cst_5 : f32 to vector<1x1x4xf32>
    %12 = arith.divf %10, %11 : vector<1x1x4xf32>
    %c0_6 = arith.constant 0 : index
    %c0_7 = arith.constant 0 : index
    %c0_8 = arith.constant 0 : index
    %c0_9 = arith.constant 0 : index
    %13 = vector.load %arg2[%c0_6, %c0_7, %c0_8, %c0_9] : memref<1x1x1x4xf32, #tpu.memory_space<vmem>>, vector<1x1x1x4xf32>
    %14 = vector.shape_cast %13 : vector<1x1x1x4xf32> to vector<1x1x4xf32>
    %cst_10 = arith.constant 1.000000e+00 : f32
    %15 = vector.broadcast %cst_10 : f32 to vector<1x1x4xf32>
    %16 = arith.addf %15, %14 : vector<1x1x4xf32>
    %17 = vector.broadcast %5 : vector<1x1x4xf32> to vector<16x16x4xf32>
    %18 = arith.subf %1, %17 : vector<16x16x4xf32>
    %cst_11 = arith.constant 9.99999974E-6 : f32
    %19 = vector.broadcast %cst_11 : f32 to vector<1x1x4xf32>
    %20 = arith.addf %12, %19 : vector<1x1x4xf32>
    %21 = math.rsqrt %20 : vector<1x1x4xf32>
    %22 = vector.broadcast %21 : vector<1x1x4xf32> to vector<16x16x4xf32>
    %23 = arith.mulf %18, %22 : vector<16x16x4xf32>
    %24 = vector.broadcast %16 : vector<1x1x4xf32> to vector<16x16x4xf32>
    %25 = arith.mulf %24, %23 : vector<16x16x4xf32>
    %c0_12 = arith.constant 0 : index
    %c0_13 = arith.constant 0 : index
    %c0_14 = arith.constant 0 : index
    %c0_15 = arith.constant 0 : index
    %26 = vector.load %arg3[%c0_12, %c0_13, %c0_14, %c0_15] : memref<1x1x1x4xf32, #tpu.memory_space<vmem>>, vector<1x1x1x4xf32>
    %27 = vector.shape_cast %26 : vector<1x1x1x4xf32> to vector<1x1x4xf32>
    %28 = vector.broadcast %27 : vector<1x1x4xf32> to vector<16x16x4xf32>
    %29 = arith.addf %25, %28 : vector<16x16x4xf32>
    %cst_16 = arith.constant 0.000000e+00 : f32
    %30 = vector.broadcast %cst_16 : f32 to vector<16x16x4xf32>
    %31 = arith.cmpf oge, %29, %30 : vector<16x16x4xf32>
    %cst_17 = arith.constant 2.000000e-01 : f32
    %32 = vector.broadcast %cst_17 : f32 to vector<16x16x4xf32>
    %33 = arith.mulf %32, %29 : vector<16x16x4xf32>
    %34 = arith.select %31, %29, %33 : vector<16x16x4xi1>, vector<16x16x4xf32>
    %cst_18 = arith.constant 0.000000e+00 : f32
    %35 = vector.broadcast %cst_18 : f32 to vector<18x18x128xf32>
    %c0_19 = arith.constant 0 : index
    %c0_20 = arith.constant 0 : index
    %c0_21 = arith.constant 0 : index
    %36 = vector.load %arg6[%c0_19, %c0_20, %c0_21] : memref<18x18x128xf32, #tpu.memory_space<vmem>>, vector<18x18x128xf32>
    tpu.vector_store %arg6[%c0_19, %c0_20, %c0_21], %35 {strides = array<i32>} : memref<18x18x128xf32, #tpu.memory_space<vmem>>, vector<18x18x128xf32>,
    %c1 = arith.constant 1 : index
    %c1_22 = arith.constant 1 : index
    %c0_23 = arith.constant 0 : index
    %37 = vector.load %arg6[%c1, %c1_22, %c0_23] : memref<18x18x128xf32, #tpu.memory_space<vmem>>, vector<16x16x4xf32>
    tpu.vector_store %arg6[%c1, %c1_22, %c0_23], %34 {strides = array<i32>} : memref<18x18x128xf32, #tpu.memory_space<vmem>>, vector<16x16x4xf32>,
    %c0_24 = arith.constant 0 : index
    %c0_25 = arith.constant 0 : index
    %c0_26 = arith.constant 0 : index
    %38 = vector.load %arg6[%c0_24, %c0_25, %c0_26] : memref<18x18x128xf32, #tpu.memory_space<vmem>>, vector<18x16x128xf32>
    %c0_27 = arith.constant 0 : index
    %c1_28 = arith.constant 1 : index
    %c0_29 = arith.constant 0 : index
    %39 = vector.load %arg6[%c0_27, %c1_28, %c0_29] : memref<18x18x128xf32, #tpu.memory_space<vmem>>, vector<18x16x128xf32>
    %c0_30 = arith.constant 0 : index
    %c2 = arith.constant 2 : index
    %c0_31 = arith.constant 0 : index
    %40 = vector.load %arg6[%c0_30, %c2, %c0_31] : memref<18x18x128xf32, #tpu.memory_space<vmem>>, vector<18x16x128xf32>
    %41 = tpu.concatenate %38, %39, %40 in 2 : vector<18x16x128xf32>, vector<18x16x128xf32>, vector<18x16x128xf32> -> vector<18x16x384xf32>
    %42 = arith.truncf %41 : vector<18x16x384xf32> to vector<18x16x384xbf16>
    %43 = vector.extract_strided_slice %42 {offsets = [0, 0, 0], sizes = [16, 16, 384], strides = [1, 1, 1]} : vector<18x16x384xbf16> to vector<16x16x384xbf16>
    %44 = vector.shape_cast %43 : vector<16x16x384xbf16> to vector<256x384xbf16>
    %c0_32 = arith.constant 0 : index
    %c0_33 = arith.constant 0 : index
    %c0_34 = arith.constant 0 : index
    %45 = vector.load %arg4[%c0_32, %c0_33, %c0_34] : memref<3x384x128xbf16, #tpu.memory_space<vmem>>, vector<1x384x128xbf16>
    %46 = vector.shape_cast %45 : vector<1x384x128xbf16> to vector<384x128xbf16>
    %cst_35 = arith.constant dense<0.000000e+00> : vector<256x128xf32>
    %47 = tpu.matmul %44, %46, %cst_35 {dimension_numbers = #tpu.dot_dimension_numbers<[1], [0], [0], [1], [0, 0, 1, 1], [], []>} : vector<256x384xbf16>, vector<384x128xbf16>, vector<256x128xf32> -> vector<256x128xf32>
    %48 = vector.extract_strided_slice %42 {offsets = [1, 0, 0], sizes = [16, 16, 384], strides = [1, 1, 1]} : vector<18x16x384xbf16> to vector<16x16x384xbf16>
    %49 = vector.shape_cast %48 : vector<16x16x384xbf16> to vector<256x384xbf16>
    %c1_36 = arith.constant 1 : index
    %c0_37 = arith.constant 0 : index
    %c0_38 = arith.constant 0 : index
    %50 = vector.load %arg4[%c1_36, %c0_37, %c0_38] : memref<3x384x128xbf16, #tpu.memory_space<vmem>>, vector<1x384x128xbf16>
    %51 = vector.shape_cast %50 : vector<1x384x128xbf16> to vector<384x128xbf16>
    %cst_39 = arith.constant dense<0.000000e+00> : vector<256x128xf32>
    %52 = tpu.matmul %49, %51, %cst_39 {dimension_numbers = #tpu.dot_dimension_numbers<[1], [0], [0], [1], [0, 0, 1, 1], [], []>} : vector<256x384xbf16>, vector<384x128xbf16>, vector<256x128xf32> -> vector<256x128xf32>
    %53 = arith.addf %47, %52 : vector<256x128xf32>
    %54 = vector.extract_strided_slice %42 {offsets = [2, 0, 0], sizes = [16, 16, 384], strides = [1, 1, 1]} : vector<18x16x384xbf16> to vector<16x16x384xbf16>
    %55 = vector.shape_cast %54 : vector<16x16x384xbf16> to vector<256x384xbf16>
    %c2_40 = arith.constant 2 : index
    %c0_41 = arith.constant 0 : index
    %c0_42 = arith.constant 0 : index
    %56 = vector.load %arg4[%c2_40, %c0_41, %c0_42] : memref<3x384x128xbf16, #tpu.memory_space<vmem>>, vector<1x384x128xbf16>
    %57 = vector.shape_cast %56 : vector<1x384x128xbf16> to vector<384x128xbf16>
    %cst_43 = arith.constant dense<0.000000e+00> : vector<256x128xf32>
    %58 = tpu.matmul %55, %57, %cst_43 {dimension_numbers = #tpu.dot_dimension_numbers<[1], [0], [0], [1], [0, 0, 1, 1], [], []>} : vector<256x384xbf16>, vector<384x128xbf16>, vector<256x128xf32> -> vector<256x128xf32>
    %59 = arith.addf %53, %58 : vector<256x128xf32>
    %60 = vector.extract_strided_slice %59 {offsets = [0, 0], sizes = [256, 8], strides = [1, 1]} : vector<256x128xf32> to vector<256x8xf32>
    %c0_44 = arith.constant 0 : index
    %c0_45 = arith.constant 0 : index
    %c0_46 = arith.constant 0 : index
    %61 = vector.load %arg5[%c0_44, %c0_45, %c0_46] : memref<1x256x8xf32, #tpu.memory_space<vmem>>, vector<1x256x8xf32>
    %62 = vector.shape_cast %61 : vector<1x256x8xf32> to vector<256x8xf32>
    %63 = vector.shape_cast %60 : vector<256x8xf32> to vector<1x256x8xf32>
    tpu.vector_store %arg5[%c0_44, %c0_45, %c0_46], %63 {strides = array<i32>} : memref<1x256x8xf32, #tpu.memory_space<vmem>>, vector<1x256x8xf32>,
    return
  }
  func.func @transform_0(%arg0: i32) -> (i32, i32, i32, i32) {
    %c0_i32 = arith.constant 0 : i32
    %c0_i32_0 = arith.constant 0 : i32
    %c0_i32_1 = arith.constant 0 : i32
    %c0_i32_2 = arith.constant 0 : i32
    return %arg0, %c0_i32, %c0_i32_0, %c0_i32_1 : i32, i32, i32, i32
  }
  func.func @transform_1(%arg0: i32) -> (i32, i32, i32, i32) {
    %c0_i32 = arith.constant 0 : i32
    %c0_i32_0 = arith.constant 0 : i32
    %c0_i32_1 = arith.constant 0 : i32
    %c0_i32_2 = arith.constant 0 : i32
    return %arg0, %c0_i32, %c0_i32_0, %c0_i32_1 : i32, i32, i32, i32
  }
  func.func @transform_2(%arg0: i32) -> (i32, i32, i32, i32) {
    %c0_i32 = arith.constant 0 : i32
    %c0_i32_0 = arith.constant 0 : i32
    %c0_i32_1 = arith.constant 0 : i32
    %c0_i32_2 = arith.constant 0 : i32
    return %arg0, %c0_i32, %c0_i32_0, %c0_i32_1 : i32, i32, i32, i32
  }
  func.func @transform_3(%arg0: i32) -> (i32, i32, i32) {
    %c0_i32 = arith.constant 0 : i32
    %c0_i32_0 = arith.constant 0 : i32
    %c0_i32_1 = arith.constant 0 : i32
    %c0_i32_2 = arith.constant 0 : i32
    return %c0_i32, %c0_i32_0, %c0_i32_1 : i32, i32, i32
  }
  func.func @transform_4(%arg0: i32) -> (i32, i32, i32) {
    %c0_i32 = arith.constant 0 : i32
    %c0_i32_0 = arith.constant 0 : i32
    %c0_i32_1 = arith.constant 0 : i32
    return %arg0, %c0_i32, %c0_i32_0 : i32, i32, i32
  }
}

</mosaic_0001>

<bundles_post_ra>
// kernel: adain_resblock_forward.3
= control target key start
LH: loop header
LB: loop body
LE: loop exit
PB: predicated region body
PF: predicated region fallthrough
CT: control target
= control target key end

     0   :  { %s4111_s21 = smov 0   ;;  %s5633_s0 = inlined_call_operand.vmem [shape: f32[2,16,16,8], index: 0, kind: input, shape index: {}]   ;;  %s5634_s1 = inlined_call_operand.vmem [shape: f32[2,1,1,8], index: 1, kind: input, shape index: {}]   ;;  %s5635_s2 = inlined_call_operand.vmem [shape: f32[2,1,1,8], index: 2, kind: input, shape index: {}]   ;;  %s5636_s3 = inlined_call_operand.vmem [shape: bf16[3,384,128], index: 3, kind: input, shape index: {}]   ;;  %s5637_s4 = inlined_call_operand.vmem [shape: f32[2,256,4], index: 4, kind: input, shape index: {}]   ;;  %s5638_s5 = inlined_call_operand.vmem [shape: bf16[4,128], index: 5, kind: input, shape index: {}]   ;;  %s5639_s6 = inlined_call_operand.vmem [shape: f32[2,256,8], index: 6, kind: output, shape index: {}]  }
   0x1 LB: > { %s2985_s22 = sadd.s32 4294967295, %s4072_s21   ;;  %p2989_p0 = scmp.ge.s32.totalorder %s4072_s21, 1  ;;  %s4072_s21 = sphi %s4111_s21, %s16_s21  }
   0x2   : > { %p238_p1 = scmp.lt.s32.totalorder %s4072_s21, 3 }
   0x4   : > { %p239_p2 = pnand %p2989_p0, %p238_p1 }
   0x6   : > { %242 = sbr.rel (%p239_p2) target bundleno = 759 (0x2f7), region = 44 }
   0xd   : > { %v883_v0 = vld [vmem:[%s5638_s5] sm:$0x3]  ;;  %vm1609_vm0 = vcmask 1041408   ;;  %p279_p3 = scmp.lt.s32.totalorder %s2985_s22, 1  ;;  %v3993_v4 = vld [vmem:[%s5636_s3 + $0x48] sm:$0xff]   ;;  %v4074_v5 = vmov 0.0  }
   0xe   : > { %v3991_v1 = vld [vmem:[%s5636_s3 + $0x40] sm:$0xff]   ;;  %3981 = vmatprep.subr.msk.bf16.mxu1 %vm1609_vm0, %v883_v0  ;;  %v1611_v2 = vsel %vm1609_vm0, %v883_v0, 0  ;;  %748 = vst [vmem:[#allocation2] sm:$0xff] %v4074_v5  ;;  %749 = vst [vmem:[#allocation2 + $0x8] sm:$0xff] %v4074_v5  ;;  %v3994_v6 = vld [vmem:[%s5636_s3 + $0x8] sm:$0xff]   ;;  %vm1560_vm1 = vcmask 31744  }
   0xf   : > { %v3992_v3 = vld [vmem:[%s5636_s3] sm:$0xff]   ;;  %3660 = vmatpush3.bf16.msra.mxu1 %v1611_v2  ;;  %s5671_s22 = smov (!%p279_p3, %s2985_s22), 1  ;;  %3186 = vmatprep.subr.bf16.mxu0 %v3991_v1  ;;  %750 = vst [vmem:[#allocation2 + $0x10] sm:$0x3] %v4074_v5  ;;  %751 = vst [vmem:[#allocation2 + $0x18] sm:$0xff] %v4074_v5  ;;  %v3995_v7 = vld [vmem:[%s5636_s3 + $0x50] sm:$0xff]  }
  0x10   : > { %3187 = vmatpush3.bf16.msra.mxu0 %v3992_v3  ;;  %752 = vst [vmem:[#allocation2 + $0x20] sm:$0xff] %v4074_v5  ;;  %753 = vst [vmem:[#allocation2 + $0x28] sm:$0x3] %v4074_v5  ;;  %s4134_s7 = sshll.u32 %s5671_s22, 8  ;;  %v3996_v21 = vld [vmem:[%s5636_s3 + $0x10] sm:$0xff]   ;;  %v3997_v23 = vld [vmem:[%s5636_s3 + $0x140] sm:$0xff]  }
  0x11   : > { %754 = vst [vmem:[#allocation2 + $0x30] sm:$0xff] %v4074_v5  ;;  %755 = vst [vmem:[#allocation2 + $0x38] sm:$0xff] %v4074_v5  ;;  %3188 = vmatprep.subr.bf16.mxu0 %v3993_v4  ;;  %s4143_s12 = scalar_lea.vmem %s5637_s4, %s4134_s7  ;;  %v3998_v25 = vld [vmem:[%s5636_s3 + $0x58] sm:$0xff]   ;;  %3693 = vmatprep.subr.bf16.mxu1 %v3997_v23  ;;  %v4000_v28 = vld [vmem:[%s5636_s3 + $0x148] sm:$0xff]   ;;  %s4231_s13 = scalar_lea.vmem %s5633_s0, %s4134_s7  ;;  %vm333_vm2 = vcmask 64512   ;;  %v4075_v61 = vmov 0.0|0.0  }
  0x12   : > { %756 = vst [vmem:[#allocation2 + $0x40] sm:$0x3] %v4074_v5  ;;  %757 = vst [vmem:[#allocation2 + $0x48] sm:$0xff] %v4074_v5  ;;  %v835_v8 = vld [vmem:[%s4143_s12] sm:$0xff]  ;;  %v836_v9 = vld [vmem:[%s4143_s12 + $0x8] sm:$0xff]  ;;  %s5453_s10 = scalar_lea.vmem %s5639_s6, %s4134_s7 }
  0x13   : > { %758 = vst [vmem:[#allocation2 + $0x50] sm:$0xff] %v4074_v5  ;;  %759 = vst [vmem:[#allocation2 + $0x58] sm:$0x3] %v4074_v5  ;;  %v837_v10 = vld [vmem:[%s4143_s12 + $0x10] sm:$0xff]  ;;  %v867_v11 = vpack.c.bf16 %v836_v9, %v835_v8  ;;  %v838_v12 = vld [vmem:[%s4143_s12 + $0x18] sm:$0xff] }
  0x14   : > { %760 = vst [vmem:[#allocation2 + $0x60] sm:$0xff] %v4074_v5  ;;  %761 = vst [vmem:[#allocation2 + $0x68] sm:$0xff] %v4074_v5  ;;  %3189 = vmatpush3.bf16.msra.mxu0 %v3994_v6  ;;  %v839_v13 = vld [vmem:[%s4143_s12 + $0x20] sm:$0xff]  ;;  %v840_v14 = vld [vmem:[%s4143_s12 + $0x28] sm:$0xff]  ;;  %v868_v15 = vpack.c.bf16 %v838_v12, %v837_v10 }
  0x15   : > { %762 = vst [vmem:[#allocation2 + $0x70] sm:$0x3] %v4074_v5  ;;  %763 = vst [vmem:[#allocation2 + $0x78] sm:$0xff] %v4074_v5  ;;  %3190 = vmatprep.subr.bf16.mxu0 %v3995_v7  ;;  %v869_v16 = vpack.c.bf16 %v840_v14, %v839_v13  ;;  %3661 = vmatprep.mubr.msk.bf16.mxu1 %vm1560_vm1, %v867_v11  ;;  %v841_v17 = vld [vmem:[%s4143_s12 + $0x30] sm:$0xff]  ;;  %v842_v18 = vld [vmem:[%s4143_s12 + $0x38] sm:$0xff] }
  0x16   : > { %764 = vst [vmem:[#allocation2 + $0x80] sm:$0xff] %v4074_v5  ;;  %765 = vst [vmem:[#allocation2 + $0x88] sm:$0x3] %v4074_v5  ;;  %3662 = vmatmul.mubr.msk.bf16.vlgmr.msra.gmra.mrb[0].mxu1 %vm1560_vm1, %v868_v15  ;;  %v843_v19 = vld [vmem:[%s4143_s12 + $0x40] sm:$0xff]  ;;  %v844_v20 = vld [vmem:[%s4143_s12 + $0x48] sm:$0xff]  ;;  %v870_v22 = vpack.c.bf16 %v842_v18, %v841_v17 }
  0x17   : > { %766 = vst [vmem:[#allocation2 + $0x90] sm:$0xff] %v4074_v5  ;;  %767 = vst [vmem:[#allocation2 + $0x98] sm:$0xff] %v4074_v5  ;;  %3665 = vmatprep.mubr.msk.bf16.mxu1 %vm1560_vm1, %v869_v16  ;;  %v871_v24 = vpack.c.bf16 %v844_v20, %v843_v19  ;;  %v3999_v26 = vld [vmem:[%s5636_s3 + $0x18] sm:$0xff]   ;;  %v845_v27 = vld [vmem:[%s4143_s12 + $0x50] sm:$0xff]  ;;  %3694 = vmatpush3.bf16.msra.mxu1 %v3997_v23 }
  0x18   : > { %768 = vst [vmem:[#allocation2 + $0xa0] sm:$0x3] %v4074_v5  ;;  %769 = vst [vmem:[#allocation2 + $0xa8] sm:$0xff] %v4074_v5  ;;  %3191 = vmatpush3.bf16.msra.mxu0 %v3996_v21  ;;  %v4001_v29 = vld [vmem:[%s5636_s3 + $0x60] sm:$0xff]   ;;  %v846_v30 = vld [vmem:[%s4143_s12 + $0x58] sm:$0xff]  ;;  %3695 = vmatprep.subr.bf16.mxu1 %v4000_v28 }
  0x19   : > { %770 = vst [vmem:[#allocation2 + $0xb0] sm:$0xff] %v4074_v5  ;;  %771 = vst [vmem:[#allocation2 + $0xb8] sm:$0x3] %v4074_v5  ;;  %3192 = vmatprep.subr.bf16.mxu0 %v3998_v25  ;;  %v4002_v31 = vld [vmem:[%s5636_s3 + $0x20] sm:$0xff]   ;;  %v848_v33 = vld [vmem:[%s4143_s12 + $0x68] sm:$0xff]  ;;  %v872_v35 = vpack.c.bf16 %v846_v30, %v845_v27 }
  0x1a   : > { %772 = vst [vmem:[#allocation2 + $0xc0] sm:$0xff] %v4074_v5  ;;  %773 = vst [vmem:[#allocation2 + $0xc8] sm:$0xff] %v4074_v5  ;;  %v847_v32 = vld [vmem:[%s4143_s12 + $0x60] sm:$0xff]  ;;  %v4003_v34 = vld [vmem:[%s5636_s3 + $0x150] sm:$0xff]  }
  0x1b   : > { %774 = vst [vmem:[#allocation2 + $0xd0] sm:$0x3] %v4074_v5  ;;  %775 = vst [vmem:[#allocation2 + $0xd8] sm:$0xff] %v4074_v5  ;;  %3696 = vmatpush3.bf16.msra.mxu1 %v4000_v28  ;;  %v4004_v36 = vld [vmem:[%s5636_s3 + $0x68] sm:$0xff]   ;;  %v873_v37 = vpack.c.bf16 %v848_v33, %v847_v32  ;;  %v4006_v39 = vld [vmem:[%s5636_s3 + $0x158] sm:$0xff]  }
  0x1c   : > { %776 = vst [vmem:[#allocation2 + $0xe0] sm:$0xff] %v4074_v5  ;;  %777 = vst [vmem:[#allocation2 + $0xe8] sm:$0x3] %v4074_v5  ;;  %3193 = vmatpush3.bf16.msra.mxu0 %v3999_v26  ;;  %3697 = vmatprep.subr.bf16.mxu1 %v4003_v34  ;;  %v4005_v38 = vld [vmem:[%s5636_s3 + $0x28] sm:$0xff]   ;;  %v4007_v40 = vld [vmem:[%s5636_s3 + $0x70] sm:$0xff]  }
  0x1d   : > { %778 = vst [vmem:[#allocation2 + $0xf0] sm:$0xff] %v4074_v5  ;;  %779 = vst [vmem:[#allocation2 + $0xf8] sm:$0xff] %v4074_v5  ;;  %3194 = vmatprep.subr.bf16.mxu0 %v4001_v29  ;;  %v4008_v41 = vld [vmem:[%s5636_s3 + $0x30] sm:$0xff]   ;;  %v850_v43 = vld [vmem:[%s4143_s12 + $0x78] sm:$0xff] }
  0x1e   : > { %780 = vst [vmem:[#allocation2 + $0x100] sm:$0x3] %v4074_v5  ;;  %781 = vst [vmem:[#allocation2 + $0x108] sm:$0xff] %v4074_v5  ;;  %3666 = vmatmul.mubr.msk.bf16.gmra.mrb[4].mxu1 %vm1560_vm1, %v870_v22  ;;  %v849_v42 = vld [vmem:[%s4143_s12 + $0x70] sm:$0xff]  ;;  %v851_v44 = vld [vmem:[%s4143_s12 + $0x80] sm:$0xff] }
  0x1f   : > { %782 = vst [vmem:[#allocation2 + $0x110] sm:$0xff] %v4074_v5  ;;  %783 = vst [vmem:[#allocation2 + $0x118] sm:$0x3] %v4074_v5  ;;  %3669 = vmatprep.mubr.msk.bf16.mxu1 %vm1560_vm1, %v871_v24  ;;  %3698 = vmatpush3.bf16.msra.mxu1 %v4003_v34  ;;  %v852_v45 = vld [vmem:[%s4143_s12 + $0x88] sm:$0xff]  ;;  %v4009_v46 = vld [vmem:[%s5636_s3 + $0x160] sm:$0xff]   ;;  %v874_v47 = vpack.c.bf16 %v850_v43, %v849_v42 }
  0x20   : > { %784 = vst [vmem:[#allocation2 + $0x120] sm:$0xff] %v4074_v5  ;;  %785 = vst [vmem:[#allocation2 + $0x128] sm:$0xff] %v4074_v5  ;;  %3195 = vmatpush3.bf16.msra.mxu0 %v4002_v31  ;;  %3699 = vmatprep.subr.bf16.mxu1 %v4006_v39  ;;  %v4010_v48 = vld [vmem:[%s5636_s3 + $0x78] sm:$0xff]   ;;  %v875_v49 = vpack.c.bf16 %v852_v45, %v851_v44  ;;  %v920_v51 = vld [vmem:[#allocation2 + $0x1] sm:$0xff] }
  0x21   : > { %786 = vst [vmem:[#allocation2 + $0x130] sm:$0x3] %v4074_v5  ;;  %787 = vst [vmem:[#allocation2 + $0x138] sm:$0xff] %v4074_v5  ;;  %3196 = vmatprep.subr.bf16.mxu0 %v4004_v36  ;;  %v4011_v50 = vld [vmem:[%s5636_s3 + $0x38] sm:$0xff]   ;;  %v921_v52 = vld [vmem:[#allocation2 + $0x9] sm:$0xff] }
  0x22   : > { %788 = vst [vmem:[#allocation2 + $0x140] sm:$0xff] %v4074_v5  ;;  %789 = vst [vmem:[#allocation2 + $0x148] sm:$0x3] %v4074_v5  ;;  %v993_v53 = vpack.c.bf16 %v921_v52, %v920_v51  ;;  %v4012_v54 = vld [vmem:[%s5636_s3 + $0x168] sm:$0xff]   ;;  %v4013_v55 = vld [vmem:[%s5636_s3 + $0x80] sm:$0xff]  }
  0x23   : > { %790 = vst [vmem:[#allocation2 + $0x150] sm:$0xff] %v4074_v5  ;;  %791 = vst [vmem:[#allocation2 + $0x158] sm:$0xff] %v4074_v5  ;;  %3700 = vmatpush3.bf16.msra.mxu1 %v4006_v39  ;;  %v853_v56 = vld [vmem:[%s4143_s12 + $0x90] sm:$0xff]  ;;  %v854_v57 = vld [vmem:[%s4143_s12 + $0x98] sm:$0xff] }
  0x24   : > { %792 = vst [vmem:[#allocation2 + $0x160] sm:$0x3] %v4074_v5  ;;  %793 = vst [vmem:[#allocation2 + $0x168] sm:$0xff] %v4074_v5  ;;  %3197 = vmatpush3.bf16.msra.mxu0 %v4005_v38  ;;  %3701 = vmatprep.subr.bf16.mxu1 %v4009_v46  ;;  %v855_v58 = vld [vmem:[%s4143_s12 + $0xa0] sm:$0xff]  ;;  %v856_v59 = vld [vmem:[%s4143_s12 + $0xa8] sm:$0xff]  ;;  %v876_v0 = vpack.c.bf16 %v854_v57, %v853_v56 }
  0x25   : > { %794 = vst [vmem:[#allocation2 + $0x170] sm:$0xff] %v4074_v5  ;;  %795 = vst [vmem:[#allocation2 + $0x178] sm:$0x3] %v4074_v5  ;;  %3198 = vmatprep.subr.bf16.mxu0 %v4007_v40  ;;  %1270 = vmatprep.mubr.bf16.mxu0 %v993_v53  ;;  %v4014_v60 = vld [vmem:[%s5636_s3 + $0x170] sm:$0xff]   ;;  %v4243_v62 = vld [vmem:[%s4231_s13] sm:$0xff]  ;;  %v877_v8 = vpack.c.bf16 %v856_v59, %v855_v58 }
  0x26   : > { %796 = vst [vmem:[#allocation2 + $0x180] sm:$0xff] %v4074_v5  ;;  %797 = vst [vmem:[#allocation2 + $0x188] sm:$0xff] %v4074_v5  ;;  %3670 = vmatmul.mubr.msk.bf16.gmra.mrb[8].mxu1 %vm1560_vm1, %v872_v35  ;;  %v4246_v63 = vld [vmem:[%s4231_s13 + $0x8] sm:$0xff]  ;;  %v4249_v1 = vld [vmem:[%s4143_s12 + $0xb0] sm:$0xff]  ;;  %v334_v6 = vsel %vm333_vm2, %v4243_v62, 0.0 }
  0x27   : > { %798 = vst [vmem:[#allocation2 + $0x190] sm:$0x3] %v4074_v5  ;;  %799 = vst [vmem:[#allocation2 + $0x198] sm:$0xff] %v4074_v5  ;;  %3673 = vmatprep.mubr.msk.bf16.mxu1 %vm1560_vm1, %v873_v37  ;;  %3702 = vmatpush3.bf16.msra.mxu1 %v4009_v46  ;;  %v4252_v2 = vld [vmem:[%s4143_s12 + $0xb8] sm:$0xff]  ;;  %v4258_v4 = vld [vmem:[%s4231_s13 + $0x10] sm:$0xff]  ;;  %v335_v7 = vsel %vm333_vm2, %v4246_v63, 0.0 }
  0x28   : > { %800 = vst [vmem:[#allocation2 + $0x1a0] sm:$0xff] %v4074_v5  ;;  %801 = vst [vmem:[#allocation2 + $0x1a8] sm:$0x3] %v4074_v5  ;;  %3199 = vmatpush3.bf16.msra.mxu0 %v4008_v41  ;;  %3703 = vmatprep.subr.bf16.mxu1 %v4012_v54  ;;  %v4015_v3 = vld [vmem:[%s5636_s3 + $0x178] sm:$0xff]   ;;  %v859_v9 = vld [vmem:[%s4143_s12 + $0xc0] sm:$0xff]  ;;  %v336_v12 = vadd.f32 %v335_v7, %v334_v6  ;;  %v337_v13 = vsel %vm333_vm2, %v4258_v4, 0.0  ;;  %v878_v26 = vpack.c.bf16 %v4252_v2, %v4249_v1 }
  0x29   : > { %3200 = vmatprep.subr.bf16.mxu0 %v4010_v48  ;;  %v4261_v5 = vld [vmem:[%s4231_s13 + $0x18] sm:$0xff]  ;;  %v860_v10 = vld [vmem:[%s4143_s12 + $0xc8] sm:$0xff]  ;;  %v4270_v11 = vld [vmem:[%s4231_s13 + $0x20] sm:$0xff] }
  0x2a   : > { %v4275_v14 = vld [vmem:[%s4231_s13 + $0x28] sm:$0xff]  ;;  %v4278_v15 = vld [vmem:[%s4231_s13 + $0x30] sm:$0xff]  ;;  %v4281_v16 = vld [vmem:[%s4231_s13 + $0x38] sm:$0xff]  ;;  %v339_v17 = vsel %vm333_vm2, %v4261_v5, 0.0  ;;  %v338_v21 = vadd.f32 %v337_v13, %v336_v12  ;;  %v341_v25 = vsel %vm333_vm2, %v4270_v11, 0.0  ;;  %v879_v32 = vpack.c.bf16 %v860_v10, %v859_v9 }
  0x2b   : > { %3704 = vmatpush3.bf16.msra.mxu1 %v4012_v54  ;;  %v4286_v18 = vld [vmem:[%s4231_s13 + $0x40] sm:$0xff]  ;;  %v4289_v19 = vld [vmem:[%s4231_s13 + $0x48] sm:$0xff]  ;;  %v4292_v20 = vld [vmem:[%s4231_s13 + $0x50] sm:$0xff]  ;;  %v343_v31 = vsel %vm333_vm2, %v4275_v14, 0.0  ;;  %v345_v36 = vsel %vm333_vm2, %v4278_v15, 0.0  ;;  %v347_v37 = vsel %vm333_vm2, %v4281_v16, 0.0 }
  0x2c   : > { %3201 = vmatpush3.bf16.msra.mxu0 %v4011_v50  ;;  %3705 = vmatprep.subr.bf16.mxu1 %v4014_v60  ;;  %v4296_v22 = vld [vmem:[%s4231_s13 + $0x58] sm:$0xff]  ;;  %v4299_v23 = vld [vmem:[%s4231_s13 + $0x60] sm:$0xff]  ;;  %v4302_v24 = vld [vmem:[%s4231_s13 + $0x68] sm:$0xff]  ;;  %v340_v30 = vadd.f32 %v339_v17, %v338_v21  ;;  %v349_v38 = vsel %vm333_vm2, %v4286_v18, 0.0  ;;  %v351_v43 = vsel %vm333_vm2, %v4289_v19, 0.0  ;;  %v353_v44 = vsel %vm333_vm2, %v4292_v20, 0.0 }
  0x2d   : > { %3611 = vmatprep.subr.bf16.mxu0 %v4013_v55  ;;  %v4310_v27 = vld [vmem:[%s4231_s13 + $0x70] sm:$0xff]  ;;  %v4313_v28 = vld [vmem:[%s4231_s13 + $0x78] sm:$0xff]  ;;  %v4316_v29 = vld [vmem:[%s4231_s13 + $0x80] sm:$0xff]  ;;  %v355_v45 = vsel %vm333_vm2, %v4296_v22, 0.0  ;;  %v357_v46 = vsel %vm333_vm2, %v4299_v23, 0.0 }
  0x2e   : > { %3674 = vmatmul.mubr.msk.bf16.gmra.mrb[12].mxu1 %vm1560_vm1, %v874_v47  ;;  %v4321_v33 = vld [vmem:[%s4231_s13 + $0x88] sm:$0xff]  ;;  %v4324_v34 = vld [vmem:[%s4231_s13 + $0x90] sm:$0xff]  ;;  %v4327_v35 = vld [vmem:[%s4231_s13 + $0x98] sm:$0xff]  ;;  %v342_v42 = vadd.f32 %v341_v25, %v340_v30  ;;  %v359_v47 = vsel %vm333_vm2, %v4302_v24, 0.0  ;;  %v361_v48 = vsel %vm333_vm2, %v4310_v27, 0.0  ;;  %v365_v51 = vsel %vm333_vm2, %v4316_v29, 0.0 }
  0x2f   : > { %3677 = vmatprep.mubr.msk.bf16.mxu1 %vm1560_vm1, %v875_v49  ;;  %1271 = vmatmul.mubr.bf16.vlgmr.msra.gmra.mrb[0].mxu0 %v4075_v61  ;;  %v4336_v39 = vld [vmem:[%s4231_s13 + $0xa0] sm:$0xff]  ;;  %v4339_v40 = vld [vmem:[%s4231_s13 + $0xa8] sm:$0xff]  ;;  %v4342_v41 = vld [vmem:[%s4231_s13 + $0xb0] sm:$0xff]  ;;  %v363_v49 = vsel %vm333_vm2, %v4313_v28, 0.0  ;;  %v367_v52 = vsel %vm333_vm2, %v4321_v33, 0.0  ;;  %v369_v53 = vsel %vm333_vm2, %v4324_v34, 0.0 }
  0x30   : > { %3612 = vmatpush3.bf16.msra.mxu0 %v4013_v55  ;;  %3706 = vmatpush3.bf16.msra.mxu1 %v4014_v60  ;;  %v344_v50 = vadd.f32 %v343_v31, %v342_v42  ;;  %v371_v54 = vsel %vm333_vm2, %v4327_v35, 0.0  ;;  %v373_v55 = vsel %vm333_vm2, %v4336_v39, 0.0  ;;  %v375_v56 = vsel %vm333_vm2, %v4339_v40, 0.0  ;;  %v861_v58 = vld [vmem:[%s4143_s12 + $0xd0] sm:$0xff]  ;;  %v862_v59 = vld [vmem:[%s4143_s12 + $0xd8] sm:$0xff]  ;;  %v863_v61 = vld [vmem:[%s4143_s12 + $0xe0] sm:$0xff] }
  0x31   : > { %3707 = vmatprep.subr.bf16.mxu1 %v4015_v3  ;;  %v377_v57 = vsel %vm333_vm2, %v4342_v41, 0.0  ;;  %v866_v9 = vld [vmem:[%s4143_s12 + $0xf8] sm:$0xff] }
  0x32   : > { %v346_v60 = vadd.f32 %v345_v36, %v344_v50  ;;  %v4384_v36 = vld [vmem:[%s4231_s13 + $0xb8] sm:$0xff] }
  0x34   : > { %3708 = vmatpush3.bf16.msra.mxu1 %v4015_v3  ;;  %v348_v1 = vadd.f32 %v347_v37, %v346_v60  ;;  %v880_v3 = vpack.c.bf16 %v862_v59, %v861_v58  ;;  %v4417_v60 = vld [vmem:[%s4231_s13 + $0xf0] sm:$0xff] }
  0x36   : > { %3678 = vmatmul.mubr.msk.bf16.gmra.mrb[16].mxu1 %vm1560_vm1, %v876_v0  ;;  %v864_v0 = vld [vmem:[%s4143_s12 + $0xe8] sm:$0xff]  ;;  %v350_v2 = vadd.f32 %v349_v38, %v348_v1  ;;  %v4387_v38 = vld [vmem:[%s4231_s13 + $0xc0] sm:$0xff]  ;;  %v4422_v1 = vld [vmem:[%s4231_s13 + $0xf8] sm:$0xff] }
  0x37   : > { %3681 = vmatprep.mubr.msk.bf16.mxu1 %vm1560_vm1, %v877_v8  ;;  %v881_v6 = vpack.c.bf16 %v864_v0, %v863_v61  ;;  %v865_v8 = vld [vmem:[%s4143_s12 + $0xf0] sm:$0xff]  ;;  %s289_s12 = scalar_lea.vmem %s5635_s2, %s5671_s22 }
  0x38   : > { %v352_v7 = vadd.f32 %v351_v43, %v350_v2  ;;  %v882_v17 = vpack.c.bf16 %v866_v9, %v865_v8 }
  0x3a   : > { %v354_v10 = vadd.f32 %v353_v44, %v352_v7  ;;  %v379_v44 = vsel %vm333_vm2, %v4384_v36, 0.0  ;;  %v395_v7 = vsel %vm333_vm2, %v4422_v1, 0.0 }
  0x3c   : > { %v356_v12 = vadd.f32 %v355_v45, %v354_v10  ;;  %v4392_v45 = vld [vmem:[%s4231_s13 + $0xc8] sm:$0xff] }
  0x3d   : > { %v383_v50 = vsel %vm333_vm2, %v4392_v45, 0.0 }
  0x3e   : > { %3682 = vmatmul.mubr.msk.bf16.gmra.mrb[20].mxu1 %vm1560_vm1, %v878_v26  ;;  %v358_v13 = vadd.f32 %v357_v46, %v356_v12 }
  0x3f   : > { %3685 = vmatprep.mubr.msk.bf16.mxu1 %vm1560_vm1, %v879_v32 }
  0x40   : > { %v360_v21 = vadd.f32 %v359_v47, %v358_v13  ;;  %v381_v47 = vsel %vm333_vm2, %v4387_v38, 0.0 }
  0x42   : > { %v362_v25 = vadd.f32 %v361_v48, %v360_v21  ;;  %v4397_v48 = vld [vmem:[%s4231_s13 + $0xd0] sm:$0xff] }
  0x44   : > { %v364_v26 = vadd.f32 %v363_v49, %v362_v25 }
  0x46   : > { %3686 = vmatmul.mubr.msk.bf16.gmra.mrb[24].mxu1 %vm1560_vm1, %v880_v3  ;;  %v366_v30 = vadd.f32 %v365_v51, %v364_v26  ;;  %v4402_v51 = vld [vmem:[%s4231_s13 + $0xd8] sm:$0xff]  ;;  %v393_v3 = vsel %vm333_vm2, %v4417_v60, 0.0  ;;  %v4016_v26 = vld [vmem:[%s5636_s3 + $0x88] sm:$0xff]  }
  0x47   : > { %3689 = vmatprep.mubr.msk.bf16.mxu1 %vm1560_vm1, %v881_v6  ;;  %3613 = vmatprep.subr.bf16.mxu0 %v4016_v26 }
  0x48   : > { %v368_v31 = vadd.f32 %v367_v52, %v366_v30  ;;  %3614 = vmatpush3.bf16.msra.mxu0 %v4016_v26 }
  0x4a   : > { %v370_v32 = vadd.f32 %v369_v53, %v368_v31  ;;  %v385_v53 = vsel %vm333_vm2, %v4397_v48, 0.0 }
  0x4c   : > { %v372_v37 = vadd.f32 %v371_v54, %v370_v32  ;;  %v4407_v54 = vld [vmem:[%s4231_s13 + $0xe0] sm:$0xff] }
  0x4d   : > { %v389_v59 = vsel %vm333_vm2, %v4407_v54, 0.0 }
  0x4e   : > { %3690 = vmatmul.mubr.msk.bf16.gmra.mrb[28].mxu1 %vm1560_vm1, %v882_v17  ;;  %v374_v42 = vadd.f32 %v373_v55, %v372_v37 }
  0x50   : > { %v376_v43 = vadd.f32 %v375_v56, %v374_v42  ;;  %v387_v56 = vsel %vm333_vm2, %v4402_v51, 0.0 }
  0x52   : > { %v378_v46 = vadd.f32 %v377_v57, %v376_v43  ;;  %v4412_v57 = vld [vmem:[%s4231_s13 + $0xe8] sm:$0xff]  ;;  %s286_s13 = scalar_lea.vmem %s5634_s1, %s5671_s22 }
  0x53   : > { %v391_v0 = vsel %vm333_vm2, %v4412_v57, 0.0 }
  0x54   : > { %v380_v49 = vadd.f32 %v379_v44, %v378_v46  ;;  %v4017_v46 = vld [vmem:[%s5636_s3 + $0x90] sm:$0xff]  }
  0x55   : > { %3615 = vmatprep.subr.bf16.mxu0 %v4017_v46 }
  0x56   : > { %v382_v52 = vadd.f32 %v381_v47, %v380_v49  ;;  %3616 = vmatpush3.bf16.msra.mxu0 %v4017_v46 }
  0x58   : > { %v384_v55 = vadd.f32 %v383_v50, %v382_v52 }
  0x5a   : > { %v386_v58 = vadd.f32 %v385_v53, %v384_v55 }
  0x5c   : > { %v388_v61 = vadd.f32 %v387_v56, %v386_v58 }
  0x5e   : > { %v390_v2 = vadd.f32 %v389_v59, %v388_v61 }
  0x60   : > { %v392_v6 = vadd.f32 %v391_v0, %v390_v2 }
  0x62   : > { %v394_v8 = vadd.f32 %v393_v3, %v392_v6 }
  0x64   : > { %v396_v9 = vadd.f32 %v395_v7, %v394_v8 }
  0x66   : > { %v397_v10 = vrot.slane %v396_v9, 4 }
  0x68   : > { %v398_v12 = vadd.f32 %v397_v10, %v396_v9 }
  0x6a   : > { %v399_v13 = vrot.slane %v398_v12, 2 }
  0x6c   : > { %v400_v17 = vadd.f32 %v399_v13, %v398_v12 }
  0x6e   : > { %v401_v21 = vrot.slane %v400_v17, 1 }
  0x70   : > { %v402_v25 = vadd.f32 %v401_v21, %v400_v17 }
  0x72   : > { %v4431_v30 = vmul.f32 0.00390625, %v402_v25 }
  0x74   : > { %v4435_v31 = vsub.f32 %v4243_v62, %v4431_v30  ;;  %v4439_v32 = vsub.f32 %v4246_v63, %v4431_v30  ;;  %v4443_v37 = vsub.f32 %v4258_v4, %v4431_v30  ;;  %v4447_v42 = vsub.f32 %v4261_v5, %v4431_v30 }
  0x75   : > { %v4451_v43 = vsub.f32 %v4270_v11, %v4431_v30  ;;  %v4461_v4 = vsub.f32 %v4275_v14, %v4431_v30  ;;  %v4467_v11 = vsub.f32 %v4278_v15, %v4431_v30  ;;  %v4479_v53 = vsub.f32 %v4281_v16, %v4431_v30 }
  0x76   : > { %v437_v62 = vmul.f32 %v4435_v31, %v4435_v31  ;;  %v438_v44 = vmul.f32 %v4439_v32, %v4439_v32  ;;  %v439_v63 = vmul.f32 %v4443_v37, %v4443_v37  ;;  %v440_v5 = vmul.f32 %v4447_v42, %v4447_v42 }
  0x77   : > { %v441_v47 = vmul.f32 %v4451_v43, %v4451_v43  ;;  %v442_v15 = vmul.f32 %v4461_v4, %v4461_v4  ;;  %v4486_v58 = vsub.f32 %v4286_v18, %v4431_v30  ;;  %v443_v59 = vmul.f32 %v4467_v11, %v4467_v11 }
  0x78   : > { %v469_v49 = vsel %vm333_vm2, %v437_v62, 0.0  ;;  %v470_v50 = vsel %vm333_vm2, %v438_v44, 0.0  ;;  %v472_v14 = vsel %vm333_vm2, %v439_v63, 0.0  ;;  %v474_v55 = vsel %vm333_vm2, %v440_v5, 0.0  ;;  %v4022_v63 = vld [vmem:[%s5636_s3 + $0x98] sm:$0xff]  }
  0x79   : > { %v471_v52 = vadd.f32 %v470_v50, %v469_v49  ;;  %v476_v61 = vsel %vm333_vm2, %v441_v47, 0.0  ;;  %v4493_v16 = vsub.f32 %v4289_v19, %v4431_v30  ;;  %v444_v2 = vmul.f32 %v4479_v53, %v4479_v53  ;;  %3617 = vmatprep.subr.bf16.mxu0 %v4022_v63 }
  0x7a   : > { %v478_v3 = vsel %vm333_vm2, %v442_v15, 0.0  ;;  %v4500_v18 = vsub.f32 %v4292_v20, %v4431_v30  ;;  %v445_v7 = vmul.f32 %v4486_v58, %v4486_v58  ;;  %v480_v8 = vsel %vm333_vm2, %v443_v59, 0.0  ;;  %3618 = vmatpush3.bf16.msra.mxu0 %v4022_v63 }
  0x7b   : > { %v473_v56 = vadd.f32 %v472_v14, %v471_v52  ;;  %v4507_v19 = vsub.f32 %v4296_v22, %v4431_v30  ;;  %v446_v10 = vmul.f32 %v4493_v16, %v4493_v16  ;;  %v482_v12 = vsel %vm333_vm2, %v444_v2, 0.0  ;;  %v4018_v22 = vld [vmem:[%s5636_s3 + $0x1c0] sm:$0xff]  }
  0x7c   : > { %v4514_v20 = vsub.f32 %v4299_v23, %v4431_v30  ;;  %v447_v17 = vmul.f32 %v4500_v18, %v4500_v18  ;;  %v484_v21 = vsel %vm333_vm2, %v445_v7, 0.0  ;;  %v4524_v26 = vsub.f32 %v4302_v24, %v4431_v30  ;;  %3475 = vmatprep.subr.bf16.mxu1 %v4018_v22 }
  0x7d   : > { %v475_v0 = vadd.f32 %v474_v55, %v473_v56  ;;  %v448_v62 = vmul.f32 %v4507_v19, %v4507_v19  ;;  %v486_v23 = vsel %vm333_vm2, %v446_v10, 0.0  ;;  %v4534_v5 = vsub.f32 %v4310_v27, %v4431_v30 }
  0x7e   : > { %v449_v46 = vmul.f32 %v4514_v20, %v4514_v20  ;;  %v488_v24 = vsel %vm333_vm2, %v447_v17, 0.0  ;;  %v4541_v49 = vsub.f32 %v4313_v28, %v4431_v30  ;;  %v450_v50 = vmul.f32 %v4524_v26, %v4524_v26 }
  0x7f   : > { %v477_v6 = vadd.f32 %v476_v61, %v475_v0  ;;  %v490_v14 = vsel %vm333_vm2, %v448_v62, 0.0  ;;  %v4548_v27 = vsub.f32 %v4316_v29, %v4431_v30  ;;  %v451_v15 = vmul.f32 %v4534_v5, %v4534_v5 }
  0x80   : > { %v492_v55 = vsel %vm333_vm2, %v449_v46, 0.0  ;;  %v4555_v28 = vsub.f32 %v4321_v33, %v4431_v30  ;;  %v452_v59 = vmul.f32 %v4541_v49, %v4541_v49  ;;  %v494_v61 = vsel %vm333_vm2, %v450_v50, 0.0 }
  0x81   : > { %v479_v9 = vadd.f32 %v478_v3, %v477_v6  ;;  %v4562_v29 = vsub.f32 %v4324_v34, %v4431_v30  ;;  %v453_v2 = vmul.f32 %v4548_v27, %v4548_v27  ;;  %v496_v3 = vsel %vm333_vm2, %v451_v15, 0.0 }
  0x82   : > { %v4569_v33 = vsub.f32 %v4327_v35, %v4431_v30  ;;  %v454_v7 = vmul.f32 %v4555_v28, %v4555_v28  ;;  %v4576_v34 = vsub.f32 %v4336_v39, %v4431_v30  ;;  %v4583_v35 = vsub.f32 %v4339_v40, %v4431_v30  ;;  %v4031_v39 = vld [vmem:[%s5636_s3 + $0xa0] sm:$0xff]  }
  0x83   : > { %v481_v13 = vadd.f32 %v480_v8, %v479_v9  ;;  %v498_v8 = vsel %vm333_vm2, %v452_v59, 0.0  ;;  %v455_v10 = vmul.f32 %v4562_v29, %v4562_v29  ;;  %v4593_v22 = vsub.f32 %v4342_v41, %v4431_v30  ;;  %3619 = vmatprep.subr.bf16.mxu0 %v4031_v39 }
  0x84   : > { %v456_v17 = vmul.f32 %v4569_v33, %v4569_v33  ;;  %v457_v62 = vmul.f32 %v4576_v34, %v4576_v34  ;;  %v458_v63 = vmul.f32 %v4583_v35, %v4583_v35  ;;  %3620 = vmatpush3.bf16.msra.mxu0 %v4031_v39  ;;  %v4607_v41 = vsub.f32 %v4387_v38, %v4431_v30 }
  0x85   : > { %v483_v25 = vadd.f32 %v482_v12, %v481_v13  ;;  %v500_v12 = vsel %vm333_vm2, %v453_v2, 0.0  ;;  %v504_v40 = vsel %vm333_vm2, %v455_v10, 0.0  ;;  %v4621_v38 = vsub.f32 %v4397_v48, %v4431_v30 }
  0x86   : > { %v506_v46 = vsel %vm333_vm2, %v456_v17, 0.0  ;;  %v508_v50 = vsel %vm333_vm2, %v457_v62, 0.0  ;;  %v510_v15 = vsel %vm333_vm2, %v458_v63, 0.0  ;;  %v4635_v48 = vsub.f32 %v4407_v54, %v4431_v30  ;;  %v4036_v54 = vld [vmem:[%s5636_s3 + $0xa8] sm:$0xff]  }
  0x87   : > { %v485_v44 = vadd.f32 %v484_v21, %v483_v25  ;;  %v502_v21 = vsel %vm333_vm2, %v454_v7, 0.0  ;;  %3621 = vmatprep.subr.bf16.mxu0 %v4036_v54 }
  0x88   : > { %v465_v17 = vmul.f32 %v4635_v48, %v4635_v48  ;;  %3622 = vmatpush3.bf16.msra.mxu0 %v4036_v54 }
  0x89   : > { %v487_v47 = vadd.f32 %v486_v23, %v485_v44  ;;  %v4600_v44 = vsub.f32 %v4384_v36, %v4431_v30  ;;  %v4614_v36 = vsub.f32 %v4392_v45, %v4431_v30  ;;  %v4628_v45 = vsub.f32 %v4402_v51, %v4431_v30 }
  0x8a   : > { %v4642_v51 = vsub.f32 %v4412_v57, %v4431_v30 }
  0x8b   : > { %v489_v52 = vadd.f32 %v488_v24, %v487_v47  ;;  %v459_v47 = vmul.f32 %v4593_v22, %v4593_v22 }
  0x8c   : > { %v466_v39 = vmul.f32 %v4642_v51, %v4642_v51 }
  0x8d   : > { %v491_v56 = vadd.f32 %v490_v14, %v489_v52  ;;  %v460_v52 = vmul.f32 %v4600_v44, %v4600_v44  ;;  %v512_v59 = vsel %vm333_vm2, %v459_v47, 0.0 }
  0x8f   : > { %v493_v0 = vadd.f32 %v492_v55, %v491_v56  ;;  %v461_v56 = vmul.f32 %v4607_v41, %v4607_v41  ;;  %v514_v2 = vsel %vm333_vm2, %v460_v52, 0.0 }
  0x91   : > { %v495_v6 = vadd.f32 %v494_v61, %v493_v0  ;;  %v462_v0 = vmul.f32 %v4614_v36, %v4614_v36  ;;  %v516_v7 = vsel %vm333_vm2, %v461_v56, 0.0 }
  0x93   : > { %v497_v9 = vadd.f32 %v496_v3, %v495_v6  ;;  %v463_v6 = vmul.f32 %v4621_v38, %v4621_v38  ;;  %v518_v10 = vsel %vm333_vm2, %v462_v0, 0.0 }
  0x95   : > { %v499_v13 = vadd.f32 %v498_v8, %v497_v9  ;;  %v464_v9 = vmul.f32 %v4628_v45, %v4628_v45  ;;  %v520_v57 = vsel %vm333_vm2, %v463_v6, 0.0  ;;  %v576_v6 = vlaneseq }
  0x97   : > { %v501_v25 = vadd.f32 %v500_v12, %v499_v13  ;;  %v4652_v13 = vsub.f32 %v4417_v60, %v4431_v30  ;;  %v522_v62 = vsel %vm333_vm2, %v464_v9, 0.0  ;;  %v577_v9 = vshrl.u32 %v576_v6, 7 }
  0x99   : > { %v503_v23 = vadd.f32 %v502_v21, %v501_v25  ;;  %v4659_v25 = vsub.f32 %v4422_v1, %v4431_v30  ;;  %v467_v60 = vmul.f32 %v4652_v13, %v4652_v13  ;;  %v578_v54 = vsub.s32 0, %v577_v9 }
  0x9b   : > { %v505_v24 = vadd.f32 %v504_v40, %v503_v23  ;;  %v524_v23 = vsel %vm333_vm2, %v465_v17, 0.0  ;;  %v528_v30 = vsel %vm333_vm2, %v467_v60, 0.0  ;;  %v4698_v60 = vld [vmem:[%s289_s12] ss:$0 sm:$0xff] }
  0x9d   : > { %v507_v14 = vadd.f32 %v506_v46, %v505_v24  ;;  %v468_v46 = vmul.f32 %v4659_v25, %v4659_v25  ;;  %v526_v24 = vsel %vm333_vm2, %v466_v39, 0.0 }
  0x9f   : > { %v509_v55 = vadd.f32 %v508_v50, %v507_v14  ;;  %v530_v50 = vsel %vm333_vm2, %v468_v46, 0.0 }
  0xa1   : > { %v511_v61 = vadd.f32 %v510_v15, %v509_v55  ;;  %v4037_v55 = vld [vmem:[%s5636_s3 + $0xb0] sm:$0xff]  }
  0xa2   : > { %3623 = vmatprep.subr.bf16.mxu0 %v4037_v55 }
  0xa3   : > { %v513_v3 = vadd.f32 %v512_v59, %v511_v61  ;;  %3624 = vmatpush3.bf16.msra.mxu0 %v4037_v55 }
  0xa5   : > { %v515_v8 = vadd.f32 %v514_v2, %v513_v3 }
  0xa7   : > { %v517_v12 = vadd.f32 %v516_v7, %v515_v8  ;;  %v4038_v8 = vld [vmem:[%s5636_s3 + $0xb8] sm:$0xff]  }
  0xa8   : > { %3625 = vmatprep.subr.bf16.mxu0 %v4038_v8 }
  0xa9   : > { %v519_v21 = vadd.f32 %v518_v10, %v517_v12  ;;  %v539_v10 = vld [vmem:[%s286_s13] sm:$0x1]  ;;  %3626 = vmatpush3.bf16.msra.mxu0 %v4038_v8 }
  0xaa   : > { %v540_v12 = vadd.f32 1.0, %v539_v10 }
  0xab   : > { %v521_v40 = vadd.f32 %v520_v57, %v519_v21 }
  0xac   : > { %v4686_v17 = vrot.slane %v540_v12, %v578_v54 }
  0xad   : > { %v523_v63 = vadd.f32 %v522_v62, %v521_v40 }
  0xaf   : > { %v525_v1 = vadd.f32 %v524_v23, %v523_v63 }
  0xb1   : > { %v527_v47 = vadd.f32 %v526_v24, %v525_v1 }
  0xb3   : > { %v529_v14 = vadd.f32 %v528_v30, %v527_v47 }
  0xb5   : > { %v531_v52 = vadd.f32 %v530_v50, %v529_v14 }
  0xb7   : > { %v532_v15 = vrot.slane %v531_v52, 4 }
  0xb9   : > { %v533_v56 = vadd.f32 %v532_v15, %v531_v52 }
  0xbb   : > { %v534_v59 = vrot.slane %v533_v56, 2 }
  0xbd   : > { %v535_v61 = vadd.f32 %v534_v59, %v533_v56  ;;  %v4039_v56 = vld [vmem:[%s5636_s3 + $0x100] sm:$0xff]  }
  0xbe   : > { %3339 = vmatprep.subr.bf16.mxu0 %v4039_v56  ;;  %v4019_v56 = vld [vmem:[%s5636_s3 + $0x180] sm:$0xff]  }
  0xbf   : > { %v536_v0 = vrot.slane %v535_v61, 1 }
  0xc1   : > { %v537_v2 = vadd.f32 %v536_v0, %v535_v61 }
  0xc3   : > { %v538_v3 = vmul.f32 0.00390625, %v537_v2 }
  0xc5   : > { %v541_v7 = vadd.f32 1e-05, %v538_v3 }
  0xc7   : > { %4063 = vrsqrt.f32 %v541_v7 }
  0xd1   : > { %v4688_v57 = vpop.eup %4063 }
  0xd2   : > { %v543_v21 = vmul.f32 %v4688_v57, %v4435_v31  ;;  %v544_v39 = vmul.f32 %v4688_v57, %v4439_v32  ;;  %v545_v62 = vmul.f32 %v4688_v57, %v4443_v37  ;;  %v546_v40 = vmul.f32 %v4688_v57, %v4447_v42 }
  0xd3   : > { %v547_v23 = vmul.f32 %v4688_v57, %v4451_v43  ;;  %v548_v63 = vmul.f32 %v4688_v57, %v4461_v4  ;;  %v549_v31 = vmul.f32 %v4688_v57, %v4467_v11  ;;  %v550_v32 = vmul.f32 %v4688_v57, %v4479_v53 }
  0xd4   : > { %v581_v46 = vmul.f32 %v4686_v17, %v543_v21  ;;  %v582_v37 = vmul.f32 %v4686_v17, %v544_v39  ;;  %v583_v42 = vmul.f32 %v4686_v17, %v545_v62  ;;  %v584_v24 = vmul.f32 %v4686_v17, %v546_v40 }
  0xd5   : > { %v585_v1 = vmul.f32 %v4686_v17, %v547_v23  ;;  %v586_v43 = vmul.f32 %v4686_v17, %v548_v63  ;;  %v587_v4 = vmul.f32 %v4686_v17, %v549_v31  ;;  %v588_v30 = vmul.f32 %v4686_v17, %v550_v32 }
  0xd6   : > { %v620_v11 = vadd.f32 %v4698_v60, %v581_v46  ;;  %v621_v53 = vadd.f32 %v4698_v60, %v582_v37  ;;  %v622_v47 = vadd.f32 %v4698_v60, %v583_v42  ;;  %v623_v50 = vadd.f32 %v4698_v60, %v584_v24 }
  0xd7   : > { %v624_v14 = vadd.f32 %v4698_v60, %v585_v1  ;;  %v625_v52 = vadd.f32 %v4698_v60, %v586_v43  ;;  %v626_v15 = vadd.f32 %v4698_v60, %v587_v4  ;;  %v627_v55 = vadd.f32 %v4698_v60, %v588_v30 }
  0xd8   : > { %vm652_vm3 = vcmp.ge.f32.partialorder %v620_v11, 0.0  ;;  %vm653_vm4 = vcmp.ge.f32.partialorder %v621_v53, 0.0  ;;  %v684_v59 = vmul.f32 0.2, %v620_v11  ;;  %v685_v61 = vmul.f32 0.2, %v621_v53 }
  0xd9   : > { %vm654_vm5 = vcmp.ge.f32.partialorder %v622_v47, 0.0  ;;  %vm655_vm6 = vcmp.ge.f32.partialorder %v623_v50, 0.0  ;;  %v686_v0 = vmul.f32 0.2, %v622_v47  ;;  %v687_v2 = vmul.f32 0.2, %v623_v50 }
  0xda   : > { %v716_v3 = vsel %vm652_vm3, %v620_v11, %v684_v59  ;;  %v717_v6 = vsel %vm653_vm4, %v621_v53, %v685_v61  ;;  %vm656_vm7 = vcmp.ge.f32.partialorder %v624_v14, 0.0  ;;  %vm657_vm8 = vcmp.ge.f32.partialorder %v625_v52, 0.0 }
  0xdb   : > { %803 = vst.msk [vmem:[#allocation2 + $0x19] sm:$0xff] %vm333_vm2, %v716_v3  ;;  %804 = vst.msk [vmem:[#allocation2 + $0x21] sm:$0xff] %vm333_vm2, %v717_v6  ;;  %v718_v7 = vsel %vm654_vm5, %v622_v47, %v686_v0  ;;  %v719_v8 = vsel %vm655_vm6, %v623_v50, %v687_v2  ;;  %v688_v9 = vmul.f32 0.2, %v624_v14  ;;  %v689_v10 = vmul.f32 0.2, %v625_v52 }
  0xdc   : > { %805 = vst.msk [vmem:[#allocation2 + $0x31] sm:$0xff] %vm333_vm2, %v718_v7  ;;  %806 = vst.msk [vmem:[#allocation2 + $0x39] sm:$0xff] %vm333_vm2, %v719_v8  ;;  %vm658_vm9 = vcmp.ge.f32.partialorder %v626_v15, 0.0  ;;  %vm659_vm10 = vcmp.ge.f32.partialorder %v627_v55, 0.0  ;;  %v690_v12 = vmul.f32 0.2, %v626_v15  ;;  %v551_v62 = vmul.f32 %v4688_v57, %v4486_v58 }
  0xdd   : > { %v691_v54 = vmul.f32 0.2, %v627_v55  ;;  %v720_v21 = vsel %vm656_vm7, %v624_v14, %v688_v9  ;;  %v721_v39 = vsel %vm657_vm8, %v625_v52, %v689_v10  ;;  %v552_v40 = vmul.f32 %v4688_v57, %v4493_v16 }
  0xde   : > { %807 = vst.msk [vmem:[#allocation2 + $0x49] sm:$0xff] %vm333_vm2, %v720_v21  ;;  %808 = vst.msk [vmem:[#allocation2 + $0x51] sm:$0xff] %vm333_vm2, %v721_v39  ;;  %v722_v23 = vsel %vm658_vm9, %v626_v15, %v690_v12  ;;  %v553_v31 = vmul.f32 %v4688_v57, %v4500_v18  ;;  %v554_v32 = vmul.f32 %v4688_v57, %v4507_v19 }
  0xdf   : > { %v723_v63 = vsel %vm659_vm10, %v627_v55, %v691_v54  ;;  %809 = vst.msk [vmem:[#allocation2 + $0x61] sm:$0xff] %vm333_vm2, %v722_v23  ;;  %v589_v58 = vmul.f32 %v4686_v17, %v551_v62  ;;  %v590_v16 = vmul.f32 %v4686_v17, %v552_v40  ;;  %v555_v46 = vmul.f32 %v4688_v57, %v4514_v20 }
  0xe0   : > { %810 = vst.msk [vmem:[#allocation2 + $0x69] sm:$0xff] %vm333_vm2, %v723_v63  ;;  %v556_v37 = vmul.f32 %v4688_v57, %v4524_v26  ;;  %v591_v42 = vmul.f32 %v4686_v17, %v553_v31  ;;  %v592_v18 = vmul.f32 %v4686_v17, %v554_v32  ;;  %v557_v19 = vmul.f32 %v4688_v57, %v4534_v5  ;;  %v4020_v31 = vld [vmem:[%s5636_s3 + $0x1c8] sm:$0xff]  }
  0xe1   : > { %v558_v24 = vmul.f32 %v4688_v57, %v4541_v49  ;;  %v628_v1 = vadd.f32 %v4698_v60, %v589_v58  ;;  %v629_v43 = vadd.f32 %v4698_v60, %v590_v16  ;;  %v593_v4 = vmul.f32 %v4686_v17, %v555_v46 }
  0xe2   : > { %v594_v20 = vmul.f32 %v4686_v17, %v556_v37  ;;  %v922_v30 = vld [vmem:[#allocation2 + $0x19] sm:$0xff]  ;;  %v923_v26 = vld [vmem:[#allocation2 + $0x21] sm:$0xff]  ;;  %v630_v53 = vadd.f32 %v4698_v60, %v591_v42  ;;  %v631_v47 = vadd.f32 %v4698_v60, %v592_v18  ;;  %v595_v5 = vmul.f32 %v4686_v17, %v557_v19 }
  0xe3   : > { %v958_v11 = vld [vmem:[#allocation2 + $0x1a] sm:$0xff]  ;;  %v596_v50 = vmul.f32 %v4686_v17, %v558_v24  ;;  %v4763_v49 = vpack.c.bf16 %v923_v26, %v922_v30  ;;  %v959_v14 = vld [vmem:[#allocation2 + $0x22] sm:$0xff]  ;;  %vm660_vm11 = vcmp.ge.f32.partialorder %v628_v1, 0.0  ;;  %vm661_vm12 = vcmp.ge.f32.partialorder %v629_v43, 0.0  ;;  %v960_v0 = vld [vmem:[#allocation2 + $0x32] sm:$0xff] }
  0xe4   : > { %v886_v52 = vld [vmem:[#allocation2 + $0x18] sm:$0xff]  ;;  %v887_v15 = vld [vmem:[#allocation2 + $0x20] sm:$0xff]  ;;  %v632_v55 = vadd.f32 %v4698_v60, %v593_v4  ;;  %v4769_v59 = vpack.c.bf16 %v959_v14, %v958_v11  ;;  %v692_v6 = vmul.f32 0.2, %v628_v1  ;;  %vm662_vm13 = vcmp.ge.f32.partialorder %v630_v53, 0.0  ;;  %v888_v62 = vld [vmem:[#allocation2 + $0x30] sm:$0xff] }
  0xe5   : > { %v4771_v61 = vpack.c.bf16 %v887_v15, %v886_v52  ;;  %v961_v2 = vld [vmem:[#allocation2 + $0x3a] sm:$0xff]  ;;  %v924_v3 = vld [vmem:[#allocation2 + $0x31] sm:$0xff]  ;;  %1278 = vmatprep.mubr.bf16.mxu0 %v4763_v49  ;;  %v693_v12 = vmul.f32 0.2, %v629_v43  ;;  %vm663_vm14 = vcmp.ge.f32.partialorder %v631_v47, 0.0  ;;  %v633_v54 = vadd.f32 %v4698_v60, %v594_v20  ;;  %v926_v37 = vld [vmem:[#allocation2 + $0x49] sm:$0xff] }
  0xe6   : > { %v4774_v7 = vpack.c.bf16 %v961_v2, %v960_v0  ;;  %v925_v8 = vld [vmem:[#allocation2 + $0x39] sm:$0xff]  ;;  %v962_v9 = vld [vmem:[#allocation2 + $0x4a] sm:$0xff]  ;;  %3709 = vmatprep.mubr.bf16.mxu1 %v4769_v59  ;;  %v724_v23 = vsel %vm660_vm11, %v628_v1, %v692_v6  ;;  %v694_v63 = vmul.f32 0.2, %v630_v53  ;;  %v695_v46 = vmul.f32 0.2, %v631_v47 }
  0xe7   : > { %v963_v10 = vld [vmem:[#allocation2 + $0x52] sm:$0xff]  ;;  %1279 = vmatmul.mubr.bf16.gmra.mrb[4].mxu0 %v4771_v61  ;;  %v4779_v21 = vpack.c.bf16 %v925_v8, %v924_v3  ;;  %v964_v32 = vld [vmem:[#allocation2 + $0x62] sm:$0xff]  ;;  %v965_v58 = vld [vmem:[#allocation2 + $0x6a] sm:$0xff]  ;;  %v725_v16 = vsel %vm661_vm12, %v629_v43, %v693_v12  ;;  %811 = vst.msk [vmem:[#allocation2 + $0x79] sm:$0xff] %vm333_vm2, %v724_v23  ;;  %vm664_vm15 = vcmp.ge.f32.partialorder %v632_v55, 0.0  ;;  %vm665_vm0 = vcmp.ge.f32.partialorder %v633_v54, 0.0 }
  0xe8   : > { %v4781_v39 = vpack.c.bf16 %v963_v10, %v962_v9  ;;  %v889_v40 = vld [vmem:[#allocation2 + $0x38] sm:$0xff]  ;;  %3710 = vmatmul.mubr.bf16.vlgmr.msra.gmra.mrb[0].mxu1 %v4774_v7  ;;  %812 = vst.msk [vmem:[#allocation2 + $0x81] sm:$0xff] %vm333_vm2, %v725_v16  ;;  %v726_v18 = vsel %vm662_vm13, %v630_v53, %v694_v63  ;;  %v727_v24 = vsel %vm663_vm14, %v631_v47, %v695_v46  ;;  %v696_v1 = vmul.f32 0.2, %v632_v55  ;;  %v4021_v4 = vld [vmem:[%s5636_s3 + $0x188] sm:$0xff]   ;;  %v4023_v15 = vld [vmem:[%s5636_s3 + $0x1d0] sm:$0xff]  }
  0xe9   : > { %1286 = vmatprep.mubr.bf16.mxu0 %v4779_v21  ;;  %v927_v42 = vld [vmem:[#allocation2 + $0x51] sm:$0xff]  ;;  %v4794_v19 = vpack.c.bf16 %v889_v40, %v888_v62  ;;  %813 = vst.msk [vmem:[#allocation2 + $0x91] sm:$0xff] %vm333_vm2, %v726_v18  ;;  %v697_v43 = vmul.f32 0.2, %v633_v54  ;;  %3476 = vmatpush3.bf16.msra.mxu1 %v4019_v56  ;;  %v4801_v20 = vpack.c.bf16 %v965_v58, %v964_v32  ;;  %814 = vst.msk [vmem:[#allocation2 + $0x99] sm:$0xff] %vm333_vm2, %v727_v24  ;;  %v890_v3 = vld [vmem:[#allocation2 + $0x48] sm:$0xff] }
  0xea   : > { %3713 = vmatprep.mubr.bf16.mxu1 %v4781_v39  ;;  %v634_v30 = vadd.f32 %v4698_v60, %v595_v5  ;;  %v635_v26 = vadd.f32 %v4698_v60, %v596_v50  ;;  %v559_v11 = vmul.f32 %v4688_v57, %v4548_v27  ;;  %3477 = vmatprep.subr.bf16.mxu1 %v4020_v31  ;;  %v4024_v0 = vld [vmem:[%s5636_s3 + $0x190] sm:$0xff]   ;;  %v4025_v2 = vld [vmem:[%s5636_s3 + $0x1d8] sm:$0xff]   ;;  %v928_v8 = vld [vmem:[#allocation2 + $0x61] sm:$0xff] }
  0xeb   : > { %v4808_v53 = vpack.c.bf16 %v927_v42, %v926_v37  ;;  %v728_v47 = vsel %vm664_vm15, %v632_v55, %v696_v1  ;;  %v729_v14 = vsel %vm665_vm0, %v633_v54, %v697_v43  ;;  %v560_v52 = vmul.f32 %v4688_v57, %v4555_v28  ;;  %v891_v6 = vld [vmem:[#allocation2 + $0x50] sm:$0xff]  ;;  %v4026_v32 = vld [vmem:[%s5636_s3 + $0x198] sm:$0xff]   ;;  %v4027_v43 = vld [vmem:[%s5636_s3 + $0x1e0] sm:$0xff]  }
  0xec   : > { %815 = vst.msk [vmem:[#allocation2 + $0xa9] sm:$0xff] %vm333_vm2, %v728_v47  ;;  %816 = vst.msk [vmem:[#allocation2 + $0xb1] sm:$0xff] %vm333_vm2, %v729_v14  ;;  %vm666_vm1 = vcmp.ge.f32.partialorder %v634_v30, 0.0  ;;  %vm667_vm3 = vcmp.ge.f32.partialorder %v635_v26, 0.0  ;;  %v698_v27 = vmul.f32 0.2, %v634_v30  ;;  %v597_v50 = vmul.f32 %v4686_v17, %v559_v11 }
  0xed   : > { %v699_v5 = vmul.f32 0.2, %v635_v26  ;;  %v598_v55 = vmul.f32 %v4686_v17, %v560_v52  ;;  %v561_v56 = vmul.f32 %v4688_v57, %v4562_v29  ;;  %v562_v28 = vmul.f32 %v4688_v57, %v4569_v33  ;;  %3478 = vmatpush3.bf16.msra.mxu1 %v4021_v4  ;;  %v929_v62 = vld [vmem:[#allocation2 + $0x69] sm:$0xff] }
  0xee   : > { %v730_v9 = vsel %vm666_vm1, %v634_v30, %v698_v27  ;;  %v563_v29 = vmul.f32 %v4688_v57, %v4576_v34  ;;  %v564_v33 = vmul.f32 %v4688_v57, %v4583_v35  ;;  %v636_v40 = vadd.f32 %v4698_v60, %v597_v50  ;;  %3479 = vmatprep.subr.bf16.mxu1 %v4023_v15  ;;  %v4028_v27 = vld [vmem:[%s5636_s3 + $0x1a0] sm:$0xff]  }
  0xef   : > { %1287 = vmatmul.mubr.bf16.gmra.mrb[8].mxu0 %v4794_v19  ;;  %v731_v10 = vsel %vm667_vm3, %v635_v26, %v699_v5  ;;  %v966_v12 = vld [vmem:[#allocation2 + $0x7a] sm:$0xff]  ;;  %v967_v54 = vld [vmem:[#allocation2 + $0x82] sm:$0xff]  ;;  %817 = vst.msk [vmem:[#allocation2 + $0xc1] sm:$0xff] %vm333_vm2, %v730_v9  ;;  %v637_v23 = vadd.f32 %v4698_v60, %v598_v55  ;;  %v599_v34 = vmul.f32 %v4686_v17, %v561_v56 }
  0xf0   : > { %3714 = vmatmul.mubr.bf16.gmra.mrb[4].mxu1 %v4801_v20  ;;  %1294 = vmatprep.mubr.bf16.mxu0 %v4808_v53  ;;  %818 = vst.msk [vmem:[#allocation2 + $0xc9] sm:$0xff] %vm333_vm2, %v731_v10  ;;  %v4843_v63 = vpack.c.bf16 %v967_v54, %v966_v12  ;;  %v600_v35 = vmul.f32 %v4686_v17, %v562_v28  ;;  %v968_v16 = vld [vmem:[#allocation2 + $0x92] sm:$0xff]  ;;  %v969_v46 = vld [vmem:[#allocation2 + $0x9a] sm:$0xff]  ;;  %vm668_vm4 = vcmp.ge.f32.partialorder %v636_v40, 0.0  ;;  %v700_v37 = vmul.f32 0.2, %v636_v40 }
  0xf1   : > { %v601_v31 = vmul.f32 %v4686_v17, %v563_v29  ;;  %v4850_v58 = vpack.c.bf16 %v891_v6, %v890_v3  ;;  %vm669_vm5 = vcmp.ge.f32.partialorder %v637_v23, 0.0  ;;  %3480 = vmatpush3.bf16.msra.mxu1 %v4024_v0  ;;  %v4853_v42 = vpack.c.bf16 %v929_v62, %v928_v8  ;;  %v4029_v5 = vld [vmem:[%s5636_s3 + $0x1e8] sm:$0xff]   ;;  %v892_v50 = vld [vmem:[#allocation2 + $0x60] sm:$0xff] }
  0xf2   : > { %3717 = vmatprep.mubr.bf16.mxu1 %v4843_v63  ;;  %v701_v18 = vmul.f32 0.2, %v637_v23  ;;  %v638_v24 = vadd.f32 %v4698_v60, %v599_v34  ;;  %v639_v1 = vadd.f32 %v4698_v60, %v600_v35  ;;  %3481 = vmatprep.subr.bf16.mxu1 %v4025_v2  ;;  %v4860_v4 = vpack.c.bf16 %v969_v46, %v968_v16  ;;  %v893_v0 = vld [vmem:[#allocation2 + $0x68] sm:$0xff]  ;;  %v930_v2 = vld [vmem:[#allocation2 + $0x79] sm:$0xff] }
  0xf3   : > { %v970_v30 = vld [vmem:[#allocation2 + $0xaa] sm:$0xff]  ;;  %v971_v26 = vld [vmem:[#allocation2 + $0xb2] sm:$0xff]  ;;  %v732_v11 = vsel %vm668_vm4, %v636_v40, %v700_v37  ;;  %v602_v47 = vmul.f32 %v4686_v17, %v564_v33  ;;  %v640_v14 = vadd.f32 %v4698_v60, %v601_v31  ;;  %v931_v3 = vld [vmem:[#allocation2 + $0x81] sm:$0xff]  ;;  %v565_v8 = vmul.f32 %v4688_v57, %v4593_v22 }
  0xf4   : > { %v4864_v52 = vpack.c.bf16 %v971_v26, %v970_v30  ;;  %v733_v15 = vsel %vm669_vm5, %v637_v23, %v701_v18  ;;  %819 = vst.msk [vmem:[#allocation2 + $0xd9] sm:$0xff] %vm333_vm2, %v732_v11  ;;  %vm670_vm6 = vcmp.ge.f32.partialorder %v638_v24, 0.0  ;;  %vm671_vm7 = vcmp.ge.f32.partialorder %v639_v1, 0.0  ;;  %v4030_v31 = vld [vmem:[%s5636_s3 + $0x1a8] sm:$0xff]  }
  0xf5   : > { %820 = vst.msk [vmem:[#allocation2 + $0xe1] sm:$0xff] %vm333_vm2, %v733_v15  ;;  %v702_v55 = vmul.f32 0.2, %v638_v24  ;;  %v703_v56 = vmul.f32 0.2, %v639_v1  ;;  %v641_v28 = vadd.f32 %v4698_v60, %v602_v47  ;;  %vm672_vm8 = vcmp.ge.f32.partialorder %v640_v14, 0.0  ;;  %3482 = vmatpush3.bf16.msra.mxu1 %v4026_v32 }
  0xf6   : > { %v704_v6 = vmul.f32 0.2, %v640_v14  ;;  %v566_v9 = vmul.f32 %v4688_v57, %v4600_v44  ;;  %3483 = vmatprep.subr.bf16.mxu1 %v4027_v43  ;;  %v603_v54 = vmul.f32 %v4686_v17, %v565_v8  ;;  %v4891_v40 = vpack.c.bf16 %v893_v0, %v892_v50  ;;  %v894_v47 = vld [vmem:[#allocation2 + $0x78] sm:$0xff] }
  0xf7   : > { %1295 = vmatmul.mubr.bf16.gmra.mrb[12].mxu0 %v4850_v58  ;;  %v734_v10 = vsel %vm670_vm6, %v638_v24, %v702_v55  ;;  %v735_v29 = vsel %vm671_vm7, %v639_v1, %v703_v56  ;;  %vm673_vm9 = vcmp.ge.f32.partialorder %v641_v28, 0.0  ;;  %v972_v33 = vld [vmem:[#allocation2 + $0xc2] sm:$0xff]  ;;  %v973_v12 = vld [vmem:[#allocation2 + $0xca] sm:$0xff]  ;;  %v705_v22 = vmul.f32 0.2, %v641_v28  ;;  %v4034_v0 = vld [vmem:[%s5636_s3 + $0x1f8] sm:$0xff]  }
  0xf8   : > { %3718 = vmatmul.mubr.bf16.gmra.mrb[8].mxu1 %v4860_v4  ;;  %1302 = vmatprep.mubr.bf16.mxu0 %v4853_v42  ;;  %821 = vst.msk [vmem:[#allocation2 + $0xf1] sm:$0xff] %vm333_vm2, %v734_v10  ;;  %822 = vst.msk [vmem:[#allocation2 + $0xf9] sm:$0xff] %vm333_vm2, %v735_v29  ;;  %v736_v44 = vsel %vm672_vm8, %v640_v14, %v704_v6  ;;  %v604_v62 = vmul.f32 %v4686_v17, %v566_v9  ;;  %v4032_v1 = vld [vmem:[%s5636_s3 + $0x1f0] sm:$0xff]   ;;  %v895_v14 = vld [vmem:[#allocation2 + $0x80] sm:$0xff] }
  0xf9   : > { %3721 = vmatprep.mubr.bf16.mxu1 %v4864_v52  ;;  %v4893_v23 = vpack.c.bf16 %v931_v3, %v930_v2  ;;  %823 = vst.msk [vmem:[#allocation2 + $0x109] sm:$0xff] %vm333_vm2, %v736_v44  ;;  %v567_v34 = vmul.f32 %v4688_v57, %v4607_v41  ;;  %v568_v35 = vmul.f32 %v4688_v57, %v4614_v36  ;;  %v932_v2 = vld [vmem:[#allocation2 + $0x91] sm:$0xff]  ;;  %v933_v3 = vld [vmem:[#allocation2 + $0x99] sm:$0xff] }
  0xfa   : > { %3484 = vmatpush3.bf16.msra.mxu1 %v4028_v27  ;;  %v737_v32 = vsel %vm673_vm9, %v641_v28, %v705_v22  ;;  %v642_v16 = vadd.f32 %v4698_v60, %v603_v54  ;;  %v643_v46 = vadd.f32 %v4698_v60, %v604_v62  ;;  %v569_v37 = vmul.f32 %v4688_v57, %v4621_v38  ;;  %v4035_v62 = vld [vmem:[%s5636_s3 + $0x1b8] sm:$0xff]  }
  0xfb   : > { %3485 = vmatprep.subr.bf16.mxu1 %v4029_v5  ;;  %v4908_v18 = vpack.c.bf16 %v973_v12, %v972_v33  ;;  %824 = vst.msk [vmem:[#allocation2 + $0x111] sm:$0xff] %vm333_vm2, %v737_v32  ;;  %v605_v41 = vmul.f32 %v4686_v17, %v567_v34  ;;  %v606_v36 = vmul.f32 %v4686_v17, %v568_v35  ;;  %v4033_v5 = vld [vmem:[%s5636_s3 + $0x1b0] sm:$0xff]  }
  0xfc   : > { %v570_v24 = vmul.f32 %v4688_v57, %v4628_v45  ;;  %v974_v43 = vld [vmem:[#allocation2 + $0xda] sm:$0xff]  ;;  %v975_v30 = vld [vmem:[#allocation2 + $0xe2] sm:$0xff]  ;;  %vm674_vm10 = vcmp.ge.f32.partialorder %v642_v16, 0.0  ;;  %vm675_vm11 = vcmp.ge.f32.partialorder %v643_v46, 0.0  ;;  %v706_v38 = vmul.f32 0.2, %v642_v16 }
  0xfd   : > { %v607_v26 = vmul.f32 %v4686_v17, %v569_v37  ;;  %v4919_v11 = vpack.c.bf16 %v975_v30, %v974_v43  ;;  %v707_v15 = vmul.f32 0.2, %v643_v46  ;;  %v644_v27 = vadd.f32 %v4698_v60, %v605_v41 }
  0xfe   : > { %v645_v45 = vadd.f32 %v4698_v60, %v606_v36  ;;  %3486 = vmatpush3.bf16.msra.mxu1 %v4030_v31  ;;  %v738_v50 = vsel %vm674_vm10, %v642_v16, %v706_v38  ;;  %v608_v55 = vmul.f32 %v4686_v17, %v570_v24  ;;  %v571_v28 = vmul.f32 %v4688_v57, %v4635_v48 }
  0xff   : > { %1303 = vmatmul.mubr.bf16.gmra.mrb[16].mxu0 %v4891_v40  ;;  %v646_v56 = vadd.f32 %v4698_v60, %v607_v26  ;;  %v739_v6 = vsel %vm675_vm11, %v643_v46, %v707_v15  ;;  %825 = vst.msk [vmem:[#allocation2 + $0x121] sm:$0xff] %vm333_vm2, %v738_v50  ;;  %vm676_vm12 = vcmp.ge.f32.partialorder %v644_v27, 0.0  ;;  %v708_v8 = vmul.f32 0.2, %v644_v27  ;;  %v976_v9 = vld [vmem:[#allocation2 + $0xf2] sm:$0xff]  ;;  %v977_v10 = vld [vmem:[#allocation2 + $0xfa] sm:$0xff]  ;;  %3487 = vmatprep.subr.bf16.mxu1 %v4032_v1 }
 0x100   : > { %3722 = vmatmul.mubr.bf16.gmra.mrb[12].mxu1 %v4908_v18  ;;  %1310 = vmatprep.mubr.bf16.mxu0 %v4893_v23  ;;  %vm677_vm13 = vcmp.ge.f32.partialorder %v645_v45, 0.0  ;;  %v4939_v48 = vpack.c.bf16 %v895_v14, %v894_v47  ;;  %826 = vst.msk [vmem:[#allocation2 + $0x129] sm:$0xff] %vm333_vm2, %v739_v6  ;;  %v709_v29 = vmul.f32 0.2, %v645_v45  ;;  %v647_v33 = vadd.f32 %v4698_v60, %v608_v55  ;;  %v4971_v26 = vld [vmem:[%s5636_s3 + $0x200] sm:$0xff]   ;;  %v934_v14 = vld [vmem:[#allocation2 + $0xa9] sm:$0xff] }
 0x101   : > { %3725 = vmatprep.mubr.bf16.mxu1 %v4919_v11  ;;  %vm678_vm14 = vcmp.ge.f32.partialorder %v646_v56, 0.0  ;;  %v740_v12 = vsel %vm676_vm12, %v644_v27, %v708_v8  ;;  %v710_v22 = vmul.f32 0.2, %v646_v56  ;;  %v572_v44 = vmul.f32 %v4688_v57, %v4642_v51  ;;  %v935_v50 = vld [vmem:[#allocation2 + $0xb1] sm:$0xff] }
 0x102   : > { %v609_v54 = vmul.f32 %v4686_v17, %v571_v28  ;;  %3488 = vmatpush3.bf16.msra.mxu1 %v4033_v5  ;;  %v4949_v34 = vpack.c.bf16 %v933_v3, %v932_v2  ;;  %v978_v35 = vld [vmem:[#allocation2 + $0x10a] sm:$0xff]  ;;  %v979_v31 = vld [vmem:[#allocation2 + $0x112] sm:$0xff]  ;;  %v741_v32 = vsel %vm677_vm13, %v645_v45, %v709_v29  ;;  %827 = vst.msk [vmem:[#allocation2 + $0x139] sm:$0xff] %vm333_vm2, %v740_v12  ;;  %vm679_vm15 = vcmp.ge.f32.partialorder %v647_v33, 0.0 }
 0x103   : > { %v711_v16 = vmul.f32 0.2, %v647_v33  ;;  %3489 = vmatprep.subr.bf16.mxu1 %v4034_v0  ;;  %v4953_v46 = vpack.c.bf16 %v977_v10, %v976_v9  ;;  %828 = vst.msk [vmem:[#allocation2 + $0x141] sm:$0xff] %vm333_vm2, %v741_v32  ;;  %v742_v51 = vsel %vm678_vm14, %v646_v56, %v710_v22  ;;  %v610_v37 = vmul.f32 %v4686_v17, %v572_v44  ;;  %v899_v12 = vld [vmem:[#allocation2 + $0xb0] sm:$0xff]  ;;  %v936_v22 = vld [vmem:[#allocation2 + $0xc1] sm:$0xff] }
 0x104   : > { %v648_v41 = vadd.f32 %v4698_v60, %v609_v54  ;;  %v4959_v36 = vpack.c.bf16 %v979_v31, %v978_v35  ;;  %829 = vst.msk [vmem:[#allocation2 + $0x151] sm:$0xff] %vm333_vm2, %v742_v51  ;;  %v573_v1 = vmul.f32 %v4688_v57, %v4652_v13  ;;  %v574_v43 = vmul.f32 %v4688_v57, %v4659_v25  ;;  %v896_v25 = vld [vmem:[#allocation2 + $0x90] sm:$0xff]  ;;  %v897_v57 = vld [vmem:[#allocation2 + $0x98] sm:$0xff] }
 0x105   : > { %v743_v24 = vsel %vm679_vm15, %v647_v33, %v711_v16  ;;  %v649_v30 = vadd.f32 %v4698_v60, %v610_v37  ;;  %v4983_v28 = vpack.c.bf16 %v897_v57, %v896_v25  ;;  %v4988_v8 = vpack.c.bf16 %v935_v50, %v934_v14  ;;  %v898_v33 = vld [vmem:[#allocation2 + $0xa8] sm:$0xff]  ;;  %v902_v57 = vld [vmem:[#allocation2 + $0xd8] sm:$0xff]  ;;  %v903_v14 = vld [vmem:[#allocation2 + $0xe0] sm:$0xff] }
 0x106   : > { %830 = vst.msk [vmem:[#allocation2 + $0x159] sm:$0xff] %vm333_vm2, %v743_v24  ;;  %vm680_vm0 = vcmp.ge.f32.partialorder %v648_v41, 0.0  ;;  %v712_v38 = vmul.f32 0.2, %v648_v41  ;;  %3490 = vmatpush3.bf16.msra.mxu1 %v4035_v62  ;;  %v611_v47 = vmul.f32 %v4686_v17, %v573_v1  ;;  %v612_v13 = vmul.f32 %v4686_v17, %v574_v43  ;;  %v937_v62 = vld [vmem:[#allocation2 + $0xc9] sm:$0xff]  ;;  %v938_v1 = vld [vmem:[#allocation2 + $0xd9] sm:$0xff] }
 0x107   : > { %1311 = vmatmul.mubr.bf16.gmra.mrb[20].mxu0 %v4939_v48  ;;  %vm681_vm1 = vcmp.ge.f32.partialorder %v649_v30, 0.0  ;;  %v713_v15 = vmul.f32 0.2, %v649_v30  ;;  %v980_v45 = vld [vmem:[#allocation2 + $0x122] sm:$0xff]  ;;  %v981_v5 = vld [vmem:[#allocation2 + $0x12a] sm:$0xff]  ;;  %3741 = vmatprep.subr.bf16.mxu1 %v4971_v26  ;;  %v4998_v32 = vpack.c.bf16 %v899_v12, %v898_v33  ;;  %v5002_v51 = vpack.c.bf16 %v937_v62, %v936_v22 }
 0x108   : > { %3726 = vmatmul.mubr.bf16.gmra.mrb[16].mxu1 %v4953_v46  ;;  %1318 = vmatprep.mubr.bf16.mxu0 %v4949_v34  ;;  %v744_v27 = vsel %vm680_vm0, %v648_v41, %v712_v38  ;;  %v650_v55 = vadd.f32 %v4698_v60, %v611_v47  ;;  %v651_v17 = vadd.f32 %v4698_v60, %v612_v13  ;;  %v900_v41 = vld [vmem:[#allocation2 + $0xc0] sm:$0xff]  ;;  %v901_v24 = vld [vmem:[#allocation2 + $0xc8] sm:$0xff]  ;;  %v907_v33 = vld [vmem:[#allocation2 + $0x110] sm:$0xff] }
 0x109   : > { %3729 = vmatprep.mubr.bf16.mxu1 %v4959_v36  ;;  %831 = vst.msk [vmem:[#allocation2 + $0x169] sm:$0xff] %vm333_vm2, %v744_v27  ;;  %v745_v56 = vsel %vm681_vm1, %v649_v30, %v713_v15  ;;  %v4986_v6 = vpack.c.bf16 %v981_v5, %v980_v45  ;;  %v939_v38 = vld [vmem:[#allocation2 + $0xe1] sm:$0xff]  ;;  %v5010_v47 = vpack.c.bf16 %v901_v24, %v900_v41  ;;  %v940_v15 = vld [vmem:[#allocation2 + $0xf1] sm:$0xff]  ;;  %v941_v27 = vld [vmem:[#allocation2 + $0xf9] sm:$0xff] }
 0x10a   : > { %v982_v0 = vld [vmem:[#allocation2 + $0x13a] sm:$0xff]  ;;  %v983_v2 = vld [vmem:[#allocation2 + $0x142] sm:$0xff]  ;;  %832 = vst.msk [vmem:[#allocation2 + $0x171] sm:$0xff] %vm333_vm2, %v745_v56  ;;  %vm682_vm3 = vcmp.ge.f32.partialorder %v650_v55, 0.0  ;;  %vm683_vm4 = vcmp.ge.f32.partialorder %v651_v17, 0.0  ;;  %v5014_v25 = vpack.c.bf16 %v939_v38, %v938_v1  ;;  %v5020_v45 = vpack.c.bf16 %v903_v14, %v902_v57 }
 0x10b   : > { %v714_v3 = vmul.f32 0.2, %v650_v55  ;;  %v715_v9 = vmul.f32 0.2, %v651_v17  ;;  %v4990_v10 = vpack.c.bf16 %v983_v2, %v982_v0  ;;  %v5022_v5 = vpack.c.bf16 %v941_v27, %v940_v15  ;;  %v4046_v50 = vld [vmem:[%s5636_s3 + $0x208] sm:$0xff]   ;;  %v943_v0 = vld [vmem:[#allocation2 + $0x111] sm:$0xff] }
 0x10c   : > { %v942_v56 = vld [vmem:[#allocation2 + $0x109] sm:$0xff]  ;;  %v3202_v2 = vpop.f32.mrb[0].mxu0  ;;  %v944_v22 = vld [vmem:[#allocation2 + $0x121] sm:$0xff]  ;;  %v946_v57 = vld [vmem:[#allocation2 + $0x139] sm:$0xff] }
 0x10d   : > { %v746_v60 = vsel %vm682_vm3, %v650_v55, %v714_v3  ;;  %v747_v29 = vsel %vm683_vm4, %v651_v17, %v715_v9  ;;  %v984_v44 = vld [vmem:[#allocation2 + $0x152] sm:$0xff]  ;;  %v985_v54 = vld [vmem:[#allocation2 + $0x15a] sm:$0xff]  ;;  %v3203_v12 = vpop.f32.mrb[1].mxu0  ;;  %v909_v38 = vld [vmem:[#allocation2 + $0x128] sm:$0xff] }
 0x10e   : > { %833 = vst.msk [vmem:[#allocation2 + $0x181] sm:$0xff] %vm333_vm2, %v746_v60  ;;  %834 = vst.msk [vmem:[#allocation2 + $0x189] sm:$0xff] %vm333_vm2, %v747_v29  ;;  %v5000_v16 = vpack.c.bf16 %v985_v54, %v984_v44  ;;  %v904_v55 = vld [vmem:[#allocation2 + $0xf0] sm:$0xff]  ;;  %v905_v17 = vld [vmem:[#allocation2 + $0xf8] sm:$0xff]  ;;  %v5037_v60 = vpack.c.bf16 %v943_v0, %v942_v56  ;;  %v5046_v54 = vadd.f32 %v3203_v12, %v3202_v2  ;;  %v3205_v62 = vpop.f32.mrb[2].mxu0 }
 0x10f   : > { %1319 = vmatmul.mubr.bf16.gmra.mrb[24].mxu0 %v4983_v28  ;;  %v4051_v3 = vld [vmem:[%s5636_s3 + $0x210] sm:$0xff]   ;;  %v5035_v9 = vpack.c.bf16 %v905_v17, %v904_v55  ;;  %v4056_v29 = vld [vmem:[%s5636_s3 + $0x218] sm:$0xff]   ;;  %v947_v14 = vld [vmem:[#allocation2 + $0x141] sm:$0xff] }
 0x110   : > { %3730 = vmatmul.mubr.bf16.gmra.mrb[20].mxu1 %v4986_v6  ;;  %1326 = vmatprep.mubr.bf16.mxu0 %v4988_v8  ;;  %v945_v44 = vld [vmem:[#allocation2 + $0x129] sm:$0xff]  ;;  %v4062_v55 = vld [vmem:[%s5636_s3 + $0x238] sm:$0xff]   ;;  %v911_v56 = vld [vmem:[#allocation2 + $0x140] sm:$0xff] }
 0x111   : > { %3733 = vmatprep.mubr.bf16.mxu1 %v4990_v10  ;;  %v986_v35 = vld [vmem:[#allocation2 + $0x16a] sm:$0xff]  ;;  %v987_v31 = vld [vmem:[#allocation2 + $0x172] sm:$0xff]  ;;  %v5055_v1 = vpack.c.bf16 %v945_v44, %v944_v22 }
 0x112   : > { %v5004_v37 = vpack.c.bf16 %v987_v31, %v986_v35  ;;  %v4059_v35 = vld [vmem:[%s5636_s3 + $0x220] sm:$0xff]   ;;  %v3206_v31 = vpop.f32.mrb[3].mxu0  ;;  %v4061_v15 = vld [vmem:[%s5636_s3 + $0x230] sm:$0xff]   ;;  %v910_v17 = vld [vmem:[#allocation2 + $0x138] sm:$0xff] }
 0x113   : > { %v5053_v24 = vadd.f32 %v3206_v31, %v3205_v62  ;;  %v948_v0 = vld [vmem:[#allocation2 + $0x151] sm:$0xff]  ;;  %v949_v2 = vld [vmem:[#allocation2 + $0x159] sm:$0xff]  ;;  %v950_v12 = vld [vmem:[#allocation2 + $0x169] sm:$0xff] }
 0x114   : > { %v951_v22 = vld [vmem:[#allocation2 + $0x171] sm:$0xff] }
 0x115   : > { %v988_v43 = vld [vmem:[#allocation2 + $0x182] sm:$0xff]  ;;  %v989_v30 = vld [vmem:[#allocation2 + $0x18a] sm:$0xff]  ;;  %v5088_v62 = vpack.c.bf16 %v951_v22, %v950_v12 }
 0x116   : > { %v5012_v13 = vpack.c.bf16 %v989_v30, %v988_v43  ;;  %v4060_v43 = vld [vmem:[%s5636_s3 + $0x228] sm:$0xff]   ;;  %v908_v30 = vld [vmem:[#allocation2 + $0x120] sm:$0xff]  ;;  %v915_v31 = vld [vmem:[#allocation2 + $0x170] sm:$0xff] }
 0x117   : > { %1327 = vmatmul.mubr.bf16.gmra.mrb[28].mxu0 %v4998_v32  ;;  %v5067_v27 = vpack.c.bf16 %v909_v38, %v908_v30  ;;  %v957_v30 = vld [vmem:[#allocation2 + $0xa] sm:$0xff] }
 0x118   : > { %3734 = vmatmul.mubr.bf16.gmra.mrb[24].mxu1 %v5000_v16  ;;  %1334 = vmatprep.mubr.bf16.mxu0 %v5002_v51  ;;  %v4053_v12 = vld [vmem:[%s5636_s3 + $0xe8] sm:$0xff]   ;;  %v4054_v22 = vld [vmem:[%s5636_s3 + $0x130] sm:$0xff]  }
 0x119   : > { %3737 = vmatprep.mubr.bf16.mxu1 %v5004_v37 }
 0x11f   : > { %1335 = vmatmul.mubr.bf16.gmra.mrb[32].mxu0 %v5010_v47 }
 0x120   : > { %3738 = vmatmul.mubr.bf16.gmra.mrb[28].mxu1 %v5012_v13  ;;  %1342 = vmatprep.mubr.bf16.mxu0 %v5014_v25 }
 0x121   : > { %2546 = vmatprep.mubr.bf16.mxu1 %v4779_v21 }
 0x127   : > { %1343 = vmatmul.mubr.bf16.gmra.mrb[36].mxu0 %v5020_v45 }
 0x128   : > { %2547 = vmatmul.mubr.bf16.vlgmr.msra.gmra.mrb[32].mxu1 %v4794_v19  ;;  %1350 = vmatprep.mubr.bf16.mxu0 %v5022_v5 }
 0x129   : > { %2554 = vmatprep.mubr.bf16.mxu1 %v4808_v53  ;;  %3742 = vmatpush3.bf16.msra.mxu1 %v4971_v26  ;;  %v906_v26 = vld [vmem:[#allocation2 + $0x108] sm:$0xff] }
 0x12a   : > { %3743 = vmatprep.subr.bf16.mxu1 %v4046_v50  ;;  %v5051_v41 = vpack.c.bf16 %v907_v33, %v906_v26  ;;  %v912_v26 = vld [vmem:[#allocation2 + $0x150] sm:$0xff]  ;;  %v913_v33 = vld [vmem:[#allocation2 + $0x158] sm:$0xff] }
 0x12b   : > { %v5086_v44 = vpack.c.bf16 %v913_v33, %v912_v26  ;;  %v4050_v26 = vld [vmem:[%s5636_s3 + $0xe0] sm:$0xff]   ;;  %v4052_v33 = vld [vmem:[%s5636_s3 + $0x128] sm:$0xff]  }
 0x12d   : > { %3744 = vmatpush3.bf16.msra.mxu1 %v4046_v50  ;;  %v5069_v50 = vpack.c.bf16 %v947_v14, %v946_v57  ;;  %v4040_v14 = vld [vmem:[%s5636_s3 + $0xc0] sm:$0xff]  }
 0x12e   : > { %3745 = vmatprep.subr.bf16.mxu1 %v4051_v3 }
 0x12f   : > { %1351 = vmatmul.mubr.bf16.gmra.mrb[40].mxu0 %v5035_v9 }
 0x130   : > { %2555 = vmatmul.mubr.bf16.gmra.mrb[36].mxu1 %v4850_v58  ;;  %1358 = vmatprep.mubr.bf16.mxu0 %v5037_v60 }
 0x131   : > { %2562 = vmatprep.mubr.bf16.mxu1 %v4853_v42  ;;  %3746 = vmatpush3.bf16.msra.mxu1 %v4051_v3  ;;  %v5078_v3 = vpack.c.bf16 %v911_v56, %v910_v17  ;;  %v4044_v17 = vld [vmem:[%s5636_s3 + $0x110] sm:$0xff]   ;;  %v4047_v56 = vld [vmem:[%s5636_s3 + $0x118] sm:$0xff]  }
 0x132   : > { %3747 = vmatprep.subr.bf16.mxu1 %v4056_v29 }
 0x135   : > { %3748 = vmatpush3.bf16.msra.mxu1 %v4056_v29  ;;  %v5080_v29 = vpack.c.bf16 %v949_v2, %v948_v0  ;;  %v4048_v0 = vld [vmem:[%s5636_s3 + $0xd8] sm:$0xff]   ;;  %v4049_v2 = vld [vmem:[%s5636_s3 + $0x120] sm:$0xff]  }
 0x136   : > { %3749 = vmatprep.subr.bf16.mxu1 %v4059_v35 }
 0x137   : > { %1359 = vmatmul.mubr.bf16.gmra.mrb[44].mxu0 %v5051_v41 }
 0x138   : > { %2563 = vmatmul.mubr.bf16.gmra.mrb[40].mxu1 %v4891_v40  ;;  %1366 = vmatprep.mubr.bf16.mxu0 %v5055_v1 }
 0x139   : > { %2570 = vmatprep.mubr.bf16.mxu1 %v4893_v23  ;;  %3750 = vmatpush3.bf16.msra.mxu1 %v4059_v35  ;;  %v914_v35 = vld [vmem:[#allocation2 + $0x168] sm:$0xff] }
 0x13a   : > { %3751 = vmatprep.subr.bf16.mxu1 %v4060_v43  ;;  %v5094_v38 = vpack.c.bf16 %v915_v31, %v914_v35  ;;  %v4055_v35 = vld [vmem:[%s5636_s3 + $0xf0] sm:$0xff]   ;;  %v4057_v31 = vld [vmem:[%s5636_s3 + $0x138] sm:$0xff]  }
 0x13d   : > { %3752 = vmatpush3.bf16.msra.mxu1 %v4060_v43  ;;  %v956_v43 = vld [vmem:[#allocation2 + $0x2] sm:$0xff] }
 0x13e   : > { %3753 = vmatprep.subr.bf16.mxu1 %v4061_v15  ;;  %v994_v57 = vpack.c.bf16 %v957_v30, %v956_v43  ;;  %v4058_v43 = vld [vmem:[%s5636_s3 + $0xf8] sm:$0xff]   ;;  %v952_v30 = vld [vmem:[#allocation2 + $0x181] sm:$0xff] }
 0x13f   : > { %1367 = vmatmul.mubr.bf16.gmra.mrb[48].mxu0 %v5067_v27 }
 0x140   : > { %2571 = vmatmul.mubr.bf16.gmra.mrb[44].mxu1 %v4939_v48  ;;  %1374 = vmatprep.mubr.bf16.mxu0 %v5069_v50 }
 0x141   : > { %2578 = vmatprep.mubr.bf16.mxu1 %v4949_v34  ;;  %3754 = vmatpush3.bf16.msra.mxu1 %v4061_v15  ;;  %v4042_v15 = vld [vmem:[%s5636_s3 + $0x108] sm:$0xff]  }
 0x142   : > { %3755 = vmatprep.subr.bf16.mxu1 %v4062_v55 }
 0x145   : > { %3756 = vmatpush3.bf16.msra.mxu1 %v4062_v55  ;;  %v4043_v55 = vld [vmem:[%s5636_s3 + $0xc8] sm:$0xff]  }
 0x147   : > { %1375 = vmatmul.mubr.bf16.gmra.mrb[52].mxu0 %v5078_v3 }
 0x148   : > { %2579 = vmatmul.mubr.bf16.gmra.mrb[48].mxu1 %v4983_v28  ;;  %1382 = vmatprep.mubr.bf16.mxu0 %v5080_v29 }
 0x149   : > { %2586 = vmatprep.mubr.bf16.mxu1 %v4988_v8 }
 0x14f   : > { %1383 = vmatmul.mubr.bf16.gmra.mrb[56].mxu0 %v5086_v44 }
 0x150   : > { %2587 = vmatmul.mubr.bf16.gmra.mrb[52].mxu1 %v4998_v32  ;;  %1390 = vmatprep.mubr.bf16.mxu0 %v5088_v62 }
 0x151   : > { %2594 = vmatprep.mubr.bf16.mxu1 %v5002_v51 }
 0x157   : > { %1391 = vmatmul.mubr.bf16.gmra.mrb[60].mxu0 %v5094_v38 }
 0x158   : > { %2595 = vmatmul.mubr.bf16.gmra.mrb[56].mxu1 %v5010_v47  ;;  %3627 = vmatprep.mubr.bf16.mxu0 %v994_v57  ;;  %v953_v57 = vld [vmem:[#allocation2 + $0x189] sm:$0xff] }
 0x159   : > { %2602 = vmatprep.mubr.bf16.mxu1 %v5014_v25 }
 0x15f   : > { %3628 = vmatmul.mubr.bf16.vlgmr.msra.gmra.mrb[64].mxu0 %v4769_v59  ;;  %v4045_v59 = vld [vmem:[%s5636_s3 + $0xd0] sm:$0xff]  }
 0x160   : > { %3340 = vmatpush3.bf16.msra.mxu0 %v4040_v14  ;;  %2603 = vmatmul.mubr.bf16.gmra.mrb[60].mxu1 %v5020_v45  ;;  %v5168_v14 = vpack.c.bf16 %v953_v57, %v952_v30 }
 0x161   : > { %3631 = vmatprep.mubr.bf16.mxu0 %v4774_v7  ;;  %3341 = vmatprep.subr.bf16.mxu0 %v4042_v15  ;;  %v916_v15 = vld [vmem:[#allocation2 + $0x180] sm:$0xff] }
 0x162   : > { %2610 = vmatprep.mubr.bf16.mxu1 %v5022_v5 }
 0x164   : > { %3342 = vmatpush3.bf16.msra.mxu0 %v4043_v55  ;;  %v917_v55 = vld [vmem:[#allocation2 + $0x188] sm:$0xff] }
 0x165   : > { %3343 = vmatprep.subr.bf16.mxu0 %v4044_v17  ;;  %v954_v17 = vld [vmem:[#allocation2 + $0x199] sm:$0xff] }
 0x167   : > { %3632 = vmatmul.mubr.bf16.gmra.mrb[68].mxu0 %v4781_v39 }
 0x168   : > { %2611 = vmatmul.mubr.bf16.gmra.mrb[64].mxu1 %v5035_v9  ;;  %3635 = vmatprep.mubr.bf16.mxu0 %v4801_v20 }
 0x169   : > { %2618 = vmatprep.mubr.bf16.mxu1 %v5037_v60  ;;  %3344 = vmatpush3.bf16.msra.mxu0 %v4045_v59  ;;  %v955_v59 = vld [vmem:[#allocation2 + $0x1a1] sm:$0xff] }
 0x16a   : > { %3345 = vmatprep.subr.bf16.mxu0 %v4047_v56  ;;  %v5174_v56 = vpack.c.bf16 %v917_v55, %v916_v15 }
 0x16d   : > { %3346 = vmatpush3.bf16.msra.mxu0 %v4048_v0  ;;  %v1044_v0 = vpack.c.bf16 %v955_v59, %v954_v17 }
 0x16e   : > { %3347 = vmatprep.subr.bf16.mxu0 %v4049_v2  ;;  %v4065_v2 = vld [vmem:[#allocation2] sm:$0xff] }
 0x16f   : > { %3636 = vmatmul.mubr.bf16.gmra.mrb[72].mxu0 %v4843_v63 }
 0x170   : > { %2619 = vmatmul.mubr.bf16.gmra.mrb[68].mxu1 %v5051_v41  ;;  %3639 = vmatprep.mubr.bf16.mxu0 %v4860_v4 }
 0x171   : > { %2626 = vmatprep.mubr.bf16.mxu1 %v5055_v1  ;;  %3348 = vmatpush3.bf16.msra.mxu0 %v4050_v26  ;;  %v1043_v26 = vpack.c.bf16 %v4065_v2, %v4065_v2 }
 0x172   : > { %3349 = vmatprep.subr.bf16.mxu0 %v4052_v33 }
 0x175   : > { %3350 = vmatpush3.bf16.msra.mxu0 %v4053_v12 }
 0x176   : > { %3351 = vmatprep.subr.bf16.mxu0 %v4054_v22 }
 0x177   : > { %3640 = vmatmul.mubr.bf16.gmra.mrb[76].mxu0 %v4864_v52 }
 0x178   : > { %2627 = vmatmul.mubr.bf16.gmra.mrb[72].mxu1 %v5067_v27  ;;  %3643 = vmatprep.mubr.bf16.mxu0 %v4908_v18 }
 0x179   : > { %2634 = vmatprep.mubr.bf16.mxu1 %v5069_v50  ;;  %3352 = vmatpush3.bf16.msra.mxu0 %v4055_v35 }
 0x17a   : > { %3353 = vmatprep.subr.bf16.mxu0 %v4057_v31 }
 0x17d   : > { %3354 = vmatpush3.bf16.msra.mxu0 %v4058_v43 }
 0x17f   : > { %3644 = vmatmul.mubr.bf16.gmra.mrb[80].mxu0 %v4919_v11 }
 0x180   : > { %2635 = vmatmul.mubr.bf16.gmra.mrb[76].mxu1 %v5078_v3  ;;  %3647 = vmatprep.mubr.bf16.mxu0 %v4953_v46 }
 0x181   : > { %2642 = vmatprep.mubr.bf16.mxu1 %v5080_v29 }
 0x187   : > { %3648 = vmatmul.mubr.bf16.gmra.mrb[84].mxu0 %v4959_v36 }
 0x188   : > { %2643 = vmatmul.mubr.bf16.gmra.mrb[80].mxu1 %v5086_v44  ;;  %3651 = vmatprep.mubr.bf16.mxu0 %v4986_v6 }
 0x189   : > { %2650 = vmatprep.mubr.bf16.mxu1 %v5088_v62 }
 0x18f   : > { %3652 = vmatmul.mubr.bf16.gmra.mrb[88].mxu0 %v4990_v10 }
 0x190   : > { %2651 = vmatmul.mubr.bf16.gmra.mrb[84].mxu1 %v5094_v38  ;;  %3655 = vmatprep.mubr.bf16.mxu0 %v5000_v16 }
 0x191   : > { %2658 = vmatprep.mubr.bf16.mxu1 %v5168_v14 }
 0x197   : > { %3656 = vmatmul.mubr.bf16.gmra.mrb[92].mxu0 %v5004_v37 }
 0x198   : > { %2659 = vmatmul.mubr.bf16.gmra.mrb[88].mxu1 %v5174_v56  ;;  %1999 = vmatprep.mubr.bf16.mxu0 %v4763_v49 }
 0x199   : > { %2666 = vmatprep.mubr.bf16.mxu1 %v1044_v0 }
 0x19f   : > { %2000 = vmatmul.mubr.bf16.vlgmr.msra.gmra.mrb[96].mxu0 %v4771_v61 }
 0x1a0   : > { %2667 = vmatmul.mubr.bf16.gmra.mrb[92].mxu1 %v1043_v26  ;;  %2007 = vmatprep.mubr.bf16.mxu0 %v4779_v21 }
 0x1a1   : > { %3757 = vmatprep.mubr.bf16.mxu1 %v4774_v7 }
 0x1a7   : > { %2008 = vmatmul.mubr.bf16.gmra.mrb[100].mxu0 %v4794_v19 }
 0x1a8   : > { %3758 = vmatmul.mubr.bf16.vlgmr.msra.gmra.mrb[0].mxu1 %v4781_v39  ;;  %2015 = vmatprep.mubr.bf16.mxu0 %v4808_v53 }
 0x1a9   : > { %3761 = vmatprep.mubr.bf16.mxu1 %v4801_v20 }
 0x1af   : > { %2016 = vmatmul.mubr.bf16.gmra.mrb[104].mxu0 %v4850_v58 }
 0x1b0   : > { %3762 = vmatmul.mubr.bf16.gmra.mrb[4].mxu1 %v4843_v63  ;;  %2023 = vmatprep.mubr.bf16.mxu0 %v4853_v42 }
 0x1b1   : > { %3765 = vmatprep.mubr.bf16.mxu1 %v4860_v4 }
 0x1b7   : > { %2024 = vmatmul.mubr.bf16.gmra.mrb[108].mxu0 %v4891_v40 }
 0x1b8   : > { %3766 = vmatmul.mubr.bf16.gmra.mrb[8].mxu1 %v4864_v52  ;;  %2031 = vmatprep.mubr.bf16.mxu0 %v4893_v23 }
 0x1b9   : > { %3769 = vmatprep.mubr.bf16.mxu1 %v4908_v18 }
 0x1ba   : > { %v3208_v49 = vpop.f32.mrb[4].mxu0 }
 0x1bb   : > { %v3209_v61 = vpop.f32.mrb[5].mxu0 }
 0x1bc   : > { %v5194_v7 = vadd.f32 %v3209_v61, %v3208_v49  ;;  %v3211_v21 = vpop.f32.mrb[6].mxu0 }
 0x1bd   : > { %v3212_v39 = vpop.f32.mrb[7].mxu0 }
 0x1be   : > { %v5196_v19 = vadd.f32 %v3212_v39, %v3211_v21 }
 0x1bf   : > { %2032 = vmatmul.mubr.bf16.gmra.mrb[112].mxu0 %v4939_v48 }
 0x1c0   : > { %3770 = vmatmul.mubr.bf16.gmra.mrb[12].mxu1 %v4919_v11  ;;  %2039 = vmatprep.mubr.bf16.mxu0 %v4949_v34 }
 0x1c1   : > { %3773 = vmatprep.mubr.bf16.mxu1 %v4953_v46 }
 0x1c2   : > { %v3214_v20 = vpop.f32.mrb[8].mxu0 }
 0x1c3   : > { %v3215_v53 = vpop.f32.mrb[9].mxu0 }
 0x1c4   : > { %v5202_v63 = vadd.f32 %v3215_v53, %v3214_v20  ;;  %v3217_v58 = vpop.f32.mrb[10].mxu0 }
 0x1c5   : > { %v3218_v42 = vpop.f32.mrb[11].mxu0 }
 0x1c6   : > { %v5204_v4 = vadd.f32 %v3218_v42, %v3217_v58 }
 0x1c7   : > { %2040 = vmatmul.mubr.bf16.gmra.mrb[116].mxu0 %v4983_v28 }
 0x1c8   : > { %3774 = vmatmul.mubr.bf16.gmra.mrb[16].mxu1 %v4959_v36  ;;  %2047 = vmatprep.mubr.bf16.mxu0 %v4988_v8 }
 0x1c9   : > { %3777 = vmatprep.mubr.bf16.mxu1 %v4986_v6 }
 0x1ca   : > { %v3220_v52 = vpop.f32.mrb[12].mxu0 }
 0x1cb   : > { %v3221_v40 = vpop.f32.mrb[13].mxu0 }
 0x1cc   : > { %v5210_v23 = vadd.f32 %v3221_v40, %v3220_v52  ;;  %v3223_v18 = vpop.f32.mrb[14].mxu0 }
 0x1cd   : > { %v3224_v11 = vpop.f32.mrb[15].mxu0 }
 0x1ce   : > { %v5212_v48 = vadd.f32 %v3224_v11, %v3223_v18 }
 0x1cf   : > { %2048 = vmatmul.mubr.bf16.gmra.mrb[120].mxu0 %v4998_v32  ;;  %v991_v32 = vld [vmem:[#allocation2 + $0x1a2] sm:$0xff] }
 0x1d0   : > { %3778 = vmatmul.mubr.bf16.gmra.mrb[20].mxu1 %v4990_v10  ;;  %2055 = vmatprep.mubr.bf16.mxu0 %v5002_v51  ;;  %v990_v10 = vld [vmem:[#allocation2 + $0x19a] sm:$0xff] }
 0x1d1   : > { %3781 = vmatprep.mubr.bf16.mxu1 %v5000_v16  ;;  %v1045_v22 = vpack.c.bf16 %v991_v32, %v990_v10 }
 0x1d2   : > { %v3226_v34 = vpop.f32.mrb[16].mxu0 }
 0x1d3   : > { %v3227_v46 = vpop.f32.mrb[17].mxu0 }
 0x1d4   : > { %v5218_v36 = vadd.f32 %v3227_v46, %v3226_v34  ;;  %v3229_v28 = vpop.f32.mrb[18].mxu0 }
 0x1d5   : > { %v3230_v6 = vpop.f32.mrb[19].mxu0 }
 0x1d6   : > { %v5220_v8 = vadd.f32 %v3230_v6, %v3229_v28 }
 0x1d7   : > { %2056 = vmatmul.mubr.bf16.gmra.mrb[124].mxu0 %v5010_v47 }
 0x1d8   : > { %3782 = vmatmul.mubr.bf16.gmra.mrb[24].mxu1 %v5004_v37  ;;  %2063 = vmatprep.mubr.bf16.mxu0 %v5014_v25 }
 0x1d9   : > { %3785 = vmatprep.mubr.bf16.mxu1 %v5012_v13 }
 0x1da   : > { %v3232_v51 = vpop.f32.mrb[20].mxu0 }
 0x1db   : > { %v3233_v16 = vpop.f32.mrb[21].mxu0 }
 0x1dc   : > { %v5226_v33 = vadd.f32 %v3233_v16, %v3232_v51  ;;  %v3235_v12 = vpop.f32.mrb[22].mxu0 }
 0x1dd   : > { %v3236_v35 = vpop.f32.mrb[23].mxu0 }
 0x1de   : > { %v5228_v31 = vadd.f32 %v3236_v35, %v3235_v12 }
 0x1df   : > { %2064 = vmatmul.mubr.bf16.gmra.mrb[128].mxu0 %v5020_v45 }
 0x1e0   : > { %3786 = vmatmul.mubr.bf16.gmra.mrb[28].mxu1 %v1045_v22  ;;  %2071 = vmatprep.mubr.bf16.mxu0 %v5022_v5 }
 0x1e2   : > { %v3238_v37 = vpop.f32.mrb[24].mxu0 }
 0x1e3   : > { %v3239_v47 = vpop.f32.mrb[25].mxu0 }
 0x1e4   : > { %v5232_v25 = vadd.f32 %v3239_v47, %v3238_v37  ;;  %v3241_v13 = vpop.f32.mrb[26].mxu0 }
 0x1e5   : > { %v3242_v43 = vpop.f32.mrb[27].mxu0 }
 0x1e6   : > { %v5234_v30 = vadd.f32 %v3242_v43, %v3241_v13 }
 0x1e7   : > { %2072 = vmatmul.mubr.bf16.gmra.mrb[132].mxu0 %v5035_v9 }
 0x1e8   : > { %2079 = vmatprep.mubr.bf16.mxu0 %v5037_v60 }
 0x1ea   : > { %v3244_v57 = vpop.f32.mrb[28].mxu0 }
 0x1eb   : > { %v3245_v15 = vpop.f32.mrb[29].mxu0 }
 0x1ec   : > { %v5238_v55 = vadd.f32 %v3245_v15, %v3244_v57  ;;  %v3247_v45 = vpop.f32.mrb[30].mxu0 }
 0x1ed   : > { %v3248_v17 = vpop.f32.mrb[31].mxu0 }
 0x1ee   : > { %v5240_v59 = vadd.f32 %v3248_v17, %v3247_v45 }
 0x1ef   : > { %2080 = vmatmul.mubr.bf16.gmra.mrb[136].mxu0 %v5051_v41 }
 0x1f0   : > { %2087 = vmatprep.mubr.bf16.mxu0 %v5055_v1 }
 0x1f2   : > { %v3250_v5 = vpop.f32.mrb[32].mxu0 }
 0x1f3   : > { %v3251_v0 = vpop.f32.mrb[33].mxu0 }
 0x1f4   : > { %v5244_v2 = vadd.f32 %v3251_v0, %v3250_v5  ;;  %v3253_v26 = vpop.f32.mrb[34].mxu0 }
 0x1f5   : > { %v3254_v9 = vpop.f32.mrb[35].mxu0 }
 0x1f6   : > { %v5246_v49 = vadd.f32 %v3254_v9, %v3253_v26 }
 0x1f7   : > { %2088 = vmatmul.mubr.bf16.gmra.mrb[140].mxu0 %v5067_v27 }
 0x1f8   : > { %2095 = vmatprep.mubr.bf16.mxu0 %v5069_v50 }
 0x1fa   : > { %v3256_v60 = vpop.f32.mrb[36].mxu0 }
 0x1fb   : > { %v3257_v61 = vpop.f32.mrb[37].mxu0  ;;  %v3491_v21 = vpop.f32.mrb[32].mxu1 }
 0x1fc   : > { %v5250_v39 = vadd.f32 %v3257_v61, %v3256_v60  ;;  %v3259_v41 = vpop.f32.mrb[38].mxu0  ;;  %v3492_v20 = vpop.f32.mrb[33].mxu1 }
 0x1fd   : > { %v3260_v1 = vpop.f32.mrb[39].mxu0  ;;  %v5252_v53 = vadd.f32 %v3492_v20, %v3491_v21  ;;  %v3494_v58 = vpop.f32.mrb[34].mxu1 }
 0x1fe   : > { %v5254_v42 = vadd.f32 %v3260_v1, %v3259_v41  ;;  %v3495_v52 = vpop.f32.mrb[35].mxu1 }
 0x1ff   : > { %2096 = vmatmul.mubr.bf16.gmra.mrb[144].mxu0 %v5078_v3  ;;  %v5257_v40 = vadd.f32 %v3495_v52, %v3494_v58 }
 0x200   : > { %2103 = vmatprep.mubr.bf16.mxu0 %v5080_v29 }
 0x202   : > { %v3262_v27 = vpop.f32.mrb[40].mxu0 }
 0x203   : > { %v3263_v50 = vpop.f32.mrb[41].mxu0  ;;  %v3497_v18 = vpop.f32.mrb[36].mxu1 }
 0x204   : > { %v5260_v11 = vadd.f32 %v3263_v50, %v3262_v27  ;;  %v3265_v34 = vpop.f32.mrb[42].mxu0  ;;  %v3498_v46 = vpop.f32.mrb[37].mxu1 }
 0x205   : > { %v3266_v28 = vpop.f32.mrb[43].mxu0  ;;  %v5262_v6 = vadd.f32 %v3498_v46, %v3497_v18  ;;  %v3500_v10 = vpop.f32.mrb[38].mxu1 }
 0x206   : > { %v5264_v32 = vadd.f32 %v3266_v28, %v3265_v34  ;;  %v3501_v51 = vpop.f32.mrb[39].mxu1 }
 0x207   : > { %2104 = vmatmul.mubr.bf16.gmra.mrb[148].mxu0 %v5086_v44  ;;  %v5267_v3 = vadd.f32 %v3501_v51, %v3500_v10 }
 0x208   : > { %2111 = vmatprep.mubr.bf16.mxu0 %v5088_v62 }
 0x20a   : > { %v3268_v29 = vpop.f32.mrb[44].mxu0 }
 0x20b   : > { %v3269_v16 = vpop.f32.mrb[45].mxu0  ;;  %v3503_v12 = vpop.f32.mrb[40].mxu1 }
 0x20c   : > { %v5270_v22 = vadd.f32 %v3269_v16, %v3268_v29  ;;  %v3271_v35 = vpop.f32.mrb[46].mxu0  ;;  %v3504_v37 = vpop.f32.mrb[41].mxu1 }
 0x20d   : > { %v3272_v47 = vpop.f32.mrb[47].mxu0  ;;  %v5272_v13 = vadd.f32 %v3504_v37, %v3503_v12  ;;  %v3506_v43 = vpop.f32.mrb[42].mxu1 }
 0x20e   : > { %v5274_v57 = vadd.f32 %v3272_v47, %v3271_v35  ;;  %v3507_v15 = vpop.f32.mrb[43].mxu1 }
 0x20f   : > { %2112 = vmatmul.mubr.bf16.gmra.mrb[152].mxu0 %v5094_v38  ;;  %v5277_v44 = vadd.f32 %v3507_v15, %v3506_v43 }
 0x210   : > { %2119 = vmatprep.mubr.bf16.mxu0 %v5168_v14 }
 0x212   : > { %v3274_v62 = vpop.f32.mrb[48].mxu0 }
 0x213   : > { %v3275_v45 = vpop.f32.mrb[49].mxu0  ;;  %v3509_v17 = vpop.f32.mrb[44].mxu1 }
 0x214   : > { %v5280_v5 = vadd.f32 %v3275_v45, %v3274_v62  ;;  %v3277_v0 = vpop.f32.mrb[50].mxu0  ;;  %v3510_v26 = vpop.f32.mrb[45].mxu1 }
 0x215   : > { %v3278_v9 = vpop.f32.mrb[51].mxu0  ;;  %v5282_v60 = vadd.f32 %v3510_v26, %v3509_v17  ;;  %v3512_v61 = vpop.f32.mrb[46].mxu1 }
 0x216   : > { %v5284_v21 = vadd.f32 %v3278_v9, %v3277_v0  ;;  %v3513_v41 = vpop.f32.mrb[47].mxu1 }
 0x217   : > { %2120 = vmatmul.mubr.bf16.gmra.mrb[156].mxu0 %v5174_v56  ;;  %v5287_v38 = vadd.f32 %v3513_v41, %v3512_v61 }
 0x21a   : > { %v3280_v20 = vpop.f32.mrb[52].mxu0 }
 0x21b   : > { %v3281_v14 = vpop.f32.mrb[53].mxu0  ;;  %v3515_v1 = vpop.f32.mrb[48].mxu1 }
 0x21c   : > { %v5289_v58 = vadd.f32 %v3281_v14, %v3280_v20  ;;  %v3283_v52 = vpop.f32.mrb[54].mxu0  ;;  %v3516_v27 = vpop.f32.mrb[49].mxu1 }
 0x21d   : > { %v3284_v50 = vpop.f32.mrb[55].mxu0  ;;  %v5291_v18 = vadd.f32 %v3516_v27, %v3515_v1  ;;  %v3518_v34 = vpop.f32.mrb[50].mxu1 }
 0x21e   : > { %v5293_v46 = vadd.f32 %v3284_v50, %v3283_v52  ;;  %v3519_v28 = vpop.f32.mrb[51].mxu1 }
 0x21f   : > { %v5295_v10 = vadd.f32 %v3519_v28, %v3518_v34 }
 0x222   : > { %v3286_v51 = vpop.f32.mrb[56].mxu0 }
 0x223   : > { %v3287_v56 = vpop.f32.mrb[57].mxu0  ;;  %v3521_v29 = vpop.f32.mrb[52].mxu1 }
 0x224   : > { %v5297_v16 = vadd.f32 %v3287_v56, %v3286_v51  ;;  %v3289_v12 = vpop.f32.mrb[58].mxu0  ;;  %v3522_v35 = vpop.f32.mrb[53].mxu1 }
 0x225   : > { %v3290_v37 = vpop.f32.mrb[59].mxu0  ;;  %v5299_v47 = vadd.f32 %v3522_v35, %v3521_v29  ;;  %v3524_v43 = vpop.f32.mrb[54].mxu1 }
 0x226   : > { %v5301_v15 = vadd.f32 %v3290_v37, %v3289_v12  ;;  %v3525_v62 = vpop.f32.mrb[55].mxu1 }
 0x227   : > { %v5303_v45 = vadd.f32 %v3525_v62, %v3524_v43 }
 0x22a   : > { %v3292_v17 = vpop.f32.mrb[60].mxu0 }
 0x22b   : > { %v3293_v0 = vpop.f32.mrb[61].mxu0  ;;  %v3527_v26 = vpop.f32.mrb[56].mxu1 }
 0x22c   : > { %v5305_v9 = vadd.f32 %v3293_v0, %v3292_v17  ;;  %v3295_v61 = vpop.f32.mrb[62].mxu0  ;;  %v3528_v41 = vpop.f32.mrb[57].mxu1 }
 0x22d   : > { %v3296_v20 = vpop.f32.mrb[63].mxu0  ;;  %v5307_v14 = vadd.f32 %v3528_v41, %v3527_v26  ;;  %v3530_v1 = vpop.f32.mrb[58].mxu1 }
 0x22e   : > { %v5309_v52 = vadd.f32 %v3296_v20, %v3295_v61  ;;  %v3531_v27 = vpop.f32.mrb[59].mxu1 }
 0x22f   : > { %v5311_v50 = vadd.f32 %v3531_v27, %v3530_v1 }
 0x232   : > { %v3629_v34 = vpop.f32.mrb[64].mxu0 }
 0x233   : > { %v5314_v28 = vadd.f32 %v3629_v34, %v5194_v7  ;;  %v1433_v51 = vpop.f32.mrb[65].mxu0  ;;  %v3533_v56 = vpop.f32.mrb[60].mxu1 }
 0x234   : > { %v5317_v29 = vadd.f32 %v5046_v54, %v1433_v51  ;;  %v3630_v12 = vpop.f32.mrb[66].mxu0  ;;  %v3534_v35 = vpop.f32.mrb[61].mxu1 }
 0x235   : > { %v5320_v37 = vadd.f32 %v3630_v12, %v5196_v19  ;;  %v1436_v43 = vpop.f32.mrb[67].mxu0  ;;  %v5322_v62 = vadd.f32 %v3534_v35, %v3533_v56  ;;  %v3536_v17 = vpop.f32.mrb[62].mxu1 }
 0x236   : > { %v5325_v0 = vadd.f32 %v5053_v24, %v1436_v43  ;;  %v3537_v26 = vpop.f32.mrb[63].mxu1 }
 0x237   : > { %v5327_v7 = vadd.f32 %v3537_v26, %v3536_v17 }
 0x23a   : > { %v3633_v61 = vpop.f32.mrb[68].mxu0 }
 0x23b   : > { %v5330_v41 = vadd.f32 %v3633_v61, %v5210_v23  ;;  %v1449_v54 = vpop.f32.mrb[69].mxu0  ;;  %v3539_v20 = vpop.f32.mrb[64].mxu1 }
 0x23c   : > { %v5333_v1 = vadd.f32 %v5202_v63, %v1449_v54  ;;  %v3634_v19 = vpop.f32.mrb[70].mxu0  ;;  %v3540_v27 = vpop.f32.mrb[65].mxu1 }
 0x23d   : > { %v5336_v34 = vadd.f32 %v3634_v19, %v5212_v48  ;;  %v1452_v51 = vpop.f32.mrb[71].mxu0  ;;  %v5338_v24 = vadd.f32 %v3540_v27, %v3539_v20  ;;  %v3542_v56 = vpop.f32.mrb[66].mxu1 }
 0x23e   : > { %v5341_v12 = vadd.f32 %v5204_v4, %v1452_v51  ;;  %v3543_v35 = vpop.f32.mrb[67].mxu1 }
 0x23f   : > { %v5343_v23 = vadd.f32 %v3543_v35, %v3542_v56 }
 0x241   : > { %5640 = vst [vmem:[#allocation3_spill] sm:$0xff] %v5343_v23 }
 0x242   : > { %v3637_v43 = vpop.f32.mrb[72].mxu0 }
 0x243   : > { %v5346_v17 = vadd.f32 %v3637_v43, %v5226_v33  ;;  %v1465_v63 = vpop.f32.mrb[73].mxu0  ;;  %v3545_v26 = vpop.f32.mrb[68].mxu1 }
 0x244   : > { %v5349_v61 = vadd.f32 %v5218_v36, %v1465_v63  ;;  %v3638_v48 = vpop.f32.mrb[74].mxu0  ;;  %v3546_v54 = vpop.f32.mrb[69].mxu1 }
 0x245   : > { %v5352_v20 = vadd.f32 %v3638_v48, %v5228_v31  ;;  %v1468_v19 = vpop.f32.mrb[75].mxu0  ;;  %v5354_v4 = vadd.f32 %v3546_v54, %v3545_v26  ;;  %v3548_v27 = vpop.f32.mrb[70].mxu1 }
 0x246   : > { %v5357_v51 = vadd.f32 %v5220_v8, %v1468_v19  ;;  %v3549_v56 = vpop.f32.mrb[71].mxu1 }
 0x247   : > { %5641 = vst [vmem:[#allocation4_spill] sm:$0xff] %v5354_v4  ;;  %v5359_v33 = vadd.f32 %v3549_v56, %v3548_v27 }
 0x249   : > { %5642 = vst [vmem:[#allocation5_spill] sm:$0xff] %v5359_v33 }
 0x24a   : > { %v3641_v35 = vpop.f32.mrb[76].mxu0 }
 0x24b   : > { %v5362_v43 = vadd.f32 %v3641_v35, %v5238_v55  ;;  %v1481_v36 = vpop.f32.mrb[77].mxu0  ;;  %v3551_v63 = vpop.f32.mrb[72].mxu1 }
 0x24c   : > { %v5365_v23 = vadd.f32 %v5232_v25, %v1481_v36  ;;  %v3642_v31 = vpop.f32.mrb[78].mxu0  ;;  %v3552_v48 = vpop.f32.mrb[73].mxu1 }
 0x24d   : > { %v5368_v26 = vadd.f32 %v3642_v31, %v5240_v59  ;;  %v1484_v54 = vpop.f32.mrb[79].mxu0  ;;  %v5370_v8 = vadd.f32 %v3552_v48, %v3551_v63  ;;  %v3554_v19 = vpop.f32.mrb[74].mxu1 }
 0x24e   : > { %v5373_v27 = vadd.f32 %v5234_v30, %v1484_v54  ;;  %v3555_v56 = vpop.f32.mrb[75].mxu1 }
 0x24f   : > { %5643 = vst [vmem:[#allocation6_spill] sm:$0xff] %v5370_v8  ;;  %v5375_v55 = vadd.f32 %v3555_v56, %v3554_v19 }
 0x251   : > { %5644 = vst [vmem:[#allocation7_spill] sm:$0xff] %v5375_v55 }
 0x252   : > { %v3645_v35 = vpop.f32.mrb[80].mxu0 }
 0x253   : > { %v5378_v33 = vadd.f32 %v3645_v35, %v5250_v39  ;;  %v1497_v25 = vpop.f32.mrb[81].mxu0  ;;  %v3557_v36 = vpop.f32.mrb[76].mxu1 }
 0x254   : > { %v5381_v4 = vadd.f32 %v5244_v2, %v1497_v25  ;;  %v3646_v59 = vpop.f32.mrb[82].mxu0  ;;  %v3558_v31 = vpop.f32.mrb[77].mxu1 }
 0x255   : > { %v5384_v63 = vadd.f32 %v3646_v59, %v5254_v42  ;;  %v1500_v48 = vpop.f32.mrb[83].mxu0  ;;  %v5386_v30 = vadd.f32 %v3558_v31, %v3557_v36  ;;  %v3560_v54 = vpop.f32.mrb[78].mxu1 }
 0x256   : > { %v5389_v19 = vadd.f32 %v5246_v49, %v1500_v48  ;;  %v3561_v56 = vpop.f32.mrb[79].mxu1 }
 0x257   : > { %5645 = vst [vmem:[#allocation8_spill] sm:$0xff] %v5386_v30  ;;  %v5391_v39 = vadd.f32 %v3561_v56, %v3560_v54 }
 0x259   : > { %5646 = vst [vmem:[#allocation9_spill] sm:$0xff] %v5391_v39 }
 0x25a   : > { %v3649_v35 = vpop.f32.mrb[84].mxu0 }
 0x25b   : > { %v5394_v55 = vadd.f32 %v3649_v35, %v5270_v22  ;;  %v1513_v2 = vpop.f32.mrb[85].mxu0  ;;  %v3563_v25 = vpop.f32.mrb[80].mxu1 }
 0x25c   : > { %v5397_v8 = vadd.f32 %v5260_v11, %v1513_v2  ;;  %v3650_v42 = vpop.f32.mrb[86].mxu0  ;;  %v3564_v59 = vpop.f32.mrb[81].mxu1 }
 0x25d   : > { %v5400_v36 = vadd.f32 %v3650_v42, %v5274_v57  ;;  %v1516_v31 = vpop.f32.mrb[87].mxu0  ;;  %v5402_v49 = vadd.f32 %v3564_v59, %v3563_v25  ;;  %v3566_v48 = vpop.f32.mrb[82].mxu1 }
 0x25e   : > { %v5405_v54 = vadd.f32 %v5264_v32, %v1516_v31  ;;  %v3567_v56 = vpop.f32.mrb[83].mxu1 }
 0x25f   : > { %v5407_v22 = vadd.f32 %v3567_v56, %v3566_v48 }
 0x261   : > { %5647 = vst [vmem:[#allocation10_spill] sm:$0xff] %v5407_v22 }
 0x262   : > { %v3653_v35 = vpop.f32.mrb[88].mxu0 }
 0x263   : > { %v5410_v39 = vadd.f32 %v3653_v35, %v5289_v58  ;;  %v1529_v11 = vpop.f32.mrb[89].mxu0  ;;  %v3569_v2 = vpop.f32.mrb[84].mxu1 }
 0x264   : > { %v5413_v30 = vadd.f32 %v5280_v5, %v1529_v11  ;;  %v3654_v57 = vpop.f32.mrb[90].mxu0  ;;  %v3570_v42 = vpop.f32.mrb[85].mxu1 }
 0x265   : > { %5648 = vst [vmem:[#allocation11_spill] sm:$0xff] %v5410_v39  ;;  %v5416_v25 = vadd.f32 %v3654_v57, %v5293_v46  ;;  %v1532_v59 = vpop.f32.mrb[91].mxu0  ;;  %v5418_v32 = vadd.f32 %v3570_v42, %v3569_v2  ;;  %v3572_v31 = vpop.f32.mrb[86].mxu1 }
 0x266   : > { %v5421_v48 = vadd.f32 %v5284_v21, %v1532_v59  ;;  %v3573_v56 = vpop.f32.mrb[87].mxu1 }
 0x267   : > { %5649 = vst [vmem:[#allocation12_spill] sm:$0xff] %v5416_v25  ;;  %v5423_v58 = vadd.f32 %v3573_v56, %v3572_v31 }
 0x269   : > { %5650 = vst [vmem:[#allocation13_spill] sm:$0xff] %v5423_v58 }
 0x26a   : > { %v3657_v35 = vpop.f32.mrb[92].mxu0 }
 0x26b   : > { %v5426_v39 = vadd.f32 %v3657_v35, %v5305_v9  ;;  %v1545_v5 = vpop.f32.mrb[93].mxu0  ;;  %v3575_v11 = vpop.f32.mrb[88].mxu1 }
 0x26c   : > { %v5429_v22 = vadd.f32 %v5297_v16, %v1545_v5  ;;  %v3658_v46 = vpop.f32.mrb[94].mxu0  ;;  %v3576_v57 = vpop.f32.mrb[89].mxu1 }
 0x26d   : > { %5651 = vst [vmem:[#allocation14_spill] sm:$0xff] %v5426_v39  ;;  %v5432_v2 = vadd.f32 %v3658_v46, %v5309_v52  ;;  %v1548_v42 = vpop.f32.mrb[95].mxu0  ;;  %v5434_v21 = vadd.f32 %v3576_v57, %v3575_v11  ;;  %v3578_v59 = vpop.f32.mrb[90].mxu1 }
 0x26e   : > { %5652 = vst [vmem:[#allocation15_spill] sm:$0xff] %v5429_v22  ;;  %v5437_v31 = vadd.f32 %v5301_v15, %v1548_v42  ;;  %v3579_v56 = vpop.f32.mrb[91].mxu1 }
 0x26f   : > { %5653 = vst [vmem:[#allocation16_spill] sm:$0xff] %v5432_v2  ;;  %v5439_v9 = vadd.f32 %v3579_v56, %v3578_v59 }
 0x271   : > { %5654 = vst [vmem:[#allocation17_spill] sm:$0xff] %v5439_v9 }
 0x272   : > { %v3355_v35 = vpop.f32.mrb[96].mxu0 }
 0x273   : > { %v3356_v39 = vpop.f32.mrb[97].mxu0  ;;  %v3581_v58 = vpop.f32.mrb[92].mxu1 }
 0x274   : > { %v3357_v16 = vadd.f32 %v3356_v39, %v3355_v35  ;;  %v3358_v5 = vpop.f32.mrb[98].mxu0  ;;  %v3582_v22 = vpop.f32.mrb[93].mxu1 }
 0x275   : > { %v3359_v25 = vpop.f32.mrb[99].mxu0  ;;  %v5441_v52 = vadd.f32 %v3582_v22, %v3581_v58  ;;  %v3584_v46 = vpop.f32.mrb[94].mxu1 }
 0x276   : > { %v3794_v11 = vadd.f32 %v3357_v16, %v5317_v29  ;;  %v3360_v57 = vadd.f32 %v3359_v25, %v3358_v5  ;;  %v3585_v2 = vpop.f32.mrb[95].mxu1 }
 0x277   : > { %v5444_v15 = vadd.f32 %v3585_v2, %v3584_v46 }
 0x278   : > { %v3802_v42 = vadd.f32 %v3360_v57, %v5325_v0  ;;  %v3795_v59 = vadd.f32 %v3794_v11, %v5252_v53 }
 0x27a   : > { %v3361_v56 = vpop.f32.mrb[100].mxu0  ;;  %v3803_v39 = vadd.f32 %v3802_v42, %v5257_v40 }
 0x27b   : > { %v3759_v35 = vpop.f32.mrb[0].mxu1  ;;  %v3362_v9 = vpop.f32.mrb[101].mxu0 }
 0x27c   : > { %v3363_v29 = vadd.f32 %v3362_v9, %v3361_v56  ;;  %v2709_v22 = vpop.f32.mrb[1].mxu1  ;;  %v3364_v25 = vpop.f32.mrb[102].mxu0 }
 0x27d   : > { %v3796_v58 = vadd.f32 %v3795_v59, %v2709_v22  ;;  %v3760_v0 = vpop.f32.mrb[2].mxu1  ;;  %v3365_v2 = vpop.f32.mrb[103].mxu0 }
 0x27e   : > { %v3790_v53 = vadd.f32 %v3363_v29, %v5314_v28  ;;  %v3366_v16 = vadd.f32 %v3365_v2, %v3364_v25  ;;  %v2712_v40 = vpop.f32.mrb[3].mxu1 }
 0x27f   : > { %2868 = vst.msk [vmem:[%s5453_s10] sm:$0xff] %vm333_vm2, %v3796_v58  ;;  %v3804_v5 = vadd.f32 %v3803_v39, %v2712_v40 }
 0x280   : > { %v3791_v46 = vadd.f32 %v3790_v53, %v5262_v6  ;;  %v3798_v11 = vadd.f32 %v3366_v16, %v5320_v37 }
 0x281   : > { %2869 = vst.msk [vmem:[%s5453_s10 + $0x8] sm:$0xff] %vm333_vm2, %v3804_v5 }
 0x282   : > { %v3792_v9 = vadd.f32 %v3791_v46, %v3759_v35  ;;  %v3799_v57 = vadd.f32 %v3798_v11, %v5267_v3  ;;  %v3367_v42 = vpop.f32.mrb[104].mxu0 }
 0x283   : > { %v3763_v59 = vpop.f32.mrb[4].mxu1  ;;  %v3368_v56 = vpop.f32.mrb[105].mxu0 }
 0x284   : > { %2870 = vst.msk [vmem:[%s5453_s10 + $0x10] sm:$0xff] %vm333_vm2, %v3792_v9  ;;  %v3800_v28 = vadd.f32 %v3799_v57, %v3760_v0  ;;  %v3369_v29 = vadd.f32 %v3368_v56, %v3367_v42  ;;  %v2725_v22 = vpop.f32.mrb[5].mxu1  ;;  %v3370_v39 = vpop.f32.mrb[106].mxu0 }
 0x285   : > { %v3764_v25 = vpop.f32.mrb[6].mxu1  ;;  %v3371_v58 = vpop.f32.mrb[107].mxu0 }
 0x286   : > { %2871 = vst.msk [vmem:[%s5453_s10 + $0x18] sm:$0xff] %vm333_vm2, %v3800_v28  ;;  %v3810_v6 = vadd.f32 %v3369_v29, %v5333_v1  ;;  %v3372_v37 = vadd.f32 %v3371_v58, %v3370_v39  ;;  %v2728_v35 = vpop.f32.mrb[7].mxu1 }
 0x288   : > { %v3811_v3 = vadd.f32 %v3810_v6, %v5272_v13  ;;  %v3818_v2 = vadd.f32 %v3372_v37, %v5341_v12 }
 0x28a   : > { %v3812_v53 = vadd.f32 %v3811_v3, %v2725_v22  ;;  %v3819_v0 = vadd.f32 %v3818_v2, %v5277_v44  ;;  %v3373_v16 = vpop.f32.mrb[108].mxu0 }
 0x28b   : > { %v3767_v40 = vpop.f32.mrb[8].mxu1  ;;  %v3374_v5 = vpop.f32.mrb[109].mxu0 }
 0x28c   : > { %2872 = vst.msk [vmem:[%s5453_s10 + $0x20] sm:$0xff] %vm333_vm2, %v3812_v53  ;;  %v3820_v46 = vadd.f32 %v3819_v0, %v2728_v35  ;;  %v3375_v11 = vadd.f32 %v3374_v5, %v3373_v16  ;;  %v2741_v9 = vpop.f32.mrb[9].mxu1  ;;  %v3376_v1 = vpop.f32.mrb[110].mxu0 }
 0x28d   : > { %v3768_v57 = vpop.f32.mrb[10].mxu1  ;;  %v3377_v42 = vpop.f32.mrb[111].mxu0 }
 0x28e   : > { %2873 = vst.msk [vmem:[%s5453_s10 + $0x28] sm:$0xff] %vm333_vm2, %v3820_v46  ;;  %v3806_v13 = vadd.f32 %v3375_v11, %v5330_v41  ;;  %v3378_v12 = vadd.f32 %v3377_v42, %v3376_v1  ;;  %v2744_v56 = vpop.f32.mrb[11].mxu1 }
 0x290   : > { %v3807_v44 = vadd.f32 %v3806_v13, %v5282_v60  ;;  %v3814_v28 = vadd.f32 %v3378_v12, %v5336_v34 }
 0x292   : > { %v3808_v29 = vadd.f32 %v3807_v44, %v3763_v59  ;;  %v3815_v22 = vadd.f32 %v3814_v28, %v5287_v38  ;;  %v3379_v39 = vpop.f32.mrb[112].mxu0 }
 0x293   : > { %v5479_v58 = vpop.f32.mrb[12].mxu1  ;;  %v3380_v6 = vpop.f32.mrb[113].mxu0 }
 0x294   : > { %2874 = vst.msk [vmem:[%s5453_s10 + $0x30] sm:$0xff] %vm333_vm2, %v3808_v29  ;;  %v3816_v37 = vadd.f32 %v3815_v22, %v3764_v25  ;;  %v3381_v35 = vadd.f32 %v3380_v6, %v3379_v39  ;;  %v2757_v41 = vpop.f32.mrb[13].mxu1  ;;  %v3382_v3 = vpop.f32.mrb[114].mxu0 }
 0x295   : > { %v5483_v2 = vpop.f32.mrb[14].mxu1  ;;  %v3383_v53 = vpop.f32.mrb[115].mxu0 }
 0x296   : > { %2875 = vst.msk [vmem:[%s5453_s10 + $0x38] sm:$0xff] %vm333_vm2, %v3816_v37  ;;  %v3826_v60 = vadd.f32 %v3381_v35, %v5349_v61  ;;  %v3384_v34 = vadd.f32 %v3383_v53, %v3382_v3  ;;  %v2760_v38 = vpop.f32.mrb[15].mxu1 }
 0x298   : > { %v3827_v59 = vadd.f32 %v3826_v60, %v5291_v18  ;;  %v3834_v0 = vadd.f32 %v3384_v34, %v5357_v51 }
 0x29a   : > { %v3828_v16 = vadd.f32 %v3827_v59, %v2741_v9  ;;  %v3835_v25 = vadd.f32 %v3834_v0, %v5295_v10  ;;  %v3385_v5 = vpop.f32.mrb[116].mxu0 }
 0x29b   : > { %v5491_v46 = vpop.f32.mrb[16].mxu1  ;;  %v3386_v11 = vpop.f32.mrb[117].mxu0 }
 0x29c   : > { %2876 = vst.msk [vmem:[%s5453_s10 + $0x40] sm:$0xff] %vm333_vm2, %v3828_v16  ;;  %v3836_v1 = vadd.f32 %v3835_v25, %v2744_v56  ;;  %v3387_v42 = vadd.f32 %v3386_v11, %v3385_v5  ;;  %v5495_v61 = vpop.f32.mrb[17].mxu1  ;;  %v3388_v13 = vpop.f32.mrb[118].mxu0 }
 0x29d   : > { %v5497_v12 = vpop.f32.mrb[18].mxu1  ;;  %v3389_v18 = vpop.f32.mrb[119].mxu0 }
 0x29e   : > { %2877 = vst.msk [vmem:[%s5453_s10 + $0x48] sm:$0xff] %vm333_vm2, %v3836_v1  ;;  %v3822_v51 = vadd.f32 %v3387_v42, %v5346_v17  ;;  %v3390_v10 = vadd.f32 %v3389_v18, %v3388_v13  ;;  %v2776_v9 = vpop.f32.mrb[19].mxu1 }
 0x2a0   : > { %v3823_v44 = vadd.f32 %v3822_v51, %v5299_v47  ;;  %v3830_v28 = vadd.f32 %v3390_v10, %v5352_v20 }
 0x2a2   : > { %v3824_v56 = vadd.f32 %v3823_v44, %v3767_v40  ;;  %v3831_v29 = vadd.f32 %v3830_v28, %v5303_v45  ;;  %v3391_v22 = vpop.f32.mrb[120].mxu0 }
 0x2a3   : > { %v5505_v39 = vpop.f32.mrb[20].mxu1  ;;  %v3392_v6 = vpop.f32.mrb[121].mxu0 }
 0x2a4   : > { %2878 = vst.msk [vmem:[%s5453_s10 + $0x50] sm:$0xff] %vm333_vm2, %v3824_v56  ;;  %v3832_v37 = vadd.f32 %v3831_v29, %v3768_v57  ;;  %v3393_v35 = vadd.f32 %v3392_v6, %v3391_v22  ;;  %v5509_v17 = vpop.f32.mrb[21].mxu1  ;;  %v3394_v3 = vpop.f32.mrb[122].mxu0 }
 0x2a5   : > { %v5511_v53 = vpop.f32.mrb[22].mxu1  ;;  %v3395_v47 = vpop.f32.mrb[123].mxu0 }
 0x2a6   : > { %2879 = vst.msk [vmem:[%s5453_s10 + $0x58] sm:$0xff] %vm333_vm2, %v3832_v37  ;;  %v3842_v20 = vadd.f32 %v3393_v35, %v5365_v23  ;;  %v3396_v45 = vadd.f32 %v3395_v47, %v3394_v3  ;;  %v5516_v40 = vpop.f32.mrb[23].mxu1  ;;  %v5655_v3 = vld [vmem:[#allocation3_spill] sm:$0xff] }
 0x2a8   : > { %v3843_v60 = vadd.f32 %v3842_v20, %v5307_v14  ;;  %v3850_v57 = vadd.f32 %v3396_v45, %v5373_v27 }
 0x2aa   : > { %v3844_v34 = vadd.f32 %v3843_v60, %v2757_v41  ;;  %v3851_v59 = vadd.f32 %v3850_v57, %v5311_v50  ;;  %v3397_v0 = vpop.f32.mrb[124].mxu0 }
 0x2ab   : > { %v5521_v16 = vpop.f32.mrb[24].mxu1  ;;  %v3398_v25 = vpop.f32.mrb[125].mxu0 }
 0x2ac   : > { %2880 = vst.msk [vmem:[%s5453_s10 + $0x60] sm:$0xff] %vm333_vm2, %v3844_v34  ;;  %v3852_v5 = vadd.f32 %v3851_v59, %v2760_v38  ;;  %v3399_v11 = vadd.f32 %v3398_v25, %v3397_v0  ;;  %v5525_v23 = vpop.f32.mrb[25].mxu1  ;;  %v3400_v1 = vpop.f32.mrb[126].mxu0 }
 0x2ad   : > { %v5527_v42 = vpop.f32.mrb[26].mxu1  ;;  %v3401_v14 = vpop.f32.mrb[127].mxu0 }
 0x2ae   : > { %2881 = vst.msk [vmem:[%s5453_s10 + $0x68] sm:$0xff] %vm333_vm2, %v3852_v5  ;;  %v3838_v27 = vadd.f32 %v3399_v11, %v5362_v43  ;;  %v3402_v50 = vadd.f32 %v3401_v14, %v3400_v1  ;;  %v5532_v41 = vpop.f32.mrb[27].mxu1  ;;  %v5657_v5 = vld [vmem:[#allocation5_spill] sm:$0xff] }
 0x2b0   : > { %v3839_v13 = vadd.f32 %v3838_v27, %v5322_v62  ;;  %v3846_v38 = vadd.f32 %v3402_v50, %v5368_v26 }
 0x2b2   : > { %v3840_v18 = vadd.f32 %v3839_v13, %v5479_v58  ;;  %v3847_v51 = vadd.f32 %v3846_v38, %v5327_v7  ;;  %v3403_v10 = vpop.f32.mrb[128].mxu0  ;;  %v5658_v38 = vld [vmem:[#allocation6_spill] sm:$0xff] }
 0x2b3   : > { %v5538_v44 = vpop.f32.mrb[28].mxu1  ;;  %v3404_v28 = vpop.f32.mrb[129].mxu0 }
 0x2b4   : > { %2882 = vst.msk [vmem:[%s5453_s10 + $0x70] sm:$0xff] %vm333_vm2, %v3840_v18  ;;  %v3848_v43 = vadd.f32 %v3847_v51, %v5483_v2  ;;  %v3405_v56 = vadd.f32 %v3404_v28, %v3403_v10  ;;  %v5543_v29 = vpop.f32.mrb[29].mxu1  ;;  %v3406_v22 = vpop.f32.mrb[130].mxu0  ;;  %v5659_v10 = vld [vmem:[#allocation7_spill] sm:$0xff] }
 0x2b5   : > { %v5545_v62 = vpop.f32.mrb[30].mxu1  ;;  %v3407_v26 = vpop.f32.mrb[131].mxu0 }
 0x2b6   : > { %2883 = vst.msk [vmem:[%s5453_s10 + $0x78] sm:$0xff] %vm333_vm2, %v3848_v43  ;;  %v3858_v7 = vadd.f32 %v3405_v56, %v5381_v4  ;;  %v3408_v58 = vadd.f32 %v3407_v26, %v3406_v22  ;;  %v5550_v6 = vpop.f32.mrb[31].mxu1 }
 0x2b8   : > { %v3859_v37 = vadd.f32 %v3858_v7, %v5338_v24  ;;  %v3866_v2 = vadd.f32 %v3408_v58, %v5389_v19  ;;  %v5656_v19 = vld [vmem:[#allocation4_spill] sm:$0xff] }
 0x2b9   : > { %v5660_v58 = vld [vmem:[#allocation8_spill] sm:$0xff] }
 0x2ba   : > { %v3860_v35 = vadd.f32 %v3859_v37, %v5495_v61  ;;  %v3867_v47 = vadd.f32 %v3866_v2, %v5655_v3  ;;  %v3409_v20 = vpop.f32.mrb[132].mxu0 }
 0x2bb   : > { %v3410_v45 = vpop.f32.mrb[133].mxu0 }
 0x2bc   : > { %2884 = vst.msk [vmem:[%s5453_s10 + $0x80] sm:$0xff] %vm333_vm2, %v3860_v35  ;;  %v3868_v60 = vadd.f32 %v3867_v47, %v2776_v9  ;;  %v3411_v57 = vadd.f32 %v3410_v45, %v3409_v20  ;;  %v3412_v34 = vpop.f32.mrb[134].mxu0  ;;  %v5661_v35 = vld [vmem:[#allocation9_spill] sm:$0xff] }
 0x2bd   : > { %v3413_v4 = vpop.f32.mrb[135].mxu0 }
 0x2be   : > { %2885 = vst.msk [vmem:[%s5453_s10 + $0x88] sm:$0xff] %vm333_vm2, %v3868_v60  ;;  %v3854_v24 = vadd.f32 %v3411_v57, %v5378_v33  ;;  %v3414_v59 = vadd.f32 %v3413_v4, %v3412_v34 }
 0x2c0   : > { %v3855_v0 = vadd.f32 %v3854_v24, %v5656_v19  ;;  %v3862_v61 = vadd.f32 %v3414_v59, %v5384_v63  ;;  %v5662_v24 = vld [vmem:[#allocation10_spill] sm:$0xff] }
 0x2c2   : > { %v3856_v25 = vadd.f32 %v3855_v0, %v5491_v46  ;;  %v3863_v11 = vadd.f32 %v3862_v61, %v5657_v5  ;;  %v3415_v1 = vpop.f32.mrb[136].mxu0 }
 0x2c3   : > { %v3416_v9 = vpop.f32.mrb[137].mxu0 }
 0x2c4   : > { %2886 = vst.msk [vmem:[%s5453_s10 + $0x90] sm:$0xff] %vm333_vm2, %v3856_v25  ;;  %v3864_v14 = vadd.f32 %v3863_v11, %v5497_v12  ;;  %v3417_v27 = vadd.f32 %v3416_v9, %v3415_v1  ;;  %v3418_v50 = vpop.f32.mrb[138].mxu0  ;;  %v5664_v11 = vld [vmem:[#allocation12_spill] sm:$0xff] }
 0x2c5   : > { %v3419_v33 = vpop.f32.mrb[139].mxu0 }
 0x2c6   : > { %2887 = vst.msk [vmem:[%s5453_s10 + $0x98] sm:$0xff] %vm333_vm2, %v3864_v14  ;;  %v3874_v13 = vadd.f32 %v3417_v27, %v5397_v8  ;;  %v3420_v63 = vadd.f32 %v3419_v33, %v3418_v50  ;;  %v5665_v14 = vld [vmem:[#allocation13_spill] sm:$0xff] }
 0x2c8   : > { %v3875_v46 = vadd.f32 %v3874_v13, %v5658_v38  ;;  %v3882_v18 = vadd.f32 %v3420_v63, %v5405_v54 }
 0x2ca   : > { %v3876_v51 = vadd.f32 %v3875_v46, %v5509_v17  ;;  %v3883_v28 = vadd.f32 %v3882_v18, %v5659_v10  ;;  %v3421_v43 = vpop.f32.mrb[140].mxu0 }
 0x2cb   : > { %v3422_v12 = vpop.f32.mrb[141].mxu0 }
 0x2cc   : > { %2888 = vst.msk [vmem:[%s5453_s10 + $0xa0] sm:$0xff] %vm333_vm2, %v3876_v51  ;;  %v3884_v56 = vadd.f32 %v3883_v28, %v5516_v40  ;;  %v3423_v22 = vadd.f32 %v3422_v12, %v3421_v43  ;;  %v3424_v26 = vpop.f32.mrb[142].mxu0  ;;  %v5667_v28 = vld [vmem:[#allocation17_spill] sm:$0xff] }
 0x2cd   : > { %v3425_v8 = vpop.f32.mrb[143].mxu0 }
 0x2ce   : > { %2889 = vst.msk [vmem:[%s5453_s10 + $0xa8] sm:$0xff] %vm333_vm2, %v3884_v56  ;;  %v3870_v7 = vadd.f32 %v3423_v22, %v5394_v55  ;;  %v3426_v54 = vadd.f32 %v3425_v8, %v3424_v26 }
 0x2d0   : > { %v3871_v17 = vadd.f32 %v3870_v7, %v5660_v58  ;;  %v3878_v37 = vadd.f32 %v3426_v54, %v5400_v36  ;;  %v5669_v54 = vld [vmem:[#allocation16_spill] sm:$0xff] }
 0x2d2   : > { %v3872_v2 = vadd.f32 %v3871_v17, %v5505_v39  ;;  %v3879_v3 = vadd.f32 %v3878_v37, %v5661_v35  ;;  %v3427_v47 = vpop.f32.mrb[144].mxu0 }
 0x2d3   : > { %v3428_v40 = vpop.f32.mrb[145].mxu0 }
 0x2d4   : > { %2890 = vst.msk [vmem:[%s5453_s10 + $0xb0] sm:$0xff] %vm333_vm2, %v3872_v2  ;;  %v3880_v20 = vadd.f32 %v3879_v3, %v5511_v53  ;;  %v3429_v45 = vadd.f32 %v3428_v40, %v3427_v47  ;;  %v3430_v60 = vpop.f32.mrb[146].mxu0 }
 0x2d5   : > { %v3431_v55 = vpop.f32.mrb[147].mxu0 }
 0x2d6   : > { %2891 = vst.msk [vmem:[%s5453_s10 + $0xb8] sm:$0xff] %vm333_vm2, %v3880_v20  ;;  %v3890_v57 = vadd.f32 %v3429_v45, %v5413_v30  ;;  %v3432_v36 = vadd.f32 %v3431_v55, %v3430_v60 }
 0x2d8   : > { %v3891_v39 = vadd.f32 %v3890_v57, %v5402_v49  ;;  %v3898_v34 = vadd.f32 %v3432_v36, %v5421_v48  ;;  %v5663_v49 = vld [vmem:[#allocation11_spill] sm:$0xff] }
 0x2da   : > { %v3892_v4 = vadd.f32 %v3891_v39, %v5525_v23  ;;  %v3899_v59 = vadd.f32 %v3898_v34, %v5662_v24  ;;  %v3433_v19 = vpop.f32.mrb[148].mxu0 }
 0x2db   : > { %v3434_v53 = vpop.f32.mrb[149].mxu0 }
 0x2dc   : > { %2892 = vst.msk [vmem:[%s5453_s10 + $0xc0] sm:$0xff] %vm333_vm2, %v3892_v4  ;;  %v3900_v0 = vadd.f32 %v3899_v59, %v5532_v41  ;;  %v3435_v61 = vadd.f32 %v3434_v53, %v3433_v19  ;;  %v3436_v25 = vpop.f32.mrb[150].mxu0 }
 0x2dd   : > { %v3437_v30 = vpop.f32.mrb[151].mxu0 }
 0x2de   : > { %2893 = vst.msk [vmem:[%s5453_s10 + $0xc8] sm:$0xff] %vm333_vm2, %v3900_v0  ;;  %v3886_v5 = vadd.f32 %v3435_v61, %v5663_v49  ;;  %v3438_v48 = vadd.f32 %v3437_v30, %v3436_v25 }
 0x2e0   : > { %v3887_v23 = vadd.f32 %v3886_v5, %v5418_v32  ;;  %v3894_v1 = vadd.f32 %v3438_v48, %v5664_v11  ;;  %v5666_v32 = vld [vmem:[#allocation15_spill] sm:$0xff] }
 0x2e2   : > { %v3888_v9 = vadd.f32 %v3887_v23, %v5521_v16  ;;  %v3895_v27 = vadd.f32 %v3894_v1, %v5665_v14  ;;  %v3439_v50 = vpop.f32.mrb[152].mxu0 }
 0x2e3   : > { %v3440_v41 = vpop.f32.mrb[153].mxu0 }
 0x2e4   : > { %2894 = vst.msk [vmem:[%s5453_s10 + $0xd0] sm:$0xff] %vm333_vm2, %v3888_v9  ;;  %v3896_v33 = vadd.f32 %v3895_v27, %v5527_v42  ;;  %v3441_v13 = vadd.f32 %v3440_v41, %v3439_v50  ;;  %v3442_v63 = vpop.f32.mrb[154].mxu0 }
 0x2e5   : > { %v3443_v38 = vpop.f32.mrb[155].mxu0 }
 0x2e6   : > { %2895 = vst.msk [vmem:[%s5453_s10 + $0xd8] sm:$0xff] %vm333_vm2, %v3896_v33  ;;  %v3906_v46 = vadd.f32 %v3441_v13, %v5666_v32  ;;  %v3444_v18 = vadd.f32 %v3443_v38, %v3442_v63 }
 0x2e8   : > { %v3907_v16 = vadd.f32 %v3906_v46, %v5434_v21  ;;  %v3914_v51 = vadd.f32 %v3444_v18, %v5437_v31  ;;  %v5668_v21 = vld [vmem:[#allocation14_spill] sm:$0xff] }
 0x2ea   : > { %v3908_v10 = vadd.f32 %v3907_v16, %v5543_v29  ;;  %v3915_v43 = vadd.f32 %v3914_v51, %v5667_v28  ;;  %v3445_v12 = vpop.f32.mrb[156].mxu0 }
 0x2eb   : > { %v3446_v42 = vpop.f32.mrb[157].mxu0 }
 0x2ec   : > { %2896 = vst.msk [vmem:[%s5453_s10 + $0xe0] sm:$0xff] %vm333_vm2, %v3908_v10  ;;  %v3916_v56 = vadd.f32 %v3915_v43, %v5550_v6  ;;  %v3447_v22 = vadd.f32 %v3446_v42, %v3445_v12  ;;  %v3448_v26 = vpop.f32.mrb[158].mxu0 }
 0x2ed   : > { %v3449_v8 = vpop.f32.mrb[159].mxu0 }
 0x2ee   : > { %2897 = vst.msk [vmem:[%s5453_s10 + $0xe8] sm:$0xff] %vm333_vm2, %v3916_v56  ;;  %v3902_v7 = vadd.f32 %v3447_v22, %v5668_v21  ;;  %v3450_v31 = vadd.f32 %v3449_v8, %v3448_v26 }
 0x2f0   : > { %v3903_v29 = vadd.f32 %v3902_v7, %v5441_v52  ;;  %v3910_v58 = vadd.f32 %v3450_v31, %v5669_v54 }
 0x2f2   : > { %v3904_v17 = vadd.f32 %v3903_v29, %v5538_v44  ;;  %v3911_v37 = vadd.f32 %v3910_v58, %v5444_v15 }
 0x2f4   : > { %2898 = vst.msk [vmem:[%s5453_s10 + $0xf0] sm:$0xff] %vm333_vm2, %v3904_v17  ;;  %v3912_v6 = vadd.f32 %v3911_v37, %v5545_v62 }
 0x2f6   : > { %2899 = vst.msk [vmem:[%s5453_s10 + $0xf8] sm:$0xff] %vm333_vm2, %v3912_v6 }
 0x2f7 PF: > { %s16_s21 = sadd.s32 1, %s4072_s21  }
 0x2f8   : > { %p13_p4 = scmp.ge.s32.totalorder %s16_s21, 4  }
 0x2fa   :  { %15 = sbr.rel (!%p13_p4) target bundleno = 1 (0x1), region = 86 }

// kernel: adain_resblock_forward.2
= control target key start
LH: loop header
LB: loop body
LE: loop exit
PB: predicated region body
PF: predicated region fallthrough
CT: control target
= control target key end

     0   :  { %s3641_s15 = smov 0   ;;  %s5099_s0 = inlined_call_operand.vmem [shape: f32[2,16,16,4], index: 0, kind: input, shape index: {}]   ;;  %s5100_s1 = inlined_call_operand.vmem [shape: f32[2,1,1,4], index: 1, kind: input, shape index: {}]   ;;  %s5101_s2 = inlined_call_operand.vmem [shape: f32[2,1,1,4], index: 2, kind: input, shape index: {}]   ;;  %s5102_s3 = inlined_call_operand.vmem [shape: bf16[3,384,128], index: 3, kind: input, shape index: {}]   ;;  %s5103_s4 = inlined_call_operand.vmem [shape: f32[2,256,8], index: 4, kind: output, shape index: {}]  }
   0x1 LB: > { %s2605_s16 = sadd.s32 4294967295, %s3613_s15   ;;  %p2609_p0 = scmp.ge.s32.totalorder %s3613_s15, 1  ;;  %s3613_s15 = sphi %s3641_s15, %s14_s15  }
   0x2   : > { %p178_p1 = scmp.lt.s32.totalorder %s3613_s15, 3 }
   0x4   : > { %p179_p2 = pnand %p2609_p0, %p178_p1 }
   0x6   : > { %182 = sbr.rel (%p179_p2) target bundleno = 724 (0x2d4), region = 36 }
   0xd   : > { %v3524_v0 = vld [vmem:[%s5102_s3 + $0x100] sm:$0xff]   ;;  %v3527_v3 = vld [vmem:[%s5102_s3 + $0x108] sm:$0xff]   ;;  %v3530_v6 = vld [vmem:[%s5102_s3 + $0x110] sm:$0xff]   ;;  %p210_p3 = scmp.lt.s32.totalorder %s2605_s16, 1  ;;  %vm259_vm0 = vcmask 31744  }
   0xe   : > { %v3525_v1 = vld [vmem:[%s5102_s3 + $0xc0] sm:$0xff]   ;;  %2787 = vmatprep.subr.bf16.mxu0 %v3524_v0  ;;  %v3528_v4 = vld [vmem:[%s5102_s3 + $0xc8] sm:$0xff]   ;;  %v3531_v7 = vld [vmem:[%s5102_s3 + $0xd0] sm:$0xff]  }
   0xf   : > { %v3658_v2 = vld [vmem:[%s5102_s3 + $0x140] sm:$0xff]   ;;  %2788 = vmatpush3.bf16.msra.mxu0 %v3525_v1  ;;  %v3529_v5 = vld [vmem:[%s5102_s3 + $0x148] sm:$0xff]   ;;  %v3532_v8 = vld [vmem:[%s5102_s3 + $0x150] sm:$0xff]   ;;  %s5107_s16 = smov (!%p210_p3, %s2605_s16), 1 }
  0x10   : > { %3339 = vmatprep.subr.bf16.mxu1 %v3658_v2  ;;  %2789 = vmatprep.subr.bf16.mxu0 %v3527_v3  ;;  %v3533_v9 = vld [vmem:[%s5102_s3 + $0x118] sm:$0xff]   ;;  %v3536_v12 = vld [vmem:[%s5102_s3 + $0x120] sm:$0xff]   ;;  %v3539_v15 = vld [vmem:[%s5102_s3 + $0x128] sm:$0xff]   ;;  %s2785_s27 = sshll.u32 %s5107_s16, 8  ;;  %s217_s25 = scalar_lea.vmem %s5100_s1, %s5107_s16 }
  0x11   : > { %3347 = vmatpush3.bf16.msra.mxu1 %v3658_v2  ;;  %v3534_v10 = vld [vmem:[%s5102_s3 + $0xd8] sm:$0xff]   ;;  %v3538_v13 = vld [vmem:[%s5102_s3 + $0x160] sm:$0xff]   ;;  %v3541_v16 = vld [vmem:[%s5102_s3 + $0x168] sm:$0xff]   ;;  %s3725_s10 = scalar_lea.vmem %s5099_s0, %s2785_s27  ;;  %s220_s29 = scalar_lea.vmem %s5101_s2, %s5107_s16 }
  0x12   : > { %3340 = vmatprep.subr.bf16.mxu1 %v3529_v5  ;;  %v3535_v11 = vld [vmem:[%s5102_s3 + $0x158] sm:$0xff]   ;;  %v3537_v14 = vld [vmem:[%s5102_s3 + $0xe0] sm:$0xff]   ;;  %v3540_v17 = vld [vmem:[%s5102_s3 + $0xe8] sm:$0xff]   ;;  %s4984_s26 = scalar_lea.vmem %s5103_s4, %s2785_s27 }
  0x13   : > { %2790 = vmatpush3.bf16.msra.mxu0 %v3528_v4  ;;  %v3542_v18 = vld [vmem:[%s5102_s3 + $0x130] sm:$0xff]   ;;  %v3545_v21 = vld [vmem:[%s5102_s3 + $0x138] sm:$0xff]   ;;  %v3734_v22 = vld [vmem:[%s3725_s10] sm:$0xff] }
  0x14   : > { %2791 = vmatprep.subr.bf16.mxu0 %v3530_v6  ;;  %v3543_v19 = vld [vmem:[%s5102_s3 + $0xf0] sm:$0xff]   ;;  %v3737_v23 = vld [vmem:[%s3725_s10 + $0x8] sm:$0xff]  ;;  %v3743_v25 = vld [vmem:[%s3725_s10 + $0x18] sm:$0xff]  ;;  %v260_v26 = vsel %vm259_vm0, %v3734_v22, 0.0 }
  0x15   : > { %3348 = vmatpush3.bf16.msra.mxu1 %v3529_v5  ;;  %v3544_v20 = vld [vmem:[%s5102_s3 + $0x170] sm:$0xff]   ;;  %v261_v27 = vsel %vm259_vm0, %v3737_v23, 0.0  ;;  %v3546_v29 = vld [vmem:[%s5102_s3 + $0xf8] sm:$0xff]   ;;  %v3758_v31 = vld [vmem:[%s3725_s10 + $0x20] sm:$0xff]  ;;  %v265_v36 = vsel %vm259_vm0, %v3743_v25, 0.0 }
  0x16   : > { %3341 = vmatprep.subr.bf16.mxu1 %v3532_v8  ;;  %v3740_v24 = vld [vmem:[%s3725_s10 + $0x10] sm:$0xff]  ;;  %v3547_v30 = vld [vmem:[%s5102_s3 + $0x178] sm:$0xff]   ;;  %v262_v32 = vadd.f32 %v261_v27, %v260_v26  ;;  %v3761_v33 = vld [vmem:[%s3725_s10 + $0x28] sm:$0xff]  ;;  %v267_v44 = vsel %vm259_vm0, %v3758_v31, 0.0 }
  0x17   : > { %2792 = vmatpush3.bf16.msra.mxu0 %v3531_v7  ;;  %v263_v28 = vsel %vm259_vm0, %v3740_v24, 0.0  ;;  %v3764_v34 = vld [vmem:[%s3725_s10 + $0x30] sm:$0xff]  ;;  %v3767_v35 = vld [vmem:[%s3725_s10 + $0x38] sm:$0xff]  ;;  %v3772_v37 = vld [vmem:[%s3725_s10 + $0x40] sm:$0xff]  ;;  %v269_v49 = vsel %vm259_vm0, %v3761_v33, 0.0 }
  0x18   : > { %2793 = vmatprep.subr.bf16.mxu0 %v3533_v9  ;;  %v3775_v38 = vld [vmem:[%s3725_s10 + $0x48] sm:$0xff]  ;;  %v3778_v39 = vld [vmem:[%s3725_s10 + $0x50] sm:$0xff]  ;;  %v264_v40 = vadd.f32 %v263_v28, %v262_v32  ;;  %v3781_v41 = vld [vmem:[%s3725_s10 + $0x58] sm:$0xff]  ;;  %v271_v50 = vsel %vm259_vm0, %v3764_v34, 0.0  ;;  %v273_v54 = vsel %vm259_vm0, %v3767_v35, 0.0  ;;  %v275_v55 = vsel %vm259_vm0, %v3772_v37, 0.0 }
  0x19   : > { %3349 = vmatpush3.bf16.msra.mxu1 %v3532_v8  ;;  %v3784_v42 = vld [vmem:[%s3725_s10 + $0x60] sm:$0xff]  ;;  %v3787_v43 = vld [vmem:[%s3725_s10 + $0x68] sm:$0xff]  ;;  %v3792_v45 = vld [vmem:[%s3725_s10 + $0x70] sm:$0xff]  ;;  %v277_v56 = vsel %vm259_vm0, %v3775_v38, 0.0  ;;  %v279_v60 = vsel %vm259_vm0, %v3778_v39, 0.0  ;;  %v281_v61 = vsel %vm259_vm0, %v3781_v41, 0.0 }
  0x1a   : > { %3342 = vmatprep.subr.bf16.mxu1 %v3535_v11  ;;  %v3795_v46 = vld [vmem:[%s3725_s10 + $0x78] sm:$0xff]  ;;  %v3798_v47 = vld [vmem:[%s3725_s10 + $0x80] sm:$0xff]  ;;  %v266_v48 = vadd.f32 %v265_v36, %v264_v40  ;;  %v3805_v51 = vld [vmem:[%s3725_s10 + $0x88] sm:$0xff]  ;;  %v283_v62 = vsel %vm259_vm0, %v3784_v42, 0.0  ;;  %v285_v63 = vsel %vm259_vm0, %v3787_v43, 0.0  ;;  %v287_v0 = vsel %vm259_vm0, %v3792_v45, 0.0 }
  0x1b   : > { %2794 = vmatpush3.bf16.msra.mxu0 %v3534_v10  ;;  %v3808_v52 = vld [vmem:[%s3725_s10 + $0x90] sm:$0xff]  ;;  %v3811_v53 = vld [vmem:[%s3725_s10 + $0x98] sm:$0xff]  ;;  %v3820_v57 = vld [vmem:[%s3725_s10 + $0xa0] sm:$0xff]  ;;  %v289_v1 = vsel %vm259_vm0, %v3795_v46, 0.0  ;;  %v291_v3 = vsel %vm259_vm0, %v3798_v47, 0.0  ;;  %v293_v5 = vsel %vm259_vm0, %v3805_v51, 0.0 }
  0x1c   : > { %2795 = vmatprep.subr.bf16.mxu0 %v3536_v12  ;;  %v3823_v58 = vld [vmem:[%s3725_s10 + $0xa8] sm:$0xff]  ;;  %v268_v59 = vadd.f32 %v267_v44, %v266_v48  ;;  %v297_v6 = vsel %vm259_vm0, %v3811_v53, 0.0  ;;  %v299_v7 = vsel %vm259_vm0, %v3820_v57, 0.0  ;;  %v3854_v27 = vld [vmem:[%s3725_s10 + $0xb8] sm:$0xff]  ;;  %v3859_v32 = vld [vmem:[%s3725_s10 + $0xc0] sm:$0xff] }
  0x1d   : > { %3350 = vmatpush3.bf16.msra.mxu1 %v3535_v11  ;;  %v301_v8 = vsel %vm259_vm0, %v3823_v58, 0.0  ;;  %v305_v40 = vsel %vm259_vm0, %v3854_v27, 0.0  ;;  %v3864_v44 = vld [vmem:[%s3725_s10 + $0xc8] sm:$0xff] }
  0x1e   : > { %3343 = vmatprep.subr.bf16.mxu1 %v3538_v13  ;;  %v270_v4 = vadd.f32 %v269_v49, %v268_v59  ;;  %v307_v49 = vsel %vm259_vm0, %v3859_v32, 0.0 }
  0x1f   : > { %2796 = vmatpush3.bf16.msra.mxu0 %v3537_v14 }
  0x20   : > { %2797 = vmatprep.subr.bf16.mxu0 %v3539_v15  ;;  %v272_v9 = vadd.f32 %v271_v50, %v270_v4  ;;  %v3869_v50 = vld [vmem:[%s3725_s10 + $0xd0] sm:$0xff] }
  0x21   : > { %3351 = vmatpush3.bf16.msra.mxu1 %v3538_v13  ;;  %v3889_v4 = vld [vmem:[%s3725_s10 + $0xf0] sm:$0xff] }
  0x22   : > { %3344 = vmatprep.subr.bf16.mxu1 %v3541_v16  ;;  %v274_v10 = vadd.f32 %v273_v54, %v272_v9 }
  0x23   : > { %2798 = vmatpush3.bf16.msra.mxu0 %v3540_v17 }
  0x24   : > { %2799 = vmatprep.subr.bf16.mxu0 %v3542_v18  ;;  %v276_v11 = vadd.f32 %v275_v55, %v274_v10  ;;  %v309_v55 = vsel %vm259_vm0, %v3864_v44, 0.0 }
  0x25   : > { %3352 = vmatpush3.bf16.msra.mxu1 %v3541_v16 }
  0x26   : > { %3345 = vmatprep.subr.bf16.mxu1 %v3544_v20  ;;  %v278_v12 = vadd.f32 %v277_v56, %v276_v11  ;;  %v3874_v56 = vld [vmem:[%s3725_s10 + $0xd8] sm:$0xff] }
  0x27   : > { %2800 = vmatpush3.bf16.msra.mxu0 %v3543_v19 }
  0x28   : > { %2801 = vmatprep.subr.bf16.mxu0 %v3545_v21  ;;  %v280_v13 = vadd.f32 %v279_v60, %v278_v12  ;;  %v3851_v21 = vld [vmem:[%s3725_s10 + $0xb0] sm:$0xff]  ;;  %v311_v60 = vsel %vm259_vm0, %v3869_v50, 0.0 }
  0x29   : > { %3353 = vmatpush3.bf16.msra.mxu1 %v3544_v20 }
  0x2a   : > { %3346 = vmatprep.subr.bf16.mxu1 %v3547_v30  ;;  %v282_v14 = vadd.f32 %v281_v61, %v280_v13  ;;  %v3879_v61 = vld [vmem:[%s3725_s10 + $0xe0] sm:$0xff] }
  0x2b   : > { %2802 = vmatpush3.bf16.msra.mxu0 %v3546_v29 }
  0x2c   : > { %3195 = vmatprep.subr.bf16.mxu0 %v3658_v2  ;;  %v295_v2 = vsel %vm259_vm0, %v3808_v52, 0.0  ;;  %v284_v15 = vadd.f32 %v283_v62, %v282_v14  ;;  %v3615_v14 = vmov 0.0  }
  0x2d   : > { %3354 = vmatpush3.bf16.msra.mxu1 %v3547_v30  ;;  %v303_v30 = vsel %vm259_vm0, %v3851_v21, 0.0  ;;  %677 = vst [vmem:[#allocation2 + $0x18] sm:$0xff] %v3615_v14  ;;  %678 = vst [vmem:[#allocation2 + $0x20] sm:$0xff] %v3615_v14 }
  0x2e   : > { %v286_v16 = vadd.f32 %v285_v63, %v284_v15  ;;  %v313_v63 = vsel %vm259_vm0, %v3874_v56, 0.0  ;;  %679 = vst [vmem:[#allocation2 + $0x28] sm:$0x3] %v3615_v14  ;;  %674 = vst [vmem:[#allocation2] sm:$0xff] %v3615_v14 }
  0x2f   : > { %675 = vst [vmem:[#allocation2 + $0x8] sm:$0xff] %v3615_v14  ;;  %676 = vst [vmem:[#allocation2 + $0x10] sm:$0x3] %v3615_v14 }
  0x30   : > { %v288_v17 = vadd.f32 %v287_v0, %v286_v16  ;;  %v3884_v0 = vld [vmem:[%s3725_s10 + $0xe8] sm:$0xff]  ;;  %680 = vst [vmem:[#allocation2 + $0x30] sm:$0xff] %v3615_v14  ;;  %681 = vst [vmem:[#allocation2 + $0x38] sm:$0xff] %v3615_v14 }
  0x31   : > { %682 = vst [vmem:[#allocation2 + $0x40] sm:$0x3] %v3615_v14  ;;  %683 = vst [vmem:[#allocation2 + $0x48] sm:$0xff] %v3615_v14 }
  0x32   : > { %v290_v18 = vadd.f32 %v289_v1, %v288_v17  ;;  %684 = vst [vmem:[#allocation2 + $0x50] sm:$0xff] %v3615_v14  ;;  %685 = vst [vmem:[#allocation2 + $0x58] sm:$0x3] %v3615_v14 }
  0x33   : > { %686 = vst [vmem:[#allocation2 + $0x60] sm:$0xff] %v3615_v14  ;;  %687 = vst [vmem:[#allocation2 + $0x68] sm:$0xff] %v3615_v14 }
  0x34   : > { %v292_v19 = vadd.f32 %v291_v3, %v290_v18  ;;  %v315_v3 = vsel %vm259_vm0, %v3879_v61, 0.0  ;;  %688 = vst [vmem:[#allocation2 + $0x70] sm:$0x3] %v3615_v14  ;;  %689 = vst [vmem:[#allocation2 + $0x78] sm:$0xff] %v3615_v14 }
  0x35   : > { %690 = vst [vmem:[#allocation2 + $0x80] sm:$0xff] %v3615_v14  ;;  %691 = vst [vmem:[#allocation2 + $0x88] sm:$0x3] %v3615_v14 }
  0x36   : > { %v294_v20 = vadd.f32 %v293_v5, %v292_v19  ;;  %692 = vst [vmem:[#allocation2 + $0x90] sm:$0xff] %v3615_v14  ;;  %693 = vst [vmem:[#allocation2 + $0x98] sm:$0xff] %v3615_v14  ;;  %v3548_v19 = vld [vmem:[%s5102_s3 + $0x40] sm:$0xff]  }
  0x37   : > { %694 = vst [vmem:[#allocation2 + $0xa0] sm:$0x3] %v3615_v14  ;;  %695 = vst [vmem:[#allocation2 + $0xa8] sm:$0xff] %v3615_v14  ;;  %2923 = vmatprep.subr.bf16.mxu1 %v3548_v19 }
  0x38   : > { %v296_v26 = vadd.f32 %v295_v2, %v294_v20  ;;  %v317_v2 = vsel %vm259_vm0, %v3884_v0, 0.0  ;;  %696 = vst [vmem:[#allocation2 + $0xb0] sm:$0xff] %v3615_v14  ;;  %697 = vst [vmem:[#allocation2 + $0xb8] sm:$0x3] %v3615_v14 }
  0x39   : > { %698 = vst [vmem:[#allocation2 + $0xc0] sm:$0xff] %v3615_v14  ;;  %699 = vst [vmem:[#allocation2 + $0xc8] sm:$0xff] %v3615_v14 }
  0x3a   : > { %v298_v28 = vadd.f32 %v297_v6, %v296_v26  ;;  %v3894_v6 = vld [vmem:[%s3725_s10 + $0xf8] sm:$0xff]  ;;  %700 = vst [vmem:[#allocation2 + $0xd0] sm:$0x3] %v3615_v14  ;;  %701 = vst [vmem:[#allocation2 + $0xd8] sm:$0xff] %v3615_v14 }
  0x3b   : > { %v321_v10 = vsel %vm259_vm0, %v3894_v6, 0.0  ;;  %702 = vst [vmem:[#allocation2 + $0xe0] sm:$0xff] %v3615_v14  ;;  %703 = vst [vmem:[#allocation2 + $0xe8] sm:$0x3] %v3615_v14 }
  0x3c   : > { %v300_v29 = vadd.f32 %v299_v7, %v298_v28  ;;  %704 = vst [vmem:[#allocation2 + $0xf0] sm:$0xff] %v3615_v14  ;;  %705 = vst [vmem:[#allocation2 + $0xf8] sm:$0xff] %v3615_v14 }
  0x3d   : > { %706 = vst [vmem:[#allocation2 + $0x100] sm:$0x3] %v3615_v14  ;;  %707 = vst [vmem:[#allocation2 + $0x108] sm:$0xff] %v3615_v14 }
  0x3e   : > { %v302_v36 = vadd.f32 %v301_v8, %v300_v29  ;;  %v319_v8 = vsel %vm259_vm0, %v3889_v4, 0.0  ;;  %708 = vst [vmem:[#allocation2 + $0x110] sm:$0xff] %v3615_v14  ;;  %709 = vst [vmem:[#allocation2 + $0x118] sm:$0x3] %v3615_v14 }
  0x3f   : > { %710 = vst [vmem:[#allocation2 + $0x120] sm:$0xff] %v3615_v14  ;;  %711 = vst [vmem:[#allocation2 + $0x128] sm:$0xff] %v3615_v14 }
  0x40   : > { %v304_v48 = vadd.f32 %v303_v30, %v302_v36  ;;  %712 = vst [vmem:[#allocation2 + $0x130] sm:$0x3] %v3615_v14  ;;  %713 = vst [vmem:[#allocation2 + $0x138] sm:$0xff] %v3615_v14 }
  0x41   : > { %714 = vst [vmem:[#allocation2 + $0x140] sm:$0xff] %v3615_v14  ;;  %715 = vst [vmem:[#allocation2 + $0x148] sm:$0x3] %v3615_v14 }
  0x42   : > { %v306_v54 = vadd.f32 %v305_v40, %v304_v48  ;;  %716 = vst [vmem:[#allocation2 + $0x150] sm:$0xff] %v3615_v14  ;;  %717 = vst [vmem:[#allocation2 + $0x158] sm:$0xff] %v3615_v14 }
  0x43   : > { %718 = vst [vmem:[#allocation2 + $0x160] sm:$0x3] %v3615_v14  ;;  %719 = vst [vmem:[#allocation2 + $0x168] sm:$0xff] %v3615_v14 }
  0x44   : > { %v308_v59 = vadd.f32 %v307_v49, %v306_v54  ;;  %720 = vst [vmem:[#allocation2 + $0x170] sm:$0xff] %v3615_v14  ;;  %721 = vst [vmem:[#allocation2 + $0x178] sm:$0x3] %v3615_v14 }
  0x45   : > { %722 = vst [vmem:[#allocation2 + $0x180] sm:$0xff] %v3615_v14  ;;  %723 = vst [vmem:[#allocation2 + $0x188] sm:$0xff] %v3615_v14 }
  0x46   : > { %v310_v62 = vadd.f32 %v309_v55, %v308_v59  ;;  %724 = vst [vmem:[#allocation2 + $0x190] sm:$0x3] %v3615_v14  ;;  %725 = vst [vmem:[#allocation2 + $0x198] sm:$0xff] %v3615_v14 }
  0x47   : > { %726 = vst [vmem:[#allocation2 + $0x1a0] sm:$0xff] %v3615_v14  ;;  %727 = vst [vmem:[#allocation2 + $0x1a8] sm:$0x3] %v3615_v14 }
  0x48   : > { %v312_v1 = vadd.f32 %v311_v60, %v310_v62 }
  0x4a   : > { %v314_v5 = vadd.f32 %v313_v63, %v312_v1 }
  0x4c   : > { %v316_v7 = vadd.f32 %v315_v3, %v314_v5 }
  0x4e   : > { %v318_v9 = vadd.f32 %v317_v2, %v316_v7 }
  0x50   : > { %v320_v11 = vadd.f32 %v319_v8, %v318_v9 }
  0x52   : > { %v322_v12 = vadd.f32 %v321_v10, %v320_v11 }
  0x54   : > { %v323_v13 = vrot.slane %v322_v12, 4 }
  0x56   : > { %v324_v15 = vadd.f32 %v323_v13, %v322_v12 }
  0x58   : > { %v325_v16 = vrot.slane %v324_v15, 2 }
  0x5a   : > { %v326_v17 = vadd.f32 %v325_v16, %v324_v15 }
  0x5c   : > { %v327_v18 = vrot.slane %v326_v17, 1 }
  0x5e   : > { %v328_v20 = vadd.f32 %v327_v18, %v326_v17 }
  0x60   : > { %v3903_v26 = vmul.f32 0.00390625, %v328_v20 }
  0x62   : > { %v3907_v28 = vsub.f32 %v3734_v22, %v3903_v26  ;;  %v3911_v29 = vsub.f32 %v3737_v23, %v3903_v26  ;;  %v3915_v30 = vsub.f32 %v3740_v24, %v3903_v26  ;;  %v3919_v36 = vsub.f32 %v3743_v25, %v3903_v26 }
  0x63   : > { %v3923_v40 = vsub.f32 %v3758_v31, %v3903_v26  ;;  %v3933_v24 = vsub.f32 %v3761_v33, %v3903_v26  ;;  %v3939_v31 = vsub.f32 %v3764_v34, %v3903_v26  ;;  %v3948_v33 = vsub.f32 %v3767_v35, %v3903_v26 }
  0x64   : > { %v363_v22 = vmul.f32 %v3907_v28, %v3907_v28  ;;  %v364_v48 = vmul.f32 %v3911_v29, %v3911_v29  ;;  %v365_v23 = vmul.f32 %v3915_v30, %v3915_v30  ;;  %v366_v25 = vmul.f32 %v3919_v36, %v3919_v36 }
  0x65   : > { %v367_v49 = vmul.f32 %v3923_v40, %v3923_v40  ;;  %v368_v62 = vmul.f32 %v3933_v24, %v3933_v24  ;;  %v3955_v1 = vsub.f32 %v3772_v37, %v3903_v26  ;;  %v369_v3 = vmul.f32 %v3939_v31, %v3939_v31 }
  0x66   : > { %v395_v54 = vsel %vm259_vm0, %v363_v22, 0.0  ;;  %v396_v55 = vsel %vm259_vm0, %v364_v48, 0.0  ;;  %v398_v59 = vsel %vm259_vm0, %v365_v23, 0.0  ;;  %v400_v34 = vsel %vm259_vm0, %v366_v25, 0.0 }
  0x67   : > { %v397_v60 = vadd.f32 %v396_v55, %v395_v54  ;;  %v402_v5 = vsel %vm259_vm0, %v367_v49, 0.0  ;;  %v3962_v35 = vsub.f32 %v3775_v38, %v3903_v26  ;;  %v370_v7 = vmul.f32 %v3948_v33, %v3948_v33 }
  0x68   : > { %v404_v8 = vsel %vm259_vm0, %v368_v62, 0.0  ;;  %v3969_v37 = vsub.f32 %v3778_v39, %v3903_v26  ;;  %v371_v10 = vmul.f32 %v3955_v1, %v3955_v1  ;;  %v406_v11 = vsel %vm259_vm0, %v369_v3, 0.0 }
  0x69   : > { %v399_v63 = vadd.f32 %v398_v59, %v397_v60  ;;  %v3976_v38 = vsub.f32 %v3781_v41, %v3903_v26  ;;  %v372_v13 = vmul.f32 %v3962_v35, %v3962_v35  ;;  %v408_v14 = vsel %vm259_vm0, %v370_v7, 0.0 }
  0x6a   : > { %v3983_v39 = vsub.f32 %v3784_v42, %v3903_v26  ;;  %v373_v16 = vmul.f32 %v3969_v37, %v3969_v37  ;;  %v410_v17 = vsel %vm259_vm0, %v371_v10, 0.0  ;;  %v3990_v41 = vsub.f32 %v3787_v43, %v3903_v26 }
  0x6b   : > { %v401_v2 = vadd.f32 %v400_v34, %v399_v63  ;;  %v374_v19 = vmul.f32 %v3976_v38, %v3976_v38  ;;  %v412_v20 = vsel %vm259_vm0, %v372_v13, 0.0  ;;  %v3997_v42 = vsub.f32 %v3792_v45, %v3903_v26 }
  0x6c   : > { %v375_v48 = vmul.f32 %v3983_v39, %v3983_v39  ;;  %v414_v23 = vsel %vm259_vm0, %v373_v16, 0.0  ;;  %v4004_v43 = vsub.f32 %v3795_v46, %v3903_v26  ;;  %v376_v49 = vmul.f32 %v3990_v41, %v3990_v41 }
  0x6d   : > { %v403_v9 = vadd.f32 %v402_v5, %v401_v2  ;;  %v416_v54 = vsel %vm259_vm0, %v374_v19, 0.0  ;;  %v4011_v45 = vsub.f32 %v3798_v47, %v3903_v26  ;;  %v377_v59 = vmul.f32 %v3997_v42, %v3997_v42 }
  0x6e   : > { %v418_v60 = vsel %vm259_vm0, %v375_v48, 0.0  ;;  %v4018_v46 = vsub.f32 %v3805_v51, %v3903_v26  ;;  %v378_v34 = vmul.f32 %v4004_v43, %v4004_v43  ;;  %v420_v63 = vsel %vm259_vm0, %v376_v49, 0.0 }
  0x6f   : > { %v405_v12 = vadd.f32 %v404_v8, %v403_v9  ;;  %v4025_v47 = vsub.f32 %v3808_v52, %v3903_v26  ;;  %v379_v5 = vmul.f32 %v4011_v45, %v4011_v45  ;;  %v422_v2 = vsel %vm259_vm0, %v377_v59, 0.0 }
  0x70   : > { %v4032_v51 = vsub.f32 %v3811_v53, %v3903_v26  ;;  %v380_v8 = vmul.f32 %v4018_v46, %v4018_v46  ;;  %v424_v9 = vsel %vm259_vm0, %v378_v34, 0.0  ;;  %v4039_v52 = vsub.f32 %v3820_v57, %v3903_v26 }
  0x71   : > { %v407_v15 = vadd.f32 %v406_v11, %v405_v12  ;;  %v381_v11 = vmul.f32 %v4025_v47, %v4025_v47  ;;  %v426_v12 = vsel %vm259_vm0, %v379_v5, 0.0  ;;  %v4046_v53 = vsub.f32 %v3823_v58, %v3903_v26 }
  0x72   : > { %v4053_v57 = vsub.f32 %v3851_v21, %v3903_v26  ;;  %v4060_v58 = vsub.f32 %v3854_v27, %v3903_v26  ;;  %v4067_v21 = vsub.f32 %v3859_v32, %v3903_v26  ;;  %v4074_v27 = vsub.f32 %v3864_v44, %v3903_v26 }
  0x73   : > { %v409_v18 = vadd.f32 %v408_v14, %v407_v15  ;;  %v382_v14 = vmul.f32 %v4032_v51, %v4032_v51  ;;  %v428_v15 = vsel %vm259_vm0, %v380_v8, 0.0  ;;  %v4081_v32 = vsub.f32 %v3869_v50, %v3903_v26 }
  0x74   : > { %v4088_v44 = vsub.f32 %v3874_v56, %v3903_v26  ;;  %v4095_v50 = vsub.f32 %v3879_v61, %v3903_v26  ;;  %v4102_v56 = vsub.f32 %v3884_v0, %v3903_v26  ;;  %v4109_v61 = vsub.f32 %v3889_v4, %v3903_v26 }
  0x75   : > { %v411_v22 = vadd.f32 %v410_v17, %v409_v18  ;;  %v383_v17 = vmul.f32 %v4039_v52, %v4039_v52  ;;  %v430_v18 = vsel %vm259_vm0, %v381_v11, 0.0  ;;  %v4116_v0 = vsub.f32 %v3894_v6, %v3903_v26 }
  0x76   : > { %v393_v4 = vmul.f32 %v4109_v61, %v4109_v61 }
  0x77   : > { %v413_v25 = vadd.f32 %v412_v20, %v411_v22  ;;  %v384_v20 = vmul.f32 %v4046_v53, %v4046_v53  ;;  %v432_v22 = vsel %vm259_vm0, %v382_v14, 0.0 }
  0x78   : > { %v454_v26 = vsel %vm259_vm0, %v393_v4, 0.0 }
  0x79   : > { %v415_v55 = vadd.f32 %v414_v23, %v413_v25  ;;  %v385_v23 = vmul.f32 %v4053_v57, %v4053_v57  ;;  %v434_v25 = vsel %vm259_vm0, %v383_v17, 0.0 }
  0x7b   : > { %v417_v62 = vadd.f32 %v416_v54, %v415_v55  ;;  %v386_v54 = vmul.f32 %v4060_v58, %v4060_v58  ;;  %v436_v55 = vsel %vm259_vm0, %v384_v20, 0.0  ;;  %v394_v20 = vmul.f32 %v4116_v0, %v4116_v0 }
  0x7d   : > { %v419_v3 = vadd.f32 %v418_v60, %v417_v62  ;;  %v387_v60 = vmul.f32 %v4067_v21, %v4067_v21  ;;  %v438_v62 = vsel %vm259_vm0, %v385_v23, 0.0  ;;  %v456_v23 = vsel %vm259_vm0, %v394_v20, 0.0 }
  0x7f   : > { %v421_v7 = vadd.f32 %v420_v63, %v419_v3  ;;  %v388_v63 = vmul.f32 %v4074_v27, %v4074_v27  ;;  %v440_v3 = vsel %vm259_vm0, %v386_v54, 0.0 }
  0x81   : > { %v423_v10 = vadd.f32 %v422_v2, %v421_v7  ;;  %v389_v2 = vmul.f32 %v4081_v32, %v4081_v32  ;;  %v442_v7 = vsel %vm259_vm0, %v387_v60, 0.0 }
  0x83   : > { %v425_v13 = vadd.f32 %v424_v9, %v423_v10  ;;  %v390_v9 = vmul.f32 %v4088_v44, %v4088_v44  ;;  %v444_v10 = vsel %vm259_vm0, %v388_v63, 0.0 }
  0x85   : > { %v427_v16 = vadd.f32 %v426_v12, %v425_v13  ;;  %v391_v12 = vmul.f32 %v4095_v50, %v4095_v50  ;;  %v446_v13 = vsel %vm259_vm0, %v389_v2, 0.0 }
  0x87   : > { %v429_v19 = vadd.f32 %v428_v15, %v427_v16  ;;  %v392_v15 = vmul.f32 %v4102_v56, %v4102_v56  ;;  %v448_v16 = vsel %vm259_vm0, %v390_v9, 0.0 }
  0x89   : > { %v431_v48 = vadd.f32 %v430_v18, %v429_v19  ;;  %v450_v18 = vsel %vm259_vm0, %v391_v12, 0.0 }
  0x8b   : > { %v433_v49 = vadd.f32 %v432_v22, %v431_v48  ;;  %v452_v22 = vsel %vm259_vm0, %v392_v15, 0.0 }
  0x8d   : > { %v435_v59 = vadd.f32 %v434_v25, %v433_v49 }
  0x8f   : > { %v437_v34 = vadd.f32 %v436_v55, %v435_v59 }
  0x91   : > { %v439_v5 = vadd.f32 %v438_v62, %v437_v34 }
  0x93   : > { %v441_v8 = vadd.f32 %v440_v3, %v439_v5  ;;  %v502_v3 = vlaneseq }
  0x95   : > { %v443_v11 = vadd.f32 %v442_v7, %v441_v8  ;;  %v503_v2 = vshrl.u32 %v502_v3, 7  ;;  %v465_v7 = vld [vmem:[%s217_s25] sm:$0x1] }
  0x96   : > { %v466_v8 = vadd.f32 1.0, %v465_v7 }
  0x97   : > { %v445_v14 = vadd.f32 %v444_v10, %v443_v11  ;;  %v504_v9 = vsub.s32 0, %v503_v2 }
  0x99   : > { %v447_v17 = vadd.f32 %v446_v13, %v445_v14  ;;  %v4137_v10 = vrot.slane %v466_v8, %v504_v9 }
  0x9b   : > { %v449_v19 = vadd.f32 %v448_v16, %v447_v17  ;;  %v4149_v16 = vld [vmem:[%s220_s29] ss:$0 sm:$0xff] }
  0x9d   : > { %v451_v6 = vadd.f32 %v450_v18, %v449_v19 }
  0x9f   : > { %v453_v48 = vadd.f32 %v452_v22, %v451_v6 }
  0xa1   : > { %v455_v25 = vadd.f32 %v454_v26, %v453_v48 }
  0xa3   : > { %v457_v49 = vadd.f32 %v456_v23, %v455_v25 }
  0xa5   : > { %v458_v54 = vrot.slane %v457_v49, 4 }
  0xa7   : > { %v459_v55 = vadd.f32 %v458_v54, %v457_v49 }
  0xa9   : > { %v460_v59 = vrot.slane %v459_v55, 2 }
  0xab   : > { %v461_v60 = vadd.f32 %v460_v59, %v459_v55 }
  0xad   : > { %v462_v62 = vrot.slane %v461_v60, 1 }
  0xaf   : > { %v463_v34 = vadd.f32 %v462_v62, %v461_v60 }
  0xb1   : > { %v464_v63 = vmul.f32 0.00390625, %v463_v34 }
  0xb3   : > { %v467_v5 = vadd.f32 1e-05, %v464_v63 }
  0xb5   : > { %3596 = vrsqrt.f32 %v467_v5 }
  0xbf   : > { %v4139_v11 = vpop.eup %3596 }
  0xc0   : > { %v469_v12 = vmul.f32 %v4139_v11, %v3907_v28  ;;  %v470_v13 = vmul.f32 %v4139_v11, %v3911_v29  ;;  %v485_v14 = vmul.f32 %v4139_v11, %v4011_v45  ;;  %v486_v15 = vmul.f32 %v4139_v11, %v4018_v46 }
  0xc1   : > { %v487_v17 = vmul.f32 %v4139_v11, %v4025_v47  ;;  %v488_v4 = vmul.f32 %v4139_v11, %v4032_v51  ;;  %v471_v28 = vmul.f32 %v4139_v11, %v3915_v30  ;;  %v472_v29 = vmul.f32 %v4139_v11, %v3919_v36 }
  0xc2   : > { %v507_v18 = vmul.f32 %v4137_v10, %v469_v12  ;;  %v508_v45 = vmul.f32 %v4137_v10, %v470_v13  ;;  %v523_v46 = vmul.f32 %v4137_v10, %v485_v14  ;;  %v524_v19 = vmul.f32 %v4137_v10, %v486_v15 }
  0xc3   : > { %v525_v20 = vmul.f32 %v4137_v10, %v487_v17  ;;  %v526_v47 = vmul.f32 %v4137_v10, %v488_v4  ;;  %v509_v51 = vmul.f32 %v4137_v10, %v471_v28  ;;  %v510_v22 = vmul.f32 %v4137_v10, %v472_v29 }
  0xc4   : > { %v546_v30 = vadd.f32 %v4149_v16, %v507_v18  ;;  %v547_v36 = vadd.f32 %v4149_v16, %v508_v45  ;;  %v562_v6 = vadd.f32 %v4149_v16, %v523_v46  ;;  %v563_v26 = vadd.f32 %v4149_v16, %v524_v19 }
  0xc5   : > { %v564_v48 = vadd.f32 %v4149_v16, %v525_v20  ;;  %v565_v23 = vadd.f32 %v4149_v16, %v526_v47  ;;  %v548_v25 = vadd.f32 %v4149_v16, %v509_v51  ;;  %v549_v49 = vadd.f32 %v4149_v16, %v510_v22 }
  0xc6   : > { %vm578_vm1 = vcmp.ge.f32.partialorder %v546_v30, 0.0  ;;  %vm579_vm2 = vcmp.ge.f32.partialorder %v547_v36, 0.0  ;;  %v610_v54 = vmul.f32 0.2, %v546_v30  ;;  %v611_v55 = vmul.f32 0.2, %v547_v36 }
  0xc7   : > { %vm594_vm3 = vcmp.ge.f32.partialorder %v562_v6, 0.0  ;;  %vm595_vm4 = vcmp.ge.f32.partialorder %v563_v26, 0.0  ;;  %v626_v59 = vmul.f32 0.2, %v562_v6  ;;  %v627_v60 = vmul.f32 0.2, %v563_v26 }
  0xc8   : > { %v642_v62 = vsel %vm578_vm1, %v546_v30, %v610_v54  ;;  %v643_v34 = vsel %vm579_vm2, %v547_v36, %v611_v55  ;;  %vm596_vm5 = vcmp.ge.f32.partialorder %v564_v48, 0.0  ;;  %vm597_vm6 = vcmp.ge.f32.partialorder %v565_v23, 0.0  ;;  %v3549_v55 = vld [vmem:[%s5102_s3] sm:$0xff]  }
  0xc9   : > { %729 = vst.msk [vmem:[#allocation2 + $0x19] sm:$0xff] %vm259_vm0, %v642_v62  ;;  %730 = vst.msk [vmem:[#allocation2 + $0x21] sm:$0xff] %vm259_vm0, %v643_v34  ;;  %v658_v63 = vsel %vm594_vm3, %v562_v6, %v626_v59  ;;  %v659_v3 = vsel %vm595_vm4, %v563_v26, %v627_v60  ;;  %v628_v5 = vmul.f32 0.2, %v564_v48  ;;  %v629_v2 = vmul.f32 0.2, %v565_v23 }
  0xca   : > { %745 = vst.msk [vmem:[#allocation2 + $0xd9] sm:$0xff] %vm259_vm0, %v658_v63  ;;  %746 = vst.msk [vmem:[#allocation2 + $0xe1] sm:$0xff] %vm259_vm0, %v659_v3  ;;  %vm580_vm7 = vcmp.ge.f32.partialorder %v548_v25, 0.0  ;;  %vm581_vm8 = vcmp.ge.f32.partialorder %v549_v49, 0.0  ;;  %v612_v7 = vmul.f32 0.2, %v548_v25  ;;  %v489_v13 = vmul.f32 %v4139_v11, %v4039_v52 }
  0xcb   : > { %v613_v8 = vmul.f32 0.2, %v549_v49  ;;  %v660_v9 = vsel %vm596_vm5, %v564_v48, %v628_v5  ;;  %v661_v12 = vsel %vm597_vm6, %v565_v23, %v629_v2  ;;  %v490_v14 = vmul.f32 %v4139_v11, %v4046_v53  ;;  %v3550_v59 = vld [vmem:[%s5102_s3 + $0x48] sm:$0xff]  }
  0xcc   : > { %747 = vst.msk [vmem:[#allocation2 + $0xf1] sm:$0xff] %vm259_vm0, %v660_v9  ;;  %748 = vst.msk [vmem:[#allocation2 + $0xf9] sm:$0xff] %vm259_vm0, %v661_v12  ;;  %v644_v15 = vsel %vm580_vm7, %v548_v25, %v612_v7  ;;  %v491_v4 = vmul.f32 %v4139_v11, %v4053_v57  ;;  %v492_v28 = vmul.f32 %v4139_v11, %v4060_v58 }
  0xcd   : > { %v645_v17 = vsel %vm581_vm8, %v549_v49, %v613_v8  ;;  %731 = vst.msk [vmem:[#allocation2 + $0x31] sm:$0xff] %vm259_vm0, %v644_v15  ;;  %v527_v52 = vmul.f32 %v4137_v10, %v489_v13  ;;  %v528_v53 = vmul.f32 %v4137_v10, %v490_v14  ;;  %v473_v29 = vmul.f32 %v4139_v11, %v3923_v40  ;;  %v3598_v15 = vld [vmem:[%s5102_s3 + $0x140] sm:$0xff]  }
  0xce   : > { %732 = vst.msk [vmem:[#allocation2 + $0x39] sm:$0xff] %vm259_vm0, %v645_v17  ;;  %v474_v18 = vmul.f32 %v4139_v11, %v3933_v24  ;;  %v529_v45 = vmul.f32 %v4137_v10, %v491_v4  ;;  %v530_v57 = vmul.f32 %v4137_v10, %v492_v28  ;;  %v493_v58 = vmul.f32 %v4139_v11, %v4067_v21 }
  0xcf   : > { %v494_v46 = vmul.f32 %v4139_v11, %v4074_v27  ;;  %v566_v19 = vadd.f32 %v4149_v16, %v527_v52  ;;  %v567_v20 = vadd.f32 %v4149_v16, %v528_v53  ;;  %v511_v47 = vmul.f32 %v4137_v10, %v473_v29 }
  0xd0   : > { %v512_v40 = vmul.f32 %v4137_v10, %v474_v18  ;;  %v799_v51 = vld [vmem:[#allocation2 + $0x19] sm:$0xff]  ;;  %v800_v24 = vld [vmem:[#allocation2 + $0x21] sm:$0xff]  ;;  %v568_v30 = vadd.f32 %v4149_v16, %v529_v45  ;;  %v569_v36 = vadd.f32 %v4149_v16, %v530_v57  ;;  %v531_v21 = vmul.f32 %v4137_v10, %v493_v58 }
  0xd1   : > { %v763_v22 = vld [vmem:[#allocation2 + $0x18] sm:$0xff]  ;;  %v532_v6 = vmul.f32 %v4137_v10, %v494_v46  ;;  %v4211_v27 = vpack.c.bf16 %v800_v24, %v799_v51  ;;  %v852_v48 = vld [vmem:[#allocation2 + $0xe2] sm:$0xff]  ;;  %vm598_vm9 = vcmp.ge.f32.partialorder %v566_v19, 0.0  ;;  %vm599_vm10 = vcmp.ge.f32.partialorder %v567_v20, 0.0 }
  0xd2   : > { %v851_v26 = vld [vmem:[#allocation2 + $0xda] sm:$0xff]  ;;  %v550_v25 = vadd.f32 %v4149_v16, %v511_v47  ;;  %v630_v60 = vmul.f32 0.2, %v566_v19  ;;  %v631_v62 = vmul.f32 0.2, %v567_v20  ;;  %vm600_vm11 = vcmp.ge.f32.partialorder %v568_v30, 0.0 }
  0xd3   : > { %v764_v23 = vld [vmem:[#allocation2 + $0x20] sm:$0xff]  ;;  %v4214_v49 = vpack.c.bf16 %v852_v48, %v851_v26  ;;  %1196 = vmatprep.mubr.bf16.mxu0 %v4211_v27  ;;  %v853_v34 = vld [vmem:[#allocation2 + $0xf2] sm:$0xff]  ;;  %vm601_vm12 = vcmp.ge.f32.partialorder %v569_v36, 0.0  ;;  %v632_v3 = vmul.f32 0.2, %v568_v30  ;;  %v551_v5 = vadd.f32 %v4149_v16, %v512_v40  ;;  %v3599_v45 = vld [vmem:[%s5102_s3 + $0x148] sm:$0xff]  }
  0xd4   : > { %v4216_v54 = vpack.c.bf16 %v764_v23, %v763_v22  ;;  %v854_v63 = vld [vmem:[#allocation2 + $0xfa] sm:$0xff]  ;;  %v801_v7 = vld [vmem:[#allocation2 + $0x31] sm:$0xff]  ;;  %v662_v9 = vsel %vm598_vm9, %v566_v19, %v630_v60  ;;  %v663_v12 = vsel %vm599_vm10, %v567_v20, %v631_v62  ;;  %v633_v14 = vmul.f32 0.2, %v569_v36  ;;  %v3551_v57 = vld [vmem:[%s5102_s3 + $0x8] sm:$0xff]  }
  0xd5   : > { %3227 = vmatprep.mubr.bf16.mxu1 %v4214_v49  ;;  %v4228_v2 = vpack.c.bf16 %v854_v63, %v853_v34  ;;  %v802_v8 = vld [vmem:[#allocation2 + $0x39] sm:$0xff]  ;;  %v765_v13 = vld [vmem:[#allocation2 + $0x30] sm:$0xff]  ;;  %749 = vst.msk [vmem:[#allocation2 + $0x109] sm:$0xff] %vm259_vm0, %v662_v9  ;;  %750 = vst.msk [vmem:[#allocation2 + $0x111] sm:$0xff] %vm259_vm0, %v663_v12  ;;  %v664_v28 = vsel %vm600_vm11, %v568_v30, %v632_v3  ;;  %vm582_vm13 = vcmp.ge.f32.partialorder %v550_v25, 0.0  ;;  %vm583_vm14 = vcmp.ge.f32.partialorder %v551_v5, 0.0 }
  0xd6   : > { %1197 = vmatmul.mubr.bf16.vlgmr.msra.gmra.mrb[0].mxu0 %v4216_v54  ;;  %v4235_v17 = vpack.c.bf16 %v802_v8, %v801_v7  ;;  %v766_v4 = vld [vmem:[#allocation2 + $0x38] sm:$0xff]  ;;  %v665_v53 = vsel %vm601_vm12, %v569_v36, %v633_v14  ;;  %751 = vst.msk [vmem:[#allocation2 + $0x121] sm:$0xff] %vm259_vm0, %v664_v28  ;;  %v614_v29 = vmul.f32 0.2, %v550_v25  ;;  %v615_v18 = vmul.f32 0.2, %v551_v5 }
  0xd7   : > { %3196 = vmatpush3.bf16.msra.mxu0 %v3598_v15  ;;  %3228 = vmatmul.mubr.bf16.vlgmr.msra.gmra.mrb[0].mxu1 %v4228_v2  ;;  %v4241_v52 = vpack.c.bf16 %v766_v4, %v765_v13  ;;  %752 = vst.msk [vmem:[#allocation2 + $0x129] sm:$0xff] %vm259_vm0, %v665_v53  ;;  %v570_v58 = vadd.f32 %v4149_v16, %v531_v21  ;;  %v3552_v20 = vld [vmem:[%s5102_s3 + $0x50] sm:$0xff]   ;;  %v3555_v34 = vld [vmem:[%s5102_s3 + $0x18] sm:$0xff]   ;;  %v3556_v4 = vld [vmem:[%s5102_s3 + $0x60] sm:$0xff]  }
  0xd8   : > { %3197 = vmatprep.subr.bf16.mxu0 %v3599_v45  ;;  %2924 = vmatpush3.bf16.msra.mxu1 %v3549_v55  ;;  %v571_v46 = vadd.f32 %v4149_v16, %v532_v6  ;;  %v495_v19 = vmul.f32 %v4139_v11, %v4081_v32  ;;  %v646_v47 = vsel %vm582_vm13, %v550_v25, %v614_v29  ;;  %v3553_v6 = vld [vmem:[%s5102_s3 + $0x10] sm:$0xff]   ;;  %v3601_v13 = vld [vmem:[%s5102_s3 + $0x158] sm:$0xff]  }
  0xd9   : > { %1204 = vmatprep.mubr.bf16.mxu0 %v4235_v17  ;;  %2925 = vmatprep.subr.bf16.mxu1 %v3550_v59  ;;  %v647_v40 = vsel %vm583_vm14, %v551_v5, %v615_v18  ;;  %v496_v51 = vmul.f32 %v4139_v11, %v4088_v44  ;;  %v475_v24 = vmul.f32 %v4139_v11, %v3939_v31  ;;  %vm602_vm15 = vcmp.ge.f32.partialorder %v570_v58, 0.0  ;;  %v3600_v31 = vld [vmem:[%s5102_s3 + $0x150] sm:$0xff]   ;;  %v3554_v59 = vld [vmem:[%s5102_s3 + $0x58] sm:$0xff]  }
  0xda   : > { %733 = vst.msk [vmem:[#allocation2 + $0x49] sm:$0xff] %vm259_vm0, %v646_v47  ;;  %734 = vst.msk [vmem:[#allocation2 + $0x51] sm:$0xff] %vm259_vm0, %v647_v40  ;;  %vm603_vm1 = vcmp.ge.f32.partialorder %v571_v46, 0.0  ;;  %v634_v32 = vmul.f32 0.2, %v570_v58  ;;  %v533_v30 = vmul.f32 %v4137_v10, %v495_v19  ;;  %v476_v21 = vmul.f32 %v4139_v11, %v3948_v33 }
  0xdb   : > { %v635_v22 = vmul.f32 0.2, %v571_v46  ;;  %3198 = vmatpush3.bf16.msra.mxu0 %v3599_v45  ;;  %v534_v36 = vmul.f32 %v4137_v10, %v496_v51  ;;  %v513_v44 = vmul.f32 %v4137_v10, %v475_v24  ;;  %v497_v23 = vmul.f32 %v4139_v11, %v4095_v50 }
  0xdc   : > { %3199 = vmatprep.subr.bf16.mxu0 %v3600_v31  ;;  %2926 = vmatpush3.bf16.msra.mxu1 %v3551_v57  ;;  %v666_v26 = vsel %vm602_vm15, %v570_v58, %v634_v32  ;;  %v498_v33 = vmul.f32 %v4139_v11, %v4102_v56  ;;  %v855_v25 = vld [vmem:[#allocation2 + $0x10a] sm:$0xff]  ;;  %v856_v55 = vld [vmem:[#allocation2 + $0x112] sm:$0xff]  ;;  %v572_v60 = vadd.f32 %v4149_v16, %v533_v30 }
  0xdd   : > { %v667_v48 = vsel %vm603_vm1, %v571_v46, %v635_v22  ;;  %2927 = vmatprep.subr.bf16.mxu1 %v3552_v20  ;;  %753 = vst.msk [vmem:[#allocation2 + $0x139] sm:$0xff] %vm259_vm0, %v666_v26  ;;  %v573_v50 = vadd.f32 %v4149_v16, %v534_v36  ;;  %v514_v62 = vmul.f32 %v4137_v10, %v476_v21  ;;  %v3557_v36 = vld [vmem:[%s5102_s3 + $0x20] sm:$0xff]   ;;  %v3558_v26 = vld [vmem:[%s5102_s3 + $0x68] sm:$0xff]  }
  0xde   : > { %1205 = vmatmul.mubr.bf16.gmra.mrb[4].mxu0 %v4241_v52  ;;  %754 = vst.msk [vmem:[#allocation2 + $0x141] sm:$0xff] %vm259_vm0, %v667_v48  ;;  %v4292_v56 = vpack.c.bf16 %v856_v55, %v855_v25  ;;  %v552_v63 = vadd.f32 %v4149_v16, %v513_v44  ;;  %v535_v3 = vmul.f32 %v4137_v10, %v497_v23  ;;  %v857_v7 = vld [vmem:[#allocation2 + $0x122] sm:$0xff]  ;;  %v858_v8 = vld [vmem:[#allocation2 + $0x12a] sm:$0xff]  ;;  %vm604_vm2 = vcmp.ge.f32.partialorder %v572_v60, 0.0 }
  0xdf   : > { %v536_v5 = vmul.f32 %v4137_v10, %v498_v33  ;;  %3200 = vmatpush3.bf16.msra.mxu0 %v3600_v31  ;;  %vm605_vm3 = vcmp.ge.f32.partialorder %v573_v50, 0.0  ;;  %v636_v9 = vmul.f32 0.2, %v572_v60  ;;  %v553_v12 = vadd.f32 %v4149_v16, %v514_v62  ;;  %v3602_v55 = vld [vmem:[%s5102_s3 + $0x160] sm:$0xff]  }
  0xe0   : > { %3201 = vmatprep.subr.bf16.mxu0 %v3601_v13  ;;  %3231 = vmatprep.mubr.bf16.mxu1 %v4292_v56  ;;  %v4305_v14 = vpack.c.bf16 %v858_v8, %v857_v7  ;;  %v637_v15 = vmul.f32 0.2, %v573_v50  ;;  %vm584_vm4 = vcmp.ge.f32.partialorder %v552_v63, 0.0  ;;  %v616_v28 = vmul.f32 0.2, %v552_v63 }
  0xe1   : > { %2928 = vmatpush3.bf16.msra.mxu1 %v3553_v6  ;;  %v803_v53 = vld [vmem:[#allocation2 + $0x49] sm:$0xff]  ;;  %v804_v29 = vld [vmem:[#allocation2 + $0x51] sm:$0xff]  ;;  %v668_v45 = vsel %vm604_vm2, %v572_v60, %v636_v9  ;;  %vm585_vm5 = vcmp.ge.f32.partialorder %v553_v12, 0.0  ;;  %v617_v57 = vmul.f32 0.2, %v553_v12  ;;  %v574_v58 = vadd.f32 %v4149_v16, %v535_v3 }
  0xe2   : > { %2929 = vmatprep.subr.bf16.mxu1 %v3554_v59  ;;  %v767_v18 = vld [vmem:[#allocation2 + $0x48] sm:$0xff]  ;;  %3232 = vmatmul.mubr.bf16.gmra.mrb[4].mxu1 %v4305_v14  ;;  %v4313_v46 = vpack.c.bf16 %v804_v29, %v803_v53  ;;  %v768_v19 = vld [vmem:[#allocation2 + $0x50] sm:$0xff]  ;;  %v669_v20 = vsel %vm605_vm3, %v573_v50, %v637_v15  ;;  %755 = vst.msk [vmem:[#allocation2 + $0x151] sm:$0xff] %vm259_vm0, %v668_v45 }
  0xe3   : > { %v648_v47 = vsel %vm584_vm4, %v552_v63, %v616_v28  ;;  %v575_v40 = vadd.f32 %v4149_v16, %v536_v5  ;;  %v4318_v51 = vpack.c.bf16 %v768_v19, %v767_v18  ;;  %756 = vst.msk [vmem:[#allocation2 + $0x159] sm:$0xff] %vm259_vm0, %v669_v20  ;;  %v649_v24 = vsel %vm585_vm5, %v553_v12, %v617_v57  ;;  %v3559_v50 = vld [vmem:[%s5102_s3 + $0x28] sm:$0xff]   ;;  %v3561_v20 = vld [vmem:[%s5102_s3 + $0x30] sm:$0xff]  }
  0xe4   : > { %735 = vst.msk [vmem:[#allocation2 + $0x61] sm:$0xff] %vm259_vm0, %v648_v47  ;;  %vm606_vm6 = vcmp.ge.f32.partialorder %v574_v58, 0.0  ;;  %v638_v32 = vmul.f32 0.2, %v574_v58  ;;  %3202 = vmatpush3.bf16.msra.mxu0 %v3601_v13  ;;  %1212 = vmatprep.mubr.bf16.mxu0 %v4313_v46  ;;  %736 = vst.msk [vmem:[#allocation2 + $0x69] sm:$0xff] %vm259_vm0, %v649_v24  ;;  %v499_v44 = vmul.f32 %v4139_v11, %v4109_v61  ;;  %v3603_v45 = vld [vmem:[%s5102_s3 + $0x168] sm:$0xff]  }
  0xe5   : > { %2930 = vmatpush3.bf16.msra.mxu1 %v3555_v34  ;;  %v859_v22 = vld [vmem:[#allocation2 + $0x13a] sm:$0xff]  ;;  %v860_v30 = vld [vmem:[#allocation2 + $0x142] sm:$0xff]  ;;  %vm607_vm7 = vcmp.ge.f32.partialorder %v575_v40, 0.0  ;;  %v639_v21 = vmul.f32 0.2, %v575_v40  ;;  %v500_v31 = vmul.f32 %v4139_v11, %v4116_v0  ;;  %v477_v23 = vmul.f32 %v4139_v11, %v3955_v1  ;;  %3203 = vmatprep.subr.bf16.mxu0 %v3602_v55 }
  0xe6   : > { %v4331_v6 = vpack.c.bf16 %v860_v30, %v859_v22  ;;  %1213 = vmatmul.mubr.bf16.gmra.mrb[8].mxu0 %v4318_v51  ;;  %2931 = vmatprep.subr.bf16.mxu1 %v3556_v4  ;;  %v670_v48 = vsel %vm606_vm6, %v574_v58, %v638_v32  ;;  %v537_v61 = vmul.f32 %v4137_v10, %v499_v44 }
  0xe7   : > { %v671_v33 = vsel %vm607_vm7, %v575_v40, %v639_v21  ;;  %757 = vst.msk [vmem:[#allocation2 + $0x169] sm:$0xff] %vm259_vm0, %v670_v48  ;;  %v538_v0 = vmul.f32 %v4137_v10, %v500_v31  ;;  %v478_v25 = vmul.f32 %v4139_v11, %v3962_v35  ;;  %v515_v1 = vmul.f32 %v4137_v10, %v477_v23  ;;  %v3562_v40 = vld [vmem:[%s5102_s3 + $0x78] sm:$0xff]  }
  0xe8   : > { %3235 = vmatprep.mubr.bf16.mxu1 %v4331_v6  ;;  %758 = vst.msk [vmem:[#allocation2 + $0x171] sm:$0xff] %vm259_vm0, %v671_v33  ;;  %v479_v59 = vmul.f32 %v4139_v11, %v3969_v37  ;;  %v480_v60 = vmul.f32 %v4139_v11, %v3976_v38  ;;  %v481_v35 = vmul.f32 %v4139_v11, %v3983_v39  ;;  %v3560_v38 = vld [vmem:[%s5102_s3 + $0x70] sm:$0xff]  }
  0xe9   : > { %2932 = vmatpush3.bf16.msra.mxu1 %v3557_v36  ;;  %v576_v62 = vadd.f32 %v4149_v16, %v537_v61  ;;  %v577_v34 = vadd.f32 %v4149_v16, %v538_v0  ;;  %v516_v63 = vmul.f32 %v4137_v10, %v478_v25  ;;  %v482_v37 = vmul.f32 %v4139_v11, %v3990_v41  ;;  %v3604_v33 = vld [vmem:[%s5102_s3 + $0x170] sm:$0xff]   ;;  %v3563_v61 = vld [vmem:[%s5102_s3 + $0x38] sm:$0xff]  }
  0xea   : > { %2933 = vmatprep.subr.bf16.mxu1 %v3558_v26  ;;  %v554_v39 = vadd.f32 %v4149_v16, %v515_v1  ;;  %v517_v3 = vmul.f32 %v4137_v10, %v479_v59  ;;  %v518_v5 = vmul.f32 %v4137_v10, %v480_v60  ;;  %v519_v7 = vmul.f32 %v4137_v10, %v481_v35  ;;  %v861_v8 = vld [vmem:[#allocation2 + $0x152] sm:$0xff]  ;;  %v862_v9 = vld [vmem:[#allocation2 + $0x15a] sm:$0xff] }
  0xeb   : > { %v805_v12 = vld [vmem:[#allocation2 + $0x61] sm:$0xff]  ;;  %vm608_vm8 = vcmp.ge.f32.partialorder %v576_v62, 0.0  ;;  %vm609_vm9 = vcmp.ge.f32.partialorder %v577_v34, 0.0  ;;  %v555_v41 = vadd.f32 %v4149_v16, %v516_v63  ;;  %v520_v13 = vmul.f32 %v4137_v10, %v482_v37  ;;  %3204 = vmatpush3.bf16.msra.mxu0 %v3602_v55  ;;  %v806_v4 = vld [vmem:[#allocation2 + $0x69] sm:$0xff] }
  0xec   : > { %v4374_v15 = vpack.c.bf16 %v862_v9, %v861_v8  ;;  %v769_v28 = vld [vmem:[#allocation2 + $0x60] sm:$0xff]  ;;  %v770_v53 = vld [vmem:[#allocation2 + $0x68] sm:$0xff]  ;;  %v640_v29 = vmul.f32 0.2, %v576_v62  ;;  %vm586_vm10 = vcmp.ge.f32.partialorder %v554_v39, 0.0  ;;  %v556_v18 = vadd.f32 %v4149_v16, %v517_v3  ;;  %3205 = vmatprep.subr.bf16.mxu0 %v3603_v45 }
  0xed   : > { %2934 = vmatpush3.bf16.msra.mxu1 %v3559_v50  ;;  %v4380_v57 = vpack.c.bf16 %v806_v4, %v805_v12  ;;  %v4382_v58 = vpack.c.bf16 %v770_v53, %v769_v28  ;;  %v641_v19 = vmul.f32 0.2, %v577_v34  ;;  %vm587_vm11 = vcmp.ge.f32.partialorder %v555_v41, 0.0  ;;  %v3564_v1 = vld [vmem:[%s5102_s3 + $0x80] sm:$0xff]   ;;  %v798_v63 = vld [vmem:[#allocation2 + $0x9] sm:$0xff] }
  0xee   : > { %3236 = vmatmul.mubr.bf16.gmra.mrb[8].mxu1 %v4374_v15  ;;  %v672_v47 = vsel %vm608_vm8, %v576_v62, %v640_v29  ;;  %2935 = vmatprep.subr.bf16.mxu1 %v3560_v38  ;;  %v618_v24 = vmul.f32 0.2, %v554_v39  ;;  %v619_v32 = vmul.f32 0.2, %v555_v41  ;;  %v557_v22 = vadd.f32 %v4149_v16, %v518_v5 }
  0xef   : > { %1220 = vmatprep.mubr.bf16.mxu0 %v4380_v57  ;;  %v863_v30 = vld [vmem:[#allocation2 + $0x16a] sm:$0xff]  ;;  %v864_v36 = vld [vmem:[#allocation2 + $0x172] sm:$0xff]  ;;  %v673_v21 = vsel %vm609_vm9, %v577_v34, %v641_v19  ;;  %759 = vst.msk [vmem:[#allocation2 + $0x181] sm:$0xff] %vm259_vm0, %v672_v47  ;;  %vm588_vm12 = vcmp.ge.f32.partialorder %v556_v18, 0.0  ;;  %v620_v44 = vmul.f32 0.2, %v556_v18  ;;  %v558_v31 = vadd.f32 %v4149_v16, %v519_v7  ;;  %3206 = vmatpush3.bf16.msra.mxu0 %v3603_v45 }
  0xf0   : > { %v4397_v26 = vpack.c.bf16 %v864_v36, %v863_v30  ;;  %1221 = vmatmul.mubr.bf16.gmra.mrb[12].mxu0 %v4382_v58  ;;  %760 = vst.msk [vmem:[#allocation2 + $0x189] sm:$0xff] %vm259_vm0, %v673_v21  ;;  %v650_v48 = vsel %vm586_vm10, %v554_v39, %v618_v24  ;;  %v651_v23 = vsel %vm587_vm11, %v555_v41, %v619_v32  ;;  %vm589_vm13 = vcmp.ge.f32.partialorder %v557_v22, 0.0  ;;  %v797_v34 = vld [vmem:[#allocation2 + $0x1] sm:$0xff] }
  0xf1   : > { %3207 = vmatprep.subr.bf16.mxu0 %v3604_v33  ;;  %2936 = vmatpush3.bf16.msra.mxu1 %v3561_v20  ;;  %737 = vst.msk [vmem:[#allocation2 + $0x79] sm:$0xff] %vm259_vm0, %v650_v48  ;;  %738 = vst.msk [vmem:[#allocation2 + $0x81] sm:$0xff] %vm259_vm0, %v651_v23  ;;  %v621_v0 = vmul.f32 0.2, %v557_v22  ;;  %v652_v25 = vsel %vm588_vm12, %v556_v18, %v620_v44  ;;  %v559_v55 = vadd.f32 %v4149_v16, %v520_v13  ;;  %v3606_v32 = vld [vmem:[#allocation2] sm:$0xff]  ;;  %v3565_v44 = vld [vmem:[%s5102_s3 + $0x88] sm:$0xff]  }
  0xf2   : > { %vm590_vm14 = vcmp.ge.f32.partialorder %v558_v31, 0.0  ;;  %3239 = vmatprep.mubr.bf16.mxu1 %v4397_v26  ;;  %2937 = vmatprep.subr.bf16.mxu1 %v3562_v40  ;;  %739 = vst.msk [vmem:[#allocation2 + $0x91] sm:$0xff] %vm259_vm0, %v652_v25  ;;  %v622_v59 = vmul.f32 0.2, %v558_v31  ;;  %v483_v60 = vmul.f32 %v4139_v11, %v3997_v42  ;;  %v484_v35 = vmul.f32 %v4139_v11, %v4004_v43  ;;  %v3605_v42 = vld [vmem:[%s5102_s3 + $0x178] sm:$0xff]   ;;  %v3570_v43 = vld [vmem:[%s5102_s3 + $0x1c0] sm:$0xff]  }
  0xf3   : > { %v653_v50 = vsel %vm589_vm13, %v557_v22, %v621_v0  ;;  %vm591_vm15 = vcmp.ge.f32.partialorder %v559_v55, 0.0  ;;  %v623_v62 = vmul.f32 0.2, %v559_v55  ;;  %3208 = vmatpush3.bf16.msra.mxu0 %v3604_v33  ;;  %v870_v8 = vpack.c.bf16 %v798_v63, %v797_v34  ;;  %v3566_v48 = vld [vmem:[%s5102_s3 + $0x90] sm:$0xff]  }
  0xf4   : > { %740 = vst.msk [vmem:[#allocation2 + $0x99] sm:$0xff] %vm259_vm0, %v653_v50  ;;  %v654_v37 = vsel %vm590_vm14, %v558_v31, %v622_v59  ;;  %v521_v38 = vmul.f32 %v4137_v10, %v483_v60  ;;  %v522_v39 = vmul.f32 %v4137_v10, %v484_v35  ;;  %3209 = vmatprep.subr.bf16.mxu0 %v3605_v42  ;;  %v815_v35 = vld [vmem:[#allocation2 + $0xd9] sm:$0xff]  ;;  %v816_v50 = vld [vmem:[#allocation2 + $0xe1] sm:$0xff]  ;;  %v3572_v63 = vld [vmem:[%s5102_s3 + $0xb0] sm:$0xff]  }
  0xf5   : > { %2938 = vmatpush3.bf16.msra.mxu1 %v3563_v61  ;;  %v655_v11 = vsel %vm591_vm15, %v559_v55, %v623_v62  ;;  %741 = vst.msk [vmem:[#allocation2 + $0xa9] sm:$0xff] %vm259_vm0, %v654_v37  ;;  %v4449_v22 = vpack.c.bf16 %v3606_v32, %v3606_v32  ;;  %v4485_v34 = vpack.c.bf16 %v816_v50, %v815_v35  ;;  %v779_v37 = vld [vmem:[#allocation2 + $0xd8] sm:$0xff]  ;;  %v824_v32 = vld [vmem:[#allocation2 + $0x141] sm:$0xff] }
  0xf6   : > { %3243 = vmatprep.subr.bf16.mxu1 %v3564_v1  ;;  %742 = vst.msk [vmem:[#allocation2 + $0xb1] sm:$0xff] %vm259_vm0, %v655_v11  ;;  %v560_v3 = vadd.f32 %v4149_v16, %v521_v38  ;;  %v561_v10 = vadd.f32 %v4149_v16, %v522_v39  ;;  %v780_v38 = vld [vmem:[#allocation2 + $0xe0] sm:$0xff]  ;;  %v817_v39 = vld [vmem:[#allocation2 + $0xf1] sm:$0xff] }
  0xf7   : > { %v865_v5 = vld [vmem:[#allocation2 + $0x182] sm:$0xff]  ;;  %v866_v7 = vld [vmem:[#allocation2 + $0x18a] sm:$0xff]  ;;  %3210 = vmatpush3.bf16.msra.mxu0 %v3605_v42  ;;  %v818_v42 = vld [vmem:[#allocation2 + $0xf9] sm:$0xff] }
  0xf8   : > { %v4436_v9 = vpack.c.bf16 %v866_v7, %v865_v5  ;;  %v807_v12 = vld [vmem:[#allocation2 + $0x79] sm:$0xff]  ;;  %v808_v41 = vld [vmem:[#allocation2 + $0x81] sm:$0xff]  ;;  %vm592_vm1 = vcmp.ge.f32.partialorder %v560_v3, 0.0  ;;  %3059 = vmatprep.subr.bf16.mxu0 %v3570_v43  ;;  %vm593_vm2 = vcmp.ge.f32.partialorder %v561_v10, 0.0  ;;  %v624_v29 = vmul.f32 0.2, %v560_v3 }
  0xf9   : > { %v771_v13 = vld [vmem:[#allocation2 + $0x78] sm:$0xff]  ;;  %v4438_v4 = vpack.c.bf16 %v808_v41, %v807_v12  ;;  %v772_v28 = vld [vmem:[#allocation2 + $0x80] sm:$0xff]  ;;  %v625_v18 = vmul.f32 0.2, %v561_v10  ;;  %v773_v40 = vld [vmem:[#allocation2 + $0x90] sm:$0xff]  ;;  %v4494_v43 = vpack.c.bf16 %v780_v38, %v779_v37 }
  0xfa   : > { %v809_v53 = vld [vmem:[#allocation2 + $0x91] sm:$0xff]  ;;  %3240 = vmatmul.mubr.bf16.gmra.mrb[12].mxu1 %v4436_v9  ;;  %v4441_v16 = vpack.c.bf16 %v772_v28, %v771_v13  ;;  %v656_v19 = vsel %vm592_vm1, %v560_v3, %v624_v29  ;;  %v4499_v3 = vpack.c.bf16 %v818_v42, %v817_v39  ;;  %v783_v28 = vld [vmem:[#allocation2 + $0x108] sm:$0xff] }
  0xfb   : > { %1228 = vmatprep.mubr.bf16.mxu0 %v4438_v4  ;;  %1662 = vmatprep.mubr.bf16.mxu1 %v870_v8  ;;  %v810_v45 = vld [vmem:[#allocation2 + $0x99] sm:$0xff]  ;;  %v657_v47 = vsel %vm593_vm2, %v561_v10, %v625_v18  ;;  %743 = vst.msk [vmem:[#allocation2 + $0xc1] sm:$0xff] %vm259_vm0, %v656_v19  ;;  %v781_v5 = vld [vmem:[#allocation2 + $0xf0] sm:$0xff]  ;;  %v821_v29 = vld [vmem:[#allocation2 + $0x121] sm:$0xff] }
  0xfc   : > { %1229 = vmatmul.mubr.bf16.gmra.mrb[16].mxu0 %v4441_v16  ;;  %v4445_v20 = vpack.c.bf16 %v810_v45, %v809_v53  ;;  %v774_v24 = vld [vmem:[#allocation2 + $0x98] sm:$0xff]  ;;  %744 = vst.msk [vmem:[#allocation2 + $0xc9] sm:$0xff] %vm259_vm0, %v657_v47  ;;  %v811_v30 = vld [vmem:[#allocation2 + $0xa9] sm:$0xff]  ;;  %v4507_v10 = vld [vmem:[%s5102_s3 + $0x200] sm:$0xff]   ;;  %vm2499_vm0 = vcmask 64512  }
  0xfd   : > { %v812_v36 = vld [vmem:[#allocation2 + $0xb1] sm:$0xff]  ;;  %v4452_v21 = vpack.c.bf16 %v774_v24, %v773_v40  ;;  %v775_v23 = vld [vmem:[#allocation2 + $0xa8] sm:$0xff]  ;;  %v785_v47 = vld [vmem:[#allocation2 + $0x120] sm:$0xff] }
  0xfe   : > { %1236 = vmatprep.mubr.bf16.mxu0 %v4445_v20  ;;  %v4457_v31 = vpack.c.bf16 %v812_v36, %v811_v30  ;;  %v776_v33 = vld [vmem:[#allocation2 + $0xb0] sm:$0xff]  ;;  %v3581_v11 = vld [vmem:[%s5102_s3 + $0xb8] sm:$0xff]   ;;  %v786_v40 = vld [vmem:[#allocation2 + $0x128] sm:$0xff] }
  0xff   : > { %v4466_v25 = vpack.c.bf16 %v776_v33, %v775_v23  ;;  %v782_v7 = vld [vmem:[#allocation2 + $0xf8] sm:$0xff]  ;;  %v819_v8 = vld [vmem:[#allocation2 + $0x109] sm:$0xff]  ;;  %v4527_v30 = vpack.c.bf16 %v786_v40, %v785_v47  ;;  %v829_v37 = vld [vmem:[#allocation2 + $0x181] sm:$0xff] }
 0x100   : > { %v820_v12 = vld [vmem:[#allocation2 + $0x111] sm:$0xff]  ;;  %v4510_v41 = vpack.c.bf16 %v782_v7, %v781_v5  ;;  %v822_v18 = vld [vmem:[#allocation2 + $0x129] sm:$0xff]  ;;  %v823_v24 = vld [vmem:[#allocation2 + $0x139] sm:$0xff] }
 0x101   : > { %v4513_v13 = vpack.c.bf16 %v820_v12, %v819_v8  ;;  %v784_v53 = vld [vmem:[#allocation2 + $0x110] sm:$0xff]  ;;  %v4521_v19 = vpack.c.bf16 %v822_v18, %v821_v29  ;;  %v4529_v36 = vpack.c.bf16 %v824_v32, %v823_v24  ;;  %v826_v33 = vld [vmem:[#allocation2 + $0x159] sm:$0xff]  ;;  %v794_v5 = vld [vmem:[#allocation2 + $0x188] sm:$0xff] }
 0x102   : > { %1663 = vmatmul.mubr.bf16.vlgmr.msra.gmra.mrb[16].mxu1 %v4449_v22  ;;  %v813_v61 = vld [vmem:[#allocation2 + $0xc1] sm:$0xff]  ;;  %v4519_v45 = vpack.c.bf16 %v784_v53, %v783_v28  ;;  %v825_v23 = vld [vmem:[#allocation2 + $0x151] sm:$0xff]  ;;  %v830_v38 = vld [vmem:[#allocation2 + $0x189] sm:$0xff] }
 0x103   : > { %3244 = vmatpush3.bf16.msra.mxu1 %v3564_v1  ;;  %1670 = vmatprep.mubr.bf16.mxu1 %v4211_v27  ;;  %v814_v0 = vld [vmem:[#allocation2 + $0xc9] sm:$0xff]  ;;  %v3567_v27 = vld [vmem:[%s5102_s3 + $0x98] sm:$0xff]   ;;  %v3568_v1 = vld [vmem:[%s5102_s3 + $0xa0] sm:$0xff]   ;;  %v4553_v42 = vpack.c.bf16 %v830_v38, %v829_v37 }
 0x104   : > { %1237 = vmatmul.mubr.bf16.gmra.mrb[20].mxu0 %v4452_v21  ;;  %3245 = vmatprep.subr.bf16.mxu1 %v3565_v44  ;;  %v4471_v55 = vpack.c.bf16 %v814_v0, %v813_v61  ;;  %v777_v59 = vld [vmem:[#allocation2 + $0xc0] sm:$0xff]  ;;  %v778_v60 = vld [vmem:[#allocation2 + $0xc8] sm:$0xff]  ;;  %v4537_v0 = vpack.c.bf16 %v826_v33, %v825_v23  ;;  %v837_v53 = vld [vmem:[#allocation2 + $0x32] sm:$0xff] }
 0x105   : > { %1244 = vmatprep.mubr.bf16.mxu0 %v4457_v31  ;;  %v4480_v62 = vpack.c.bf16 %v778_v60, %v777_v59  ;;  %v827_v59 = vld [vmem:[#allocation2 + $0x169] sm:$0xff]  ;;  %v828_v60 = vld [vmem:[#allocation2 + $0x171] sm:$0xff]  ;;  %v835_v7 = vld [vmem:[#allocation2 + $0x1a] sm:$0xff] }
 0x106   : > { %v4545_v50 = vpack.c.bf16 %v828_v60, %v827_v59  ;;  %v836_v8 = vld [vmem:[#allocation2 + $0x22] sm:$0xff]  ;;  %v838_v29 = vld [vmem:[#allocation2 + $0x3a] sm:$0xff]  ;;  %v839_v18 = vld [vmem:[#allocation2 + $0x4a] sm:$0xff] }
 0x107   : > { %3246 = vmatpush3.bf16.msra.mxu1 %v3565_v44  ;;  %v787_v44 = vld [vmem:[#allocation2 + $0x138] sm:$0xff]  ;;  %v4561_v28 = vpack.c.bf16 %v836_v8, %v835_v7  ;;  %v4567_v40 = vpack.c.bf16 %v838_v29, %v837_v53  ;;  %v3571_v24 = vld [vmem:[%s5102_s3 + $0x180] sm:$0xff]   ;;  %v842_v33 = vld [vmem:[#allocation2 + $0x6a] sm:$0xff] }
 0x108   : > { %3247 = vmatprep.subr.bf16.mxu1 %v3566_v48  ;;  %v840_v47 = vld [vmem:[#allocation2 + $0x52] sm:$0xff]  ;;  %v841_v23 = vld [vmem:[#allocation2 + $0x62] sm:$0xff]  ;;  %v847_v8 = vld [vmem:[#allocation2 + $0xaa] sm:$0xff] }
 0x109   : > { %v4572_v32 = vpack.c.bf16 %v840_v47, %v839_v18  ;;  %v844_v59 = vld [vmem:[#allocation2 + $0x82] sm:$0xff]  ;;  %v4587_v60 = vpack.c.bf16 %v842_v33, %v841_v23  ;;  %v3577_v37 = vld [vmem:[%s5102_s3 + $0x1d8] sm:$0xff]   ;;  %v850_v23 = vld [vmem:[#allocation2 + $0xca] sm:$0xff] }
 0x10a   : > { %1671 = vmatmul.mubr.bf16.gmra.mrb[20].mxu1 %v4216_v54  ;;  %v3569_v54 = vld [vmem:[%s5102_s3 + $0xa8] sm:$0xff]   ;;  %v3578_v38 = vld [vmem:[%s5102_s3 + $0x198] sm:$0xff]   ;;  %v3579_v7 = vld [vmem:[%s5102_s3 + $0x1e0] sm:$0xff]  }
 0x10b   : > { %1678 = vmatprep.mubr.bf16.mxu1 %v4235_v17  ;;  %3248 = vmatpush3.bf16.msra.mxu1 %v3566_v48  ;;  %v788_v48 = vld [vmem:[#allocation2 + $0x140] sm:$0xff]  ;;  %v848_v53 = vld [vmem:[#allocation2 + $0xb2] sm:$0xff] }
 0x10c   : > { %1245 = vmatmul.mubr.bf16.gmra.mrb[24].mxu0 %v4466_v25  ;;  %3249 = vmatprep.subr.bf16.mxu1 %v3567_v27  ;;  %v4535_v61 = vpack.c.bf16 %v788_v48, %v787_v44  ;;  %v3573_v44 = vld [vmem:[%s5102_s3 + $0x1c8] sm:$0xff]   ;;  %v3580_v18 = vld [vmem:[%s5102_s3 + $0x1a0] sm:$0xff]   ;;  %v4612_v47 = vpack.c.bf16 %v848_v53, %v847_v8  ;;  %v3584_v33 = vld [vmem:[%s5102_s3 + $0x1f0] sm:$0xff]  }
 0x10d   : > { %1252 = vmatprep.mubr.bf16.mxu0 %v4471_v55  ;;  %v3574_v48 = vld [vmem:[%s5102_s3 + $0x188] sm:$0xff]  }
 0x10f   : > { %3250 = vmatpush3.bf16.msra.mxu1 %v3567_v27  ;;  %v789_v27 = vld [vmem:[#allocation2 + $0x150] sm:$0xff] }
 0x110   : > { %3251 = vmatprep.subr.bf16.mxu1 %v3568_v1 }
 0x112   : > { %1679 = vmatmul.mubr.bf16.gmra.mrb[24].mxu1 %v4241_v52 }
 0x113   : > { %1686 = vmatprep.mubr.bf16.mxu1 %v4313_v46  ;;  %3252 = vmatpush3.bf16.msra.mxu1 %v3568_v1  ;;  %v790_v1 = vld [vmem:[#allocation2 + $0x158] sm:$0xff] }
 0x114   : > { %1253 = vmatmul.mubr.bf16.gmra.mrb[28].mxu0 %v4480_v62  ;;  %3253 = vmatprep.subr.bf16.mxu1 %v3569_v54  ;;  %v4543_v35 = vpack.c.bf16 %v790_v1, %v789_v27  ;;  %v3575_v27 = vld [vmem:[%s5102_s3 + $0x1d0] sm:$0xff]   ;;  %v843_v1 = vld [vmem:[#allocation2 + $0x7a] sm:$0xff] }
 0x115   : > { %1260 = vmatprep.mubr.bf16.mxu0 %v4485_v34 }
 0x117   : > { %3254 = vmatpush3.bf16.msra.mxu1 %v3569_v54  ;;  %v791_v54 = vld [vmem:[#allocation2 + $0x168] sm:$0xff] }
 0x118   : > { %3255 = vmatprep.subr.bf16.mxu1 %v3572_v63 }
 0x11a   : > { %1687 = vmatmul.mubr.bf16.gmra.mrb[28].mxu1 %v4318_v51 }
 0x11b   : > { %1694 = vmatprep.mubr.bf16.mxu1 %v4380_v57  ;;  %3256 = vmatpush3.bf16.msra.mxu1 %v3572_v63  ;;  %v792_v63 = vld [vmem:[#allocation2 + $0x170] sm:$0xff] }
 0x11c   : > { %1261 = vmatmul.mubr.bf16.gmra.mrb[32].mxu0 %v4494_v43  ;;  %3257 = vmatprep.subr.bf16.mxu1 %v3581_v11  ;;  %v4551_v39 = vpack.c.bf16 %v792_v63, %v791_v54  ;;  %v3576_v54 = vld [vmem:[%s5102_s3 + $0x190] sm:$0xff]   ;;  %v4592_v63 = vpack.c.bf16 %v844_v59, %v843_v1  ;;  %v3586_v59 = vld [vmem:[%s5102_s3 + $0x1f8] sm:$0xff]  }
 0x11d   : > { %1268 = vmatprep.mubr.bf16.mxu0 %v4499_v3  ;;  %v3585_v1 = vld [vmem:[%s5102_s3 + $0x1b0] sm:$0xff]  }
 0x11f   : > { %3258 = vmatpush3.bf16.msra.mxu1 %v3581_v11  ;;  %v793_v11 = vld [vmem:[#allocation2 + $0x180] sm:$0xff] }
 0x120   : > { %3291 = vmatprep.subr.bf16.mxu1 %v4507_v10  ;;  %v4559_v12 = vpack.c.bf16 %v794_v5, %v793_v11  ;;  %v845_v11 = vld [vmem:[#allocation2 + $0x92] sm:$0xff]  ;;  %v846_v5 = vld [vmem:[#allocation2 + $0x9a] sm:$0xff] }
 0x121   : > { %v4607_v29 = vpack.c.bf16 %v846_v5, %v845_v11  ;;  %v3589_v5 = vld [vmem:[%s5102_s3 + $0x208] sm:$0xff]  }
 0x122   : > { %1695 = vmatmul.mubr.bf16.gmra.mrb[32].mxu1 %v4382_v58 }
 0x123   : > { %1702 = vmatprep.mubr.bf16.mxu1 %v4438_v4 }
 0x124   : > { %1269 = vmatmul.mubr.bf16.gmra.mrb[36].mxu0 %v4510_v41 }
 0x125   : > { %1276 = vmatprep.mubr.bf16.mxu0 %v4513_v13 }
 0x12a   : > { %1703 = vmatmul.mubr.bf16.gmra.mrb[36].mxu1 %v4441_v16 }
 0x12b   : > { %1710 = vmatprep.mubr.bf16.mxu1 %v4445_v20 }
 0x12c   : > { %1277 = vmatmul.mubr.bf16.gmra.mrb[40].mxu0 %v4519_v45 }
 0x12d   : > { %1284 = vmatprep.mubr.bf16.mxu0 %v4521_v19 }
 0x132   : > { %1711 = vmatmul.mubr.bf16.gmra.mrb[40].mxu1 %v4452_v21 }
 0x133   : > { %1718 = vmatprep.mubr.bf16.mxu1 %v4457_v31 }
 0x134   : > { %1285 = vmatmul.mubr.bf16.gmra.mrb[44].mxu0 %v4527_v30 }
 0x135   : > { %1292 = vmatprep.mubr.bf16.mxu0 %v4529_v36 }
 0x13a   : > { %1719 = vmatmul.mubr.bf16.gmra.mrb[44].mxu1 %v4466_v25 }
 0x13b   : > { %1726 = vmatprep.mubr.bf16.mxu1 %v4471_v55 }
 0x13c   : > { %1293 = vmatmul.mubr.bf16.gmra.mrb[48].mxu0 %v4535_v61 }
 0x13d   : > { %1300 = vmatprep.mubr.bf16.mxu0 %v4537_v0 }
 0x142   : > { %1727 = vmatmul.mubr.bf16.gmra.mrb[48].mxu1 %v4480_v62 }
 0x143   : > { %1734 = vmatprep.mubr.bf16.mxu1 %v4485_v34 }
 0x144   : > { %1301 = vmatmul.mubr.bf16.gmra.mrb[52].mxu0 %v4543_v35 }
 0x145   : > { %1308 = vmatprep.mubr.bf16.mxu0 %v4545_v50 }
 0x14a   : > { %1735 = vmatmul.mubr.bf16.gmra.mrb[52].mxu1 %v4494_v43 }
 0x14b   : > { %1742 = vmatprep.mubr.bf16.mxu1 %v4499_v3 }
 0x14c   : > { %1309 = vmatmul.mubr.bf16.gmra.mrb[56].mxu0 %v4551_v39 }
 0x14d   : > { %1316 = vmatprep.mubr.bf16.mxu0 %v4553_v42 }
 0x152   : > { %1743 = vmatmul.mubr.bf16.gmra.mrb[56].mxu1 %v4510_v41 }
 0x153   : > { %1750 = vmatprep.mubr.bf16.mxu1 %v4513_v13 }
 0x154   : > { %1317 = vmatmul.mubr.bf16.gmra.mrb[60].mxu0 %v4559_v12 }
 0x155   : > { %3211 = vmatprep.mubr.bf16.mxu0 %v4561_v28 }
 0x15a   : > { %1751 = vmatmul.mubr.bf16.gmra.mrb[60].mxu1 %v4519_v45 }
 0x15b   : > { %1758 = vmatprep.mubr.bf16.mxu1 %v4521_v19 }
 0x15c   : > { %3212 = vmatmul.mubr.bf16.vlgmr.msra.gmra.mrb[64].mxu0 %v4567_v40 }
 0x15d   : > { %3060 = vmatpush3.bf16.msra.mxu0 %v3571_v24  ;;  %3215 = vmatprep.mubr.bf16.mxu0 %v4572_v32  ;;  %v3582_v24 = vld [vmem:[%s5102_s3 + $0x1e8] sm:$0xff]  }
 0x15e   : > { %3061 = vmatprep.subr.bf16.mxu0 %v3573_v44  ;;  %v3583_v44 = vld [vmem:[%s5102_s3 + $0x1a8] sm:$0xff]  }
 0x161   : > { %3062 = vmatpush3.bf16.msra.mxu0 %v3574_v48  ;;  %v849_v48 = vld [vmem:[#allocation2 + $0xc2] sm:$0xff] }
 0x162   : > { %1759 = vmatmul.mubr.bf16.gmra.mrb[64].mxu1 %v4527_v30  ;;  %3063 = vmatprep.subr.bf16.mxu0 %v3575_v27  ;;  %v4627_v27 = vpack.c.bf16 %v850_v23, %v849_v48 }
 0x163   : > { %1766 = vmatprep.mubr.bf16.mxu1 %v4529_v36 }
 0x164   : > { %3216 = vmatmul.mubr.bf16.gmra.mrb[68].mxu0 %v4587_v60 }
 0x165   : > { %3064 = vmatpush3.bf16.msra.mxu0 %v3576_v54  ;;  %3219 = vmatprep.mubr.bf16.mxu0 %v4592_v63  ;;  %v833_v54 = vld [vmem:[#allocation2 + $0x2] sm:$0xff] }
 0x166   : > { %3065 = vmatprep.subr.bf16.mxu0 %v3577_v37  ;;  %v834_v37 = vld [vmem:[#allocation2 + $0xa] sm:$0xff] }
 0x167   : > { %v871_v11 = vpack.c.bf16 %v834_v37, %v833_v54 }
 0x169   : > { %3066 = vmatpush3.bf16.msra.mxu0 %v3578_v38  ;;  %v3587_v38 = vld [vmem:[%s5102_s3 + $0x1b8] sm:$0xff]  }
 0x16a   : > { %1767 = vmatmul.mubr.bf16.gmra.mrb[68].mxu1 %v4535_v61  ;;  %3067 = vmatprep.subr.bf16.mxu0 %v3579_v7 }
 0x16b   : > { %1774 = vmatprep.mubr.bf16.mxu1 %v4537_v0 }
 0x16c   : > { %3220 = vmatmul.mubr.bf16.gmra.mrb[72].mxu0 %v4607_v29 }
 0x16d   : > { %3068 = vmatpush3.bf16.msra.mxu0 %v3580_v18  ;;  %3223 = vmatprep.mubr.bf16.mxu0 %v4612_v47 }
 0x16e   : > { %3069 = vmatprep.subr.bf16.mxu0 %v3582_v24 }
 0x171   : > { %3070 = vmatpush3.bf16.msra.mxu0 %v3583_v44 }
 0x172   : > { %1775 = vmatmul.mubr.bf16.gmra.mrb[72].mxu1 %v4543_v35  ;;  %3071 = vmatprep.subr.bf16.mxu0 %v3584_v33 }
 0x173   : > { %1782 = vmatprep.mubr.bf16.mxu1 %v4545_v50 }
 0x174   : > { %3224 = vmatmul.mubr.bf16.gmra.mrb[76].mxu0 %v4627_v27 }
 0x175   : > { %3072 = vmatpush3.bf16.msra.mxu0 %v3585_v1  ;;  %2177 = vmatprep.mubr.bf16.mxu0 %v4235_v17  ;;  %v3590_v17 = vld [vmem:[%s5102_s3 + $0x210] sm:$0xff]  }
 0x176   : > { %3073 = vmatprep.subr.bf16.mxu0 %v3586_v59 }
 0x179   : > { %3074 = vmatpush3.bf16.msra.mxu0 %v3587_v38 }
 0x17a   : > { %1783 = vmatmul.mubr.bf16.gmra.mrb[76].mxu1 %v4551_v39 }
 0x17b   : > { %3259 = vmatprep.mubr.bf16.mxu1 %v871_v11 }
 0x17c   : > { %2178 = vmatmul.mubr.bf16.vlgmr.msra.gmra.mrb[80].mxu0 %v4241_v52  ;;  %v3591_v52 = vld [vmem:[%s5102_s3 + $0x218] sm:$0xff]  }
 0x17d   : > { %2185 = vmatprep.mubr.bf16.mxu0 %v4313_v46  ;;  %v3592_v46 = vld [vmem:[%s5102_s3 + $0x220] sm:$0xff]  }
 0x182   : > { %3260 = vmatmul.mubr.bf16.vlgmr.msra.gmra.mrb[80].mxu1 %v4561_v28 }
 0x183   : > { %3292 = vmatpush3.bf16.msra.mxu1 %v4507_v10  ;;  %3263 = vmatprep.mubr.bf16.mxu1 %v4567_v40 }
 0x184   : > { %2186 = vmatmul.mubr.bf16.gmra.mrb[84].mxu0 %v4318_v51  ;;  %3293 = vmatprep.subr.bf16.mxu1 %v3589_v5  ;;  %v3593_v51 = vld [vmem:[%s5102_s3 + $0x228] sm:$0xff]  }
 0x185   : > { %2193 = vmatprep.mubr.bf16.mxu0 %v4380_v57  ;;  %v3594_v57 = vld [vmem:[%s5102_s3 + $0x230] sm:$0xff]  }
 0x187   : > { %3294 = vmatpush3.bf16.msra.mxu1 %v3589_v5 }
 0x188   : > { %3295 = vmatprep.subr.bf16.mxu1 %v3590_v17 }
 0x18a   : > { %3264 = vmatmul.mubr.bf16.gmra.mrb[84].mxu1 %v4572_v32 }
 0x18b   : > { %3267 = vmatprep.mubr.bf16.mxu1 %v4587_v60  ;;  %3296 = vmatpush3.bf16.msra.mxu1 %v3590_v17 }
 0x18c   : > { %2194 = vmatmul.mubr.bf16.gmra.mrb[88].mxu0 %v4382_v58  ;;  %3297 = vmatprep.subr.bf16.mxu1 %v3591_v52  ;;  %v3595_v58 = vld [vmem:[%s5102_s3 + $0x238] sm:$0xff]  }
 0x18d   : > { %2201 = vmatprep.mubr.bf16.mxu0 %v4438_v4 }
 0x18f   : > { %3298 = vmatpush3.bf16.msra.mxu1 %v3591_v52 }
 0x190   : > { %3299 = vmatprep.subr.bf16.mxu1 %v3592_v46 }
 0x192   : > { %3268 = vmatmul.mubr.bf16.gmra.mrb[88].mxu1 %v4592_v63 }
 0x193   : > { %3271 = vmatprep.mubr.bf16.mxu1 %v4607_v29  ;;  %3300 = vmatpush3.bf16.msra.mxu1 %v3592_v46 }
 0x194   : > { %2202 = vmatmul.mubr.bf16.gmra.mrb[92].mxu0 %v4441_v16  ;;  %3301 = vmatprep.subr.bf16.mxu1 %v3593_v51 }
 0x195   : > { %2209 = vmatprep.mubr.bf16.mxu0 %v4445_v20 }
 0x197   : > { %3302 = vmatpush3.bf16.msra.mxu1 %v3593_v51 }
 0x198   : > { %3303 = vmatprep.subr.bf16.mxu1 %v3594_v57 }
 0x19a   : > { %3272 = vmatmul.mubr.bf16.gmra.mrb[92].mxu1 %v4612_v47 }
 0x19b   : > { %3275 = vmatprep.mubr.bf16.mxu1 %v4627_v27  ;;  %3304 = vmatpush3.bf16.msra.mxu1 %v3594_v57 }
 0x19c   : > { %2210 = vmatmul.mubr.bf16.gmra.mrb[96].mxu0 %v4452_v21  ;;  %3305 = vmatprep.subr.bf16.mxu1 %v3595_v58 }
 0x19d   : > { %2217 = vmatprep.mubr.bf16.mxu0 %v4457_v31 }
 0x19f   : > { %3306 = vmatpush3.bf16.msra.mxu1 %v3595_v58 }
 0x1a2   : > { %3276 = vmatmul.mubr.bf16.gmra.mrb[0].mxu1 %v4214_v49 }
 0x1a3   : > { %3279 = vmatprep.mubr.bf16.mxu1 %v4228_v2 }
 0x1a4   : > { %2218 = vmatmul.mubr.bf16.gmra.mrb[100].mxu0 %v4466_v25 }
 0x1a5   : > { %2225 = vmatprep.mubr.bf16.mxu0 %v4471_v55 }
 0x1a9   : > { %v2803_v4 = vpop.f32.mrb[0].mxu0 }
 0x1aa   : > { %3280 = vmatmul.mubr.bf16.gmra.mrb[4].mxu1 %v4292_v56  ;;  %v2804_v16 = vpop.f32.mrb[1].mxu0 }
 0x1ab   : > { %3283 = vmatprep.mubr.bf16.mxu1 %v4305_v14  ;;  %v4689_v20 = vadd.f32 %v2804_v16, %v2803_v4  ;;  %v2806_v21 = vpop.f32.mrb[2].mxu0 }
 0x1ac   : > { %2226 = vmatmul.mubr.bf16.gmra.mrb[104].mxu0 %v4480_v62  ;;  %v2807_v31 = vpop.f32.mrb[3].mxu0 }
 0x1ad   : > { %v4692_v10 = vadd.f32 %v2807_v31, %v2806_v21  ;;  %2233 = vmatprep.mubr.bf16.mxu0 %v4485_v34  ;;  %v831_v21 = vld [vmem:[#allocation2 + $0x199] sm:$0xff]  ;;  %v832_v31 = vld [vmem:[#allocation2 + $0x1a1] sm:$0xff] }
 0x1b1   : > { %v2809_v28 = vpop.f32.mrb[4].mxu0 }
 0x1b2   : > { %3284 = vmatmul.mubr.bf16.gmra.mrb[8].mxu1 %v4331_v6  ;;  %v2810_v25 = vpop.f32.mrb[5].mxu0 }
 0x1b3   : > { %3287 = vmatprep.mubr.bf16.mxu1 %v4374_v15  ;;  %v4697_v55 = vadd.f32 %v2810_v25, %v2809_v28  ;;  %v2812_v7 = vpop.f32.mrb[6].mxu0 }
 0x1b4   : > { %2234 = vmatmul.mubr.bf16.gmra.mrb[108].mxu0 %v4494_v43  ;;  %v2813_v8 = vpop.f32.mrb[7].mxu0 }
 0x1b5   : > { %v4700_v53 = vadd.f32 %v2813_v8, %v2812_v7  ;;  %2241 = vmatprep.mubr.bf16.mxu0 %v4499_v3 }
 0x1b9   : > { %v2815_v62 = vpop.f32.mrb[8].mxu0 }
 0x1ba   : > { %3288 = vmatmul.mubr.bf16.gmra.mrb[12].mxu1 %v4397_v26  ;;  %v2816_v34 = vpop.f32.mrb[9].mxu0 }
 0x1bb   : > { %3307 = vmatprep.mubr.bf16.mxu1 %v4567_v40  ;;  %v4705_v18 = vadd.f32 %v2816_v34, %v2815_v62  ;;  %v2818_v24 = vpop.f32.mrb[10].mxu0 }
 0x1bc   : > { %2242 = vmatmul.mubr.bf16.gmra.mrb[112].mxu0 %v4510_v41  ;;  %v2819_v44 = vpop.f32.mrb[11].mxu0 }
 0x1bd   : > { %v4708_v48 = vadd.f32 %v2819_v44, %v2818_v24  ;;  %2249 = vmatprep.mubr.bf16.mxu0 %v4513_v13 }
 0x1c2   : > { %3308 = vmatmul.mubr.bf16.vlgmr.msra.gmra.mrb[80].mxu1 %v4572_v32 }
 0x1c3   : > { %3311 = vmatprep.mubr.bf16.mxu1 %v4587_v60  ;;  %v2821_v43 = vpop.f32.mrb[12].mxu0 }
 0x1c4   : > { %2250 = vmatmul.mubr.bf16.gmra.mrb[116].mxu0 %v4519_v45  ;;  %v2822_v3 = vpop.f32.mrb[13].mxu0 }
 0x1c5   : > { %v4714_v23 = vadd.f32 %v2822_v3, %v2821_v43  ;;  %v2824_v40 = vpop.f32.mrb[14].mxu0  ;;  %2257 = vmatprep.mubr.bf16.mxu0 %v4521_v19 }
 0x1c6   : > { %v2825_v33 = vpop.f32.mrb[15].mxu0 }
 0x1c7   : > { %v4717_v41 = vadd.f32 %v2825_v33, %v2824_v40 }
 0x1ca   : > { %3312 = vmatmul.mubr.bf16.gmra.mrb[84].mxu1 %v4592_v63 }
 0x1cb   : > { %3315 = vmatprep.mubr.bf16.mxu1 %v4607_v29 }
 0x1cc   : > { %2258 = vmatmul.mubr.bf16.gmra.mrb[120].mxu0 %v4527_v30 }
 0x1cd   : > { %2265 = vmatprep.mubr.bf16.mxu0 %v4529_v36 }
 0x1cf   : > { %v2827_v13 = vpop.f32.mrb[16].mxu0 }
 0x1d0   : > { %v2828_v32 = vpop.f32.mrb[17].mxu0 }
 0x1d1   : > { %v4723_v45 = vadd.f32 %v2828_v32, %v2827_v13  ;;  %v2830_v60 = vpop.f32.mrb[18].mxu0 }
 0x1d2   : > { %3316 = vmatmul.mubr.bf16.gmra.mrb[88].mxu1 %v4612_v47  ;;  %v2831_v1 = vpop.f32.mrb[19].mxu0 }
 0x1d3   : > { %v4726_v19 = vadd.f32 %v2831_v1, %v2830_v60  ;;  %3319 = vmatprep.mubr.bf16.mxu1 %v4627_v27 }
 0x1d4   : > { %2266 = vmatmul.mubr.bf16.gmra.mrb[124].mxu0 %v4535_v61 }
 0x1d5   : > { %v2939_v63 = vpop.f32.mrb[16].mxu1  ;;  %2273 = vmatprep.mubr.bf16.mxu0 %v4537_v0 }
 0x1d6   : > { %v2940_v30 = vpop.f32.mrb[17].mxu1 }
 0x1d7   : > { %v4731_v29 = vadd.f32 %v2940_v30, %v2939_v63  ;;  %v2942_v36 = vpop.f32.mrb[18].mxu1  ;;  %v2833_v59 = vpop.f32.mrb[20].mxu0  ;;  %v868_v30 = vld [vmem:[#allocation2 + $0x1a2] sm:$0xff] }
 0x1d8   : > { %v2943_v54 = vpop.f32.mrb[19].mxu1  ;;  %v2834_v37 = vpop.f32.mrb[21].mxu0 }
 0x1d9   : > { %v4733_v38 = vadd.f32 %v2943_v54, %v2942_v36  ;;  %v4735_v47 = vadd.f32 %v2834_v37, %v2833_v59  ;;  %v2836_v11 = vpop.f32.mrb[22].mxu0 }
 0x1da   : > { %3320 = vmatmul.mubr.bf16.gmra.mrb[92].mxu1 %v4214_v49  ;;  %v2837_v27 = vpop.f32.mrb[23].mxu0 }
 0x1db   : > { %v4738_v5 = vadd.f32 %v2837_v27, %v2836_v11  ;;  %3323 = vmatprep.mubr.bf16.mxu1 %v4228_v2 }
 0x1dc   : > { %2274 = vmatmul.mubr.bf16.gmra.mrb[128].mxu0 %v4543_v35 }
 0x1dd   : > { %v2945_v61 = vpop.f32.mrb[20].mxu1  ;;  %2281 = vmatprep.mubr.bf16.mxu0 %v4545_v50 }
 0x1de   : > { %v2946_v0 = vpop.f32.mrb[21].mxu1 }
 0x1df   : > { %v4743_v17 = vadd.f32 %v2946_v0, %v2945_v61  ;;  %v2948_v52 = vpop.f32.mrb[22].mxu1  ;;  %v2839_v46 = vpop.f32.mrb[24].mxu0 }
 0x1e0   : > { %v2949_v51 = vpop.f32.mrb[23].mxu1  ;;  %v2840_v57 = vpop.f32.mrb[25].mxu0 }
 0x1e1   : > { %v4745_v58 = vadd.f32 %v2949_v51, %v2948_v52  ;;  %v4747_v49 = vadd.f32 %v2840_v57, %v2839_v46  ;;  %v2842_v4 = vpop.f32.mrb[26].mxu0 }
 0x1e2   : > { %3324 = vmatmul.mubr.bf16.gmra.mrb[0].mxu1 %v4292_v56  ;;  %v2843_v2 = vpop.f32.mrb[27].mxu0 }
 0x1e3   : > { %v4750_v16 = vadd.f32 %v2843_v2, %v2842_v4  ;;  %3327 = vmatprep.mubr.bf16.mxu1 %v4305_v14  ;;  %v921_v14 = vpack.c.bf16 %v832_v31, %v831_v21 }
 0x1e4   : > { %2282 = vmatmul.mubr.bf16.gmra.mrb[132].mxu0 %v4551_v39 }
 0x1e5   : > { %v2951_v35 = vpop.f32.mrb[24].mxu1  ;;  %2289 = vmatprep.mubr.bf16.mxu0 %v4553_v42 }
 0x1e6   : > { %v2952_v50 = vpop.f32.mrb[25].mxu1 }
 0x1e7   : > { %v4755_v28 = vadd.f32 %v2952_v50, %v2951_v35  ;;  %v2954_v25 = vpop.f32.mrb[26].mxu1  ;;  %v2845_v7 = vpop.f32.mrb[28].mxu0 }
 0x1e8   : > { %v2955_v8 = vpop.f32.mrb[27].mxu1  ;;  %v2846_v62 = vpop.f32.mrb[29].mxu0 }
 0x1e9   : > { %v4757_v56 = vadd.f32 %v2955_v8, %v2954_v25  ;;  %v4759_v34 = vadd.f32 %v2846_v62, %v2845_v7  ;;  %v2848_v24 = vpop.f32.mrb[30].mxu0 }
 0x1ea   : > { %3328 = vmatmul.mubr.bf16.gmra.mrb[4].mxu1 %v4331_v6  ;;  %v2849_v39 = vpop.f32.mrb[31].mxu0 }
 0x1eb   : > { %v4762_v44 = vadd.f32 %v2849_v39, %v2848_v24  ;;  %3331 = vmatprep.mubr.bf16.mxu1 %v4374_v15 }
 0x1ec   : > { %2290 = vmatmul.mubr.bf16.gmra.mrb[136].mxu0 %v4559_v12  ;;  %v867_v12 = vld [vmem:[#allocation2 + $0x19a] sm:$0xff] }
 0x1ed   : > { %v2957_v42 = vpop.f32.mrb[28].mxu1  ;;  %2297 = vmatprep.mubr.bf16.mxu0 %v921_v14  ;;  %v922_v54 = vpack.c.bf16 %v868_v30, %v867_v12 }
 0x1ee   : > { %v2958_v43 = vpop.f32.mrb[29].mxu1 }
 0x1ef   : > { %v4766_v3 = vadd.f32 %v2958_v43, %v2957_v42  ;;  %v2960_v40 = vpop.f32.mrb[30].mxu1  ;;  %v2851_v33 = vpop.f32.mrb[32].mxu0 }
 0x1f0   : > { %v2961_v13 = vpop.f32.mrb[31].mxu1  ;;  %v2852_v32 = vpop.f32.mrb[33].mxu0 }
 0x1f1   : > { %v4768_v60 = vadd.f32 %v2961_v13, %v2960_v40  ;;  %v4770_v1 = vadd.f32 %v2852_v32, %v2851_v33  ;;  %v2854_v6 = vpop.f32.mrb[34].mxu0 }
 0x1f2   : > { %3332 = vmatmul.mubr.bf16.gmra.mrb[8].mxu1 %v4397_v26  ;;  %v2855_v63 = vpop.f32.mrb[35].mxu0 }
 0x1f3   : > { %v4773_v15 = vadd.f32 %v2855_v63, %v2854_v6  ;;  %3335 = vmatprep.mubr.bf16.mxu1 %v4436_v9 }
 0x1f4   : > { %2298 = vmatmul.mubr.bf16.gmra.mrb[140].mxu0 %v4449_v22 }
 0x1f5   : > { %v2963_v36 = vpop.f32.mrb[32].mxu1 }
 0x1f6   : > { %v2964_v59 = vpop.f32.mrb[33].mxu1 }
 0x1f7   : > { %v4777_v37 = vadd.f32 %v2964_v59, %v2963_v36  ;;  %v2966_v11 = vpop.f32.mrb[34].mxu1  ;;  %v2857_v27 = vpop.f32.mrb[36].mxu0 }
 0x1f8   : > { %v2967_v61 = vpop.f32.mrb[35].mxu1  ;;  %v2858_v0 = vpop.f32.mrb[37].mxu0 }
 0x1f9   : > { %v4779_v52 = vadd.f32 %v2967_v61, %v2966_v11  ;;  %v2859_v26 = vadd.f32 %v2858_v0, %v2857_v27  ;;  %v2860_v46 = vpop.f32.mrb[38].mxu0 }
 0x1fa   : > { %3336 = vmatmul.mubr.bf16.gmra.mrb[12].mxu1 %v922_v54  ;;  %v2861_v51 = vpop.f32.mrb[39].mxu0 }
 0x1fb   : > { %v4781_v9 = vadd.f32 %v2861_v51, %v2860_v46 }
 0x1fd   : > { %v2969_v57 = vpop.f32.mrb[36].mxu1 }
 0x1fe   : > { %v2970_v4 = vpop.f32.mrb[37].mxu1 }
 0x1ff   : > { %v4783_v22 = vadd.f32 %v2970_v4, %v2969_v57  ;;  %v2972_v2 = vpop.f32.mrb[38].mxu1  ;;  %v2863_v35 = vpop.f32.mrb[40].mxu0 }
 0x200   : > { %v2973_v50 = vpop.f32.mrb[39].mxu1  ;;  %v2864_v21 = vpop.f32.mrb[41].mxu0 }
 0x201   : > { %v4785_v31 = vadd.f32 %v2973_v50, %v2972_v2  ;;  %v4787_v25 = vadd.f32 %v2864_v21, %v2863_v35  ;;  %v2866_v7 = vpop.f32.mrb[42].mxu0 }
 0x202   : > { %v2867_v8 = vpop.f32.mrb[43].mxu0 }
 0x203   : > { %v4789_v62 = vadd.f32 %v2867_v8, %v2866_v7 }
 0x205   : > { %v2975_v24 = vpop.f32.mrb[40].mxu1 }
 0x206   : > { %v2976_v14 = vpop.f32.mrb[41].mxu1 }
 0x207   : > { %v4791_v39 = vadd.f32 %v2976_v14, %v2975_v24  ;;  %v2978_v42 = vpop.f32.mrb[42].mxu1  ;;  %v2869_v43 = vpop.f32.mrb[44].mxu0 }
 0x208   : > { %v2979_v40 = vpop.f32.mrb[43].mxu1  ;;  %v2870_v33 = vpop.f32.mrb[45].mxu0 }
 0x209   : > { %v4793_v13 = vadd.f32 %v2979_v40, %v2978_v42  ;;  %v4795_v32 = vadd.f32 %v2870_v33, %v2869_v43  ;;  %v2872_v6 = vpop.f32.mrb[46].mxu0 }
 0x20a   : > { %v2873_v63 = vpop.f32.mrb[47].mxu0 }
 0x20b   : > { %v4797_v12 = vadd.f32 %v2873_v63, %v2872_v6 }
 0x20d   : > { %v2981_v30 = vpop.f32.mrb[44].mxu1 }
 0x20e   : > { %v2982_v36 = vpop.f32.mrb[45].mxu1 }
 0x20f   : > { %v4799_v59 = vadd.f32 %v2982_v36, %v2981_v30  ;;  %v2984_v54 = vpop.f32.mrb[46].mxu1  ;;  %v2875_v11 = vpop.f32.mrb[48].mxu0 }
 0x210   : > { %v2985_v27 = vpop.f32.mrb[47].mxu1  ;;  %v2876_v61 = vpop.f32.mrb[49].mxu0 }
 0x211   : > { %v4801_v0 = vadd.f32 %v2985_v27, %v2984_v54  ;;  %v4803_v46 = vadd.f32 %v2876_v61, %v2875_v11  ;;  %v2878_v51 = vpop.f32.mrb[50].mxu0 }
 0x212   : > { %v2879_v57 = vpop.f32.mrb[51].mxu0 }
 0x213   : > { %v4805_v4 = vadd.f32 %v2879_v57, %v2878_v51 }
 0x215   : > { %v2987_v2 = vpop.f32.mrb[48].mxu1 }
 0x216   : > { %v2988_v35 = vpop.f32.mrb[49].mxu1 }
 0x217   : > { %v2989_v50 = vadd.f32 %v2988_v35, %v2987_v2  ;;  %v2990_v21 = vpop.f32.mrb[50].mxu1  ;;  %v2881_v7 = vpop.f32.mrb[52].mxu0 }
 0x218   : > { %v2991_v8 = vpop.f32.mrb[51].mxu1  ;;  %v2882_v24 = vpop.f32.mrb[53].mxu0 }
 0x219   : > { %v4808_v14 = vadd.f32 %v2989_v50, %v4770_v1  ;;  %v2992_v42 = vadd.f32 %v2991_v8, %v2990_v21  ;;  %v4810_v43 = vadd.f32 %v2882_v24, %v2881_v7  ;;  %v2884_v40 = vpop.f32.mrb[54].mxu0 }
 0x21a   : > { %v2885_v33 = vpop.f32.mrb[55].mxu0 }
 0x21b   : > { %v4813_v6 = vadd.f32 %v2992_v42, %v4773_v15  ;;  %v4815_v63 = vadd.f32 %v2885_v33, %v2884_v40 }
 0x21d   : > { %v2993_v30 = vpop.f32.mrb[52].mxu1 }
 0x21e   : > { %v2994_v36 = vpop.f32.mrb[53].mxu1 }
 0x21f   : > { %v2995_v54 = vadd.f32 %v2994_v36, %v2993_v30  ;;  %v2996_v11 = vpop.f32.mrb[54].mxu1  ;;  %v2887_v27 = vpop.f32.mrb[56].mxu0 }
 0x220   : > { %v2997_v61 = vpop.f32.mrb[55].mxu1  ;;  %v2888_v51 = vpop.f32.mrb[57].mxu0 }
 0x221   : > { %v4817_v57 = vadd.f32 %v2995_v54, %v2859_v26  ;;  %v2998_v1 = vadd.f32 %v2997_v61, %v2996_v11  ;;  %v4819_v2 = vadd.f32 %v2888_v51, %v2887_v27  ;;  %v2890_v35 = vpop.f32.mrb[58].mxu0 }
 0x222   : > { %v2891_v50 = vpop.f32.mrb[59].mxu0 }
 0x223   : > { %v4822_v21 = vadd.f32 %v2998_v1, %v4781_v9  ;;  %v4824_v15 = vadd.f32 %v2891_v50, %v2890_v35 }
 0x225   : > { %5104 = vst [vmem:[#allocation3_spill] sm:$0xff] %v4822_v21  ;;  %v2999_v7 = vpop.f32.mrb[56].mxu1 }
 0x226   : > { %v3000_v8 = vpop.f32.mrb[57].mxu1 }
 0x227   : > { %v3001_v24 = vadd.f32 %v3000_v8, %v2999_v7  ;;  %v3002_v42 = vpop.f32.mrb[58].mxu1  ;;  %v2893_v40 = vpop.f32.mrb[60].mxu0 }
 0x228   : > { %v3003_v33 = vpop.f32.mrb[59].mxu1  ;;  %v2894_v30 = vpop.f32.mrb[61].mxu0 }
 0x229   : > { %v4827_v26 = vadd.f32 %v3001_v24, %v4787_v25  ;;  %v3004_v36 = vadd.f32 %v3003_v33, %v3002_v42  ;;  %v4829_v54 = vadd.f32 %v2894_v30, %v2893_v40  ;;  %v2896_v11 = vpop.f32.mrb[62].mxu0 }
 0x22a   : > { %v2897_v27 = vpop.f32.mrb[63].mxu0 }
 0x22b   : > { %v4832_v9 = vadd.f32 %v3004_v36, %v4789_v62  ;;  %v4834_v61 = vadd.f32 %v2897_v27, %v2896_v11 }
 0x22d   : > { %v3005_v51 = vpop.f32.mrb[60].mxu1 }
 0x22e   : > { %v3006_v1 = vpop.f32.mrb[61].mxu1 }
 0x22f   : > { %v3007_v35 = vadd.f32 %v3006_v1, %v3005_v51  ;;  %v3008_v50 = vpop.f32.mrb[62].mxu1  ;;  %v3213_v7 = vpop.f32.mrb[64].mxu0 }
 0x230   : > { %v3009_v8 = vpop.f32.mrb[63].mxu1  ;;  %v1368_v21 = vadd.f32 %v3213_v7, %v4697_v55  ;;  %v1359_v25 = vpop.f32.mrb[65].mxu0 }
 0x231   : > { %v4838_v24 = vadd.f32 %v3007_v35, %v4795_v32  ;;  %v3010_v42 = vadd.f32 %v3009_v8, %v3008_v50  ;;  %v1360_v40 = vadd.f32 %v4689_v20, %v1359_v25  ;;  %v3214_v33 = vpop.f32.mrb[66].mxu0 }
 0x232   : > { %v4842_v62 = vadd.f32 %v4743_v17, %v1368_v21  ;;  %v1371_v30 = vadd.f32 %v3214_v33, %v4700_v53  ;;  %v1362_v36 = vpop.f32.mrb[67].mxu0 }
 0x233   : > { %v4846_v11 = vadd.f32 %v3010_v42, %v4797_v12  ;;  %v4849_v27 = vadd.f32 %v4731_v29, %v1360_v40  ;;  %v1363_v55 = vadd.f32 %v4692_v10, %v1362_v36 }
 0x234   : > { %v4853_v32 = vadd.f32 %v4745_v58, %v1371_v30 }
 0x235   : > { %v3011_v51 = vpop.f32.mrb[64].mxu1  ;;  %v4856_v20 = vadd.f32 %v4733_v38, %v1363_v55 }
 0x236   : > { %v3012_v17 = vpop.f32.mrb[65].mxu1 }
 0x237   : > { %v3013_v21 = vadd.f32 %v3012_v17, %v3011_v51  ;;  %v3014_v1 = vpop.f32.mrb[66].mxu1  ;;  %v3217_v53 = vpop.f32.mrb[68].mxu0 }
 0x238   : > { %v3015_v35 = vpop.f32.mrb[67].mxu1  ;;  %v1384_v12 = vadd.f32 %v3217_v53, %v4714_v23  ;;  %v1375_v50 = vpop.f32.mrb[69].mxu0 }
 0x239   : > { %v4860_v29 = vadd.f32 %v3013_v21, %v4803_v46  ;;  %v3016_v7 = vadd.f32 %v3015_v35, %v3014_v1  ;;  %v1376_v10 = vadd.f32 %v4705_v18, %v1375_v50  ;;  %v3218_v58 = vpop.f32.mrb[70].mxu0 }
 0x23a   : > { %v4864_v8 = vadd.f32 %v4766_v3, %v1384_v12  ;;  %v1387_v38 = vadd.f32 %v3218_v58, %v4717_v41  ;;  %v1378_v25 = vpop.f32.mrb[71].mxu0 }
 0x23b   : > { %v4868_v42 = vadd.f32 %v3016_v7, %v4805_v4  ;;  %v4871_v40 = vadd.f32 %v4755_v28, %v1376_v10  ;;  %v1379_v23 = vadd.f32 %v4708_v48, %v1378_v25 }
 0x23c   : > { %v4875_v46 = vadd.f32 %v4768_v60, %v1387_v38 }
 0x23d   : > { %v3017_v33 = vpop.f32.mrb[68].mxu1  ;;  %v4878_v18 = vadd.f32 %v4757_v56, %v1379_v23 }
 0x23e   : > { %v3018_v3 = vpop.f32.mrb[69].mxu1 }
 0x23f   : > { %v3019_v30 = vadd.f32 %v3018_v3, %v3017_v33  ;;  %v3020_v36 = vpop.f32.mrb[70].mxu1  ;;  %v3221_v41 = vpop.f32.mrb[72].mxu0 }
 0x240   : > { %v3021_v55 = vpop.f32.mrb[71].mxu1  ;;  %v1400_v4 = vadd.f32 %v3221_v41, %v4735_v47  ;;  %v1391_v51 = vpop.f32.mrb[73].mxu0 }
 0x241   : > { %v4882_v28 = vadd.f32 %v3019_v30, %v4810_v43  ;;  %v3022_v17 = vadd.f32 %v3021_v55, %v3020_v36  ;;  %v1392_v48 = vadd.f32 %v4723_v45, %v1391_v51  ;;  %v3222_v60 = vpop.f32.mrb[74].mxu0 }
 0x242   : > { %v4886_v21 = vadd.f32 %v4783_v22, %v1400_v4  ;;  %v1403_v56 = vadd.f32 %v3222_v60, %v4738_v5  ;;  %v1394_v1 = vpop.f32.mrb[75].mxu0 }
 0x243   : > { %v4890_v53 = vadd.f32 %v3022_v17, %v4815_v63  ;;  %v4893_v35 = vadd.f32 %v4777_v37, %v1392_v48  ;;  %v1395_v47 = vadd.f32 %v4726_v19, %v1394_v1 }
 0x244   : > { %v4897_v43 = vadd.f32 %v4785_v31, %v1403_v56 }
 0x245   : > { %v3023_v12 = vpop.f32.mrb[72].mxu1  ;;  %v4900_v45 = vadd.f32 %v4779_v52, %v1395_v47 }
 0x246   : > { %v3024_v22 = vpop.f32.mrb[73].mxu1 }
 0x247   : > { %v3025_v50 = vadd.f32 %v3024_v22, %v3023_v12  ;;  %v3026_v7 = vpop.f32.mrb[74].mxu1  ;;  %v3225_v5 = vpop.f32.mrb[76].mxu0 }
 0x248   : > { %v3027_v10 = vpop.f32.mrb[75].mxu1  ;;  %v1416_v63 = vadd.f32 %v3225_v5, %v4759_v34  ;;  %v1407_v58 = vpop.f32.mrb[77].mxu0 }
 0x249   : > { %v4904_v37 = vadd.f32 %v3025_v50, %v4819_v2  ;;  %v3028_v38 = vadd.f32 %v3027_v10, %v3026_v7  ;;  %v1408_v19 = vadd.f32 %v4747_v49, %v1407_v58  ;;  %v3226_v31 = vpop.f32.mrb[78].mxu0 }
 0x24a   : > { %v4908_v25 = vadd.f32 %v4799_v59, %v1416_v63  ;;  %v1419_v52 = vadd.f32 %v3226_v31, %v4762_v44  ;;  %v1410_v23 = vpop.f32.mrb[79].mxu0 }
 0x24b   : > { %v4912_v33 = vadd.f32 %v3028_v38, %v4824_v15  ;;  %v4915_v3 = vadd.f32 %v4791_v39, %v1408_v19  ;;  %v1411_v34 = vadd.f32 %v4750_v16, %v1410_v23 }
 0x24c   : > { %v4919_v2 = vadd.f32 %v4801_v0, %v1419_v52 }
 0x24d   : > { %v3029_v30 = vpop.f32.mrb[76].mxu1  ;;  %v4922_v49 = vadd.f32 %v4793_v13, %v1411_v34 }
 0x24e   : > { %v3030_v59 = vpop.f32.mrb[77].mxu1 }
 0x24f   : > { %v3031_v36 = vadd.f32 %v3030_v59, %v3029_v30  ;;  %v3032_v41 = vpop.f32.mrb[78].mxu1  ;;  %v3075_v44 = vpop.f32.mrb[80].mxu0 }
 0x250   : > { %v3033_v55 = vpop.f32.mrb[79].mxu1  ;;  %v3076_v4 = vpop.f32.mrb[81].mxu0 }
 0x251   : > { %v4925_v15 = vadd.f32 %v3031_v36, %v4829_v54  ;;  %v3034_v39 = vadd.f32 %v3033_v55, %v3032_v41  ;;  %v3077_v51 = vadd.f32 %v3076_v4, %v3075_v44  ;;  %v3078_v17 = vpop.f32.mrb[82].mxu0 }
 0x252   : > { %v3079_v16 = vpop.f32.mrb[83].mxu0 }
 0x253   : > { %v4928_v0 = vadd.f32 %v3034_v39, %v4834_v61  ;;  %v3080_v48 = vadd.f32 %v3079_v16, %v3078_v17  ;;  %v4931_v13 = vadd.f32 %v3077_v51, %v4849_v27 }
 0x255   : > { %v4934_v60 = vadd.f32 %v3080_v48, %v4856_v20 }
 0x257   : > { %v3081_v56 = vpop.f32.mrb[84].mxu0 }
 0x258   : > { %v3082_v1 = vpop.f32.mrb[85].mxu0 }
 0x259   : > { %v3083_v47 = vadd.f32 %v3082_v1, %v3081_v56  ;;  %v3084_v12 = vpop.f32.mrb[86].mxu0 }
 0x25a   : > { %v3085_v54 = vpop.f32.mrb[87].mxu0 }
 0x25b   : > { %v3086_v22 = vadd.f32 %v3085_v54, %v3084_v12  ;;  %v3357_v50 = vadd.f32 %v3083_v47, %v4842_v62 }
 0x25d   : > { %v4938_v7 = vadd.f32 %v3086_v22, %v4853_v32 }
 0x25f   : > { %v3087_v61 = vpop.f32.mrb[88].mxu0 }
 0x260   : > { %v3088_v5 = vpop.f32.mrb[89].mxu0 }
 0x261   : > { %v3089_v10 = vadd.f32 %v3088_v5, %v3087_v61  ;;  %v3090_v63 = vpop.f32.mrb[90].mxu0 }
 0x262   : > { %v3091_v27 = vpop.f32.mrb[91].mxu0 }
 0x263   : > { %v3092_v58 = vadd.f32 %v3091_v27, %v3090_v63  ;;  %v4941_v20 = vadd.f32 %v3089_v10, %v4871_v40 }
 0x265   : > { %v4944_v38 = vadd.f32 %v3092_v58, %v4878_v18 }
 0x267   : > { %v3093_v19 = vpop.f32.mrb[92].mxu0 }
 0x268   : > { %v3094_v31 = vpop.f32.mrb[93].mxu0 }
 0x269   : > { %v3095_v52 = vadd.f32 %v3094_v31, %v3093_v19  ;;  %v3096_v23 = vpop.f32.mrb[94].mxu0 }
 0x26a   : > { %v3097_v62 = vpop.f32.mrb[95].mxu0 }
 0x26b   : > { %v3098_v34 = vadd.f32 %v3097_v62, %v3096_v23  ;;  %v4947_v32 = vadd.f32 %v3095_v52, %v4864_v8 }
 0x26d   : > { %v4950_v30 = vadd.f32 %v3098_v34, %v4875_v46 }
 0x26f   : > { %v3099_v59 = vpop.f32.mrb[96].mxu0 }
 0x270   : > { %v3100_v36 = vpop.f32.mrb[97].mxu0 }
 0x271   : > { %v3101_v41 = vadd.f32 %v3100_v36, %v3099_v59  ;;  %v3102_v40 = vpop.f32.mrb[98].mxu0 }
 0x272   : > { %v3103_v44 = vpop.f32.mrb[99].mxu0 }
 0x273   : > { %v3104_v55 = vadd.f32 %v3103_v44, %v3102_v40  ;;  %v4953_v18 = vadd.f32 %v3101_v41, %v4893_v35 }
 0x275   : > { %v4956_v4 = vadd.f32 %v3104_v55, %v4900_v45 }
 0x277   : > { %v3105_v39 = vpop.f32.mrb[100].mxu0 }
 0x278   : > { %v3106_v51 = vpop.f32.mrb[101].mxu0 }
 0x279   : > { %v3107_v17 = vadd.f32 %v3106_v51, %v3105_v39  ;;  %v3108_v8 = vpop.f32.mrb[102].mxu0 }
 0x27a   : > { %v3109_v16 = vpop.f32.mrb[103].mxu0 }
 0x27b   : > { %v3110_v48 = vadd.f32 %v3109_v16, %v3108_v8  ;;  %v4959_v46 = vadd.f32 %v3107_v17, %v4886_v21  ;;  %v5105_v16 = vld [vmem:[#allocation3_spill] sm:$0xff] }
 0x27d   : > { %v4962_v56 = vadd.f32 %v3110_v48, %v4897_v43 }
 0x27f   : > { %v3111_v1 = vpop.f32.mrb[104].mxu0 }
 0x280   : > { %v3112_v47 = vpop.f32.mrb[105].mxu0 }
 0x281   : > { %v3113_v12 = vadd.f32 %v3112_v47, %v3111_v1  ;;  %v3114_v35 = vpop.f32.mrb[106].mxu0 }
 0x282   : > { %v3115_v54 = vpop.f32.mrb[107].mxu0 }
 0x283   : > { %v3116_v22 = vadd.f32 %v3115_v54, %v3114_v35  ;;  %v4965_v45 = vadd.f32 %v3113_v12, %v4915_v3 }
 0x285   : > { %v4968_v61 = vadd.f32 %v3116_v22, %v4922_v49 }
 0x287   : > { %v3117_v5 = vpop.f32.mrb[108].mxu0 }
 0x288   : > { %v3118_v10 = vpop.f32.mrb[109].mxu0 }
 0x289   : > { %v3119_v21 = vadd.f32 %v3118_v10, %v3117_v5  ;;  %v3120_v63 = vpop.f32.mrb[110].mxu0 }
 0x28a   : > { %v3121_v27 = vpop.f32.mrb[111].mxu0 }
 0x28b   : > { %v3122_v43 = vadd.f32 %v3121_v27, %v3120_v63  ;;  %v4971_v58 = vadd.f32 %v3119_v21, %v4908_v25 }
 0x28d   : > { %v4974_v19 = vadd.f32 %v3122_v43, %v4919_v2 }
 0x28f   : > { %v3123_v31 = vpop.f32.mrb[112].mxu0 }
 0x290   : > { %v3124_v52 = vpop.f32.mrb[113].mxu0 }
 0x291   : > { %v3125_v3 = vadd.f32 %v3124_v52, %v3123_v31  ;;  %v3126_v23 = vpop.f32.mrb[114].mxu0 }
 0x292   : > { %v3127_v62 = vpop.f32.mrb[115].mxu0 }
 0x293   : > { %v3128_v49 = vadd.f32 %v3127_v62, %v3126_v23  ;;  %v4977_v34 = vadd.f32 %v4808_v14, %v3125_v3 }
 0x295   : > { %v3309_v25 = vpop.f32.mrb[80].mxu1  ;;  %v4987_v2 = vadd.f32 %v4813_v6, %v3128_v49 }
 0x296   : > { %v3358_v59 = vadd.f32 %v3357_v50, %v3309_v25  ;;  %v2340_v36 = vpop.f32.mrb[81].mxu1 }
 0x297   : > { %v3362_v14 = vadd.f32 %v4931_v13, %v2340_v36  ;;  %v3310_v41 = vpop.f32.mrb[82].mxu1  ;;  %v3129_v40 = vpop.f32.mrb[116].mxu0 }
 0x298   : > { %2502 = vst.msk [vmem:[%s4984_s26 + $0x10] sm:$0xff] %vm2499_vm0, %v3358_v59  ;;  %v3366_v44 = vadd.f32 %v4938_v7, %v3310_v41  ;;  %v2343_v55 = vpop.f32.mrb[83].mxu1  ;;  %v3130_v39 = vpop.f32.mrb[117].mxu0 }
 0x299   : > { %2500 = vst.msk [vmem:[%s4984_s26] sm:$0xff] %vm2499_vm0, %v3362_v14  ;;  %v3370_v51 = vadd.f32 %v4934_v60, %v2343_v55  ;;  %v3131_v6 = vadd.f32 %v3130_v39, %v3129_v40  ;;  %v3132_v17 = vpop.f32.mrb[118].mxu0 }
 0x29a   : > { %2503 = vst.msk [vmem:[%s4984_s26 + $0x18] sm:$0xff] %vm2499_vm0, %v3366_v44  ;;  %v3133_v50 = vpop.f32.mrb[119].mxu0 }
 0x29b   : > { %2501 = vst.msk [vmem:[%s4984_s26 + $0x8] sm:$0xff] %vm2499_vm0, %v3370_v51  ;;  %v3134_v13 = vadd.f32 %v3133_v50, %v3132_v17  ;;  %v5001_v8 = vadd.f32 %v4817_v57, %v3131_v6 }
 0x29d   : > { %v3313_v7 = vpop.f32.mrb[84].mxu1  ;;  %v5004_v48 = vadd.f32 %v5105_v16, %v3134_v13 }
 0x29e   : > { %v3374_v60 = vadd.f32 %v4947_v32, %v3313_v7  ;;  %v2356_v1 = vpop.f32.mrb[85].mxu1 }
 0x29f   : > { %v3378_v47 = vadd.f32 %v4941_v20, %v2356_v1  ;;  %v3314_v12 = vpop.f32.mrb[86].mxu1  ;;  %v3135_v35 = vpop.f32.mrb[120].mxu0 }
 0x2a0   : > { %2506 = vst.msk [vmem:[%s4984_s26 + $0x30] sm:$0xff] %vm2499_vm0, %v3374_v60  ;;  %v3382_v54 = vadd.f32 %v4950_v30, %v3314_v12  ;;  %v2359_v22 = vpop.f32.mrb[87].mxu1  ;;  %v3136_v57 = vpop.f32.mrb[121].mxu0 }
 0x2a1   : > { %2504 = vst.msk [vmem:[%s4984_s26 + $0x20] sm:$0xff] %vm2499_vm0, %v3378_v47  ;;  %v3386_v5 = vadd.f32 %v4944_v38, %v2359_v22  ;;  %v3137_v10 = vadd.f32 %v3136_v57, %v3135_v35  ;;  %v3138_v21 = vpop.f32.mrb[122].mxu0 }
 0x2a2   : > { %2507 = vst.msk [vmem:[%s4984_s26 + $0x38] sm:$0xff] %vm2499_vm0, %v3382_v54  ;;  %v3139_v32 = vpop.f32.mrb[123].mxu0 }
 0x2a3   : > { %2505 = vst.msk [vmem:[%s4984_s26 + $0x28] sm:$0xff] %vm2499_vm0, %v3386_v5  ;;  %v3140_v20 = vadd.f32 %v3139_v32, %v3138_v21  ;;  %v5019_v63 = vadd.f32 %v4827_v26, %v3137_v10 }
 0x2a5   : > { %v3317_v30 = vpop.f32.mrb[88].mxu1  ;;  %v5022_v27 = vadd.f32 %v4832_v9, %v3140_v20 }
 0x2a6   : > { %v3390_v38 = vadd.f32 %v4959_v46, %v3317_v30  ;;  %v2372_v43 = vpop.f32.mrb[89].mxu1 }
 0x2a7   : > { %v3394_v31 = vadd.f32 %v4953_v18, %v2372_v43  ;;  %v3318_v52 = vpop.f32.mrb[90].mxu1  ;;  %v3141_v3 = vpop.f32.mrb[124].mxu0 }
 0x2a8   : > { %2510 = vst.msk [vmem:[%s4984_s26 + $0x50] sm:$0xff] %vm2499_vm0, %v3390_v38  ;;  %v3398_v23 = vadd.f32 %v4962_v56, %v3318_v52  ;;  %v2375_v62 = vpop.f32.mrb[91].mxu1  ;;  %v3142_v26 = vpop.f32.mrb[125].mxu0 }
 0x2a9   : > { %2508 = vst.msk [vmem:[%s4984_s26 + $0x40] sm:$0xff] %vm2499_vm0, %v3394_v31  ;;  %v3402_v9 = vadd.f32 %v4956_v4, %v2375_v62  ;;  %v3143_v49 = vadd.f32 %v3142_v26, %v3141_v3  ;;  %v3144_v25 = vpop.f32.mrb[126].mxu0 }
 0x2aa   : > { %2511 = vst.msk [vmem:[%s4984_s26 + $0x58] sm:$0xff] %vm2499_vm0, %v3398_v23  ;;  %v3145_v46 = vpop.f32.mrb[127].mxu0 }
 0x2ab   : > { %2509 = vst.msk [vmem:[%s4984_s26 + $0x48] sm:$0xff] %vm2499_vm0, %v3402_v9  ;;  %v3146_v18 = vadd.f32 %v3145_v46, %v3144_v25  ;;  %v3432_v59 = vadd.f32 %v4838_v24, %v3143_v49 }
 0x2ad   : > { %v3321_v56 = vpop.f32.mrb[92].mxu1  ;;  %v3438_v36 = vadd.f32 %v4846_v11, %v3146_v18 }
 0x2ae   : > { %v3406_v14 = vadd.f32 %v4971_v58, %v3321_v56  ;;  %v2388_v41 = vpop.f32.mrb[93].mxu1 }
 0x2af   : > { %v3410_v4 = vadd.f32 %v4965_v45, %v2388_v41  ;;  %v3322_v40 = vpop.f32.mrb[94].mxu1  ;;  %v3147_v44 = vpop.f32.mrb[128].mxu0 }
 0x2b0   : > { %2514 = vst.msk [vmem:[%s4984_s26 + $0x70] sm:$0xff] %vm2499_vm0, %v3406_v14  ;;  %v3414_v55 = vadd.f32 %v4974_v19, %v3322_v40  ;;  %v2391_v39 = vpop.f32.mrb[95].mxu1  ;;  %v3148_v51 = vpop.f32.mrb[129].mxu0 }
 0x2b1   : > { %2512 = vst.msk [vmem:[%s4984_s26 + $0x60] sm:$0xff] %vm2499_vm0, %v3410_v4  ;;  %v3418_v24 = vadd.f32 %v4968_v61, %v2391_v39  ;;  %v3149_v11 = vadd.f32 %v3148_v51, %v3147_v44  ;;  %v3150_v6 = vpop.f32.mrb[130].mxu0 }
 0x2b2   : > { %2515 = vst.msk [vmem:[%s4984_s26 + $0x78] sm:$0xff] %vm2499_vm0, %v3414_v55  ;;  %v3151_v58 = vpop.f32.mrb[131].mxu0 }
 0x2b3   : > { %2513 = vst.msk [vmem:[%s4984_s26 + $0x68] sm:$0xff] %vm2499_vm0, %v3418_v24  ;;  %v3152_v45 = vadd.f32 %v3151_v58, %v3150_v6  ;;  %v3447_v17 = vadd.f32 %v4860_v29, %v3149_v11 }
 0x2b5   : > { %v3325_v19 = vpop.f32.mrb[0].mxu1  ;;  %v3453_v50 = vadd.f32 %v4868_v42, %v3152_v45 }
 0x2b6   : > { %v3421_v13 = vadd.f32 %v5001_v8, %v3325_v19  ;;  %v2404_v7 = vpop.f32.mrb[1].mxu1 }
 0x2b7   : > { %v3424_v61 = vadd.f32 %v4977_v34, %v2404_v7  ;;  %v3326_v16 = vpop.f32.mrb[2].mxu1  ;;  %v3153_v60 = vpop.f32.mrb[132].mxu0 }
 0x2b8   : > { %2518 = vst.msk [vmem:[%s4984_s26 + $0x90] sm:$0xff] %vm2499_vm0, %v3421_v13  ;;  %v3427_v1 = vadd.f32 %v5004_v48, %v3326_v16  ;;  %v2407_v47 = vpop.f32.mrb[3].mxu1  ;;  %v3154_v12 = vpop.f32.mrb[133].mxu0 }
 0x2b9   : > { %2516 = vst.msk [vmem:[%s4984_s26 + $0x80] sm:$0xff] %vm2499_vm0, %v3424_v61  ;;  %v3430_v29 = vadd.f32 %v4987_v2, %v2407_v47  ;;  %v3155_v42 = vadd.f32 %v3154_v12, %v3153_v60  ;;  %v3156_v35 = vpop.f32.mrb[134].mxu0 }
 0x2ba   : > { %2519 = vst.msk [vmem:[%s4984_s26 + $0x98] sm:$0xff] %vm2499_vm0, %v3427_v1  ;;  %v3157_v8 = vpop.f32.mrb[135].mxu0 }
 0x2bb   : > { %2517 = vst.msk [vmem:[%s4984_s26 + $0x88] sm:$0xff] %vm2499_vm0, %v3430_v29  ;;  %v3158_v34 = vadd.f32 %v3157_v8, %v3156_v35  ;;  %v3444_v54 = vadd.f32 %v4882_v28, %v3155_v42 }
 0x2bd   : > { %v3329_v48 = vpop.f32.mrb[4].mxu1  ;;  %v3450_v22 = vadd.f32 %v4890_v53, %v3158_v34 }
 0x2be   : > { %v3433_v57 = vadd.f32 %v3432_v59, %v3329_v48  ;;  %v2420_v5 = vpop.f32.mrb[5].mxu1 }
 0x2bf   : > { %v3436_v2 = vadd.f32 %v5019_v63, %v2420_v5  ;;  %v3330_v10 = vpop.f32.mrb[6].mxu1  ;;  %v3159_v21 = vpop.f32.mrb[136].mxu0 }
 0x2c0   : > { %2522 = vst.msk [vmem:[%s4984_s26 + $0xb0] sm:$0xff] %vm2499_vm0, %v3433_v57  ;;  %v3439_v32 = vadd.f32 %v3438_v36, %v3330_v10  ;;  %v2423_v20 = vpop.f32.mrb[7].mxu1  ;;  %v3160_v30 = vpop.f32.mrb[137].mxu0 }
 0x2c1   : > { %2520 = vst.msk [vmem:[%s4984_s26 + $0xa0] sm:$0xff] %vm2499_vm0, %v3436_v2  ;;  %v3442_v28 = vadd.f32 %v5022_v27, %v2423_v20  ;;  %v3161_v38 = vadd.f32 %v3160_v30, %v3159_v21  ;;  %v3162_v43 = vpop.f32.mrb[138].mxu0 }
 0x2c2   : > { %2523 = vst.msk [vmem:[%s4984_s26 + $0xb8] sm:$0xff] %vm2499_vm0, %v3439_v32  ;;  %v3163_v53 = vpop.f32.mrb[139].mxu0 }
 0x2c3   : > { %2521 = vst.msk [vmem:[%s4984_s26 + $0xa8] sm:$0xff] %vm2499_vm0, %v3442_v28  ;;  %v3164_v63 = vadd.f32 %v3163_v53, %v3162_v43  ;;  %v3459_v31 = vadd.f32 %v4904_v37, %v3161_v38 }
 0x2c5   : > { %v3333_v52 = vpop.f32.mrb[8].mxu1  ;;  %v3465_v3 = vadd.f32 %v4912_v33, %v3164_v63 }
 0x2c6   : > { %v3445_v23 = vadd.f32 %v3444_v54, %v3333_v52  ;;  %v2436_v62 = vpop.f32.mrb[9].mxu1 }
 0x2c7   : > { %v3448_v26 = vadd.f32 %v3447_v17, %v2436_v62  ;;  %v3334_v27 = vpop.f32.mrb[10].mxu1  ;;  %v3165_v9 = vpop.f32.mrb[140].mxu0 }
 0x2c8   : > { %2526 = vst.msk [vmem:[%s4984_s26 + $0xd0] sm:$0xff] %vm2499_vm0, %v3445_v23  ;;  %v3451_v49 = vadd.f32 %v3450_v22, %v3334_v27  ;;  %v2439_v25 = vpop.f32.mrb[11].mxu1  ;;  %v3166_v46 = vpop.f32.mrb[141].mxu0 }
 0x2c9   : > { %2524 = vst.msk [vmem:[%s4984_s26 + $0xc0] sm:$0xff] %vm2499_vm0, %v3448_v26  ;;  %v3454_v18 = vadd.f32 %v3453_v50, %v2439_v25  ;;  %v3167_v37 = vadd.f32 %v3166_v46, %v3165_v9  ;;  %v3168_v59 = vpop.f32.mrb[142].mxu0 }
 0x2ca   : > { %2527 = vst.msk [vmem:[%s4984_s26 + $0xd8] sm:$0xff] %vm2499_vm0, %v3451_v49  ;;  %v3169_v33 = vpop.f32.mrb[143].mxu0 }
 0x2cb   : > { %2525 = vst.msk [vmem:[%s4984_s26 + $0xc8] sm:$0xff] %vm2499_vm0, %v3454_v18  ;;  %v3456_v56 = vadd.f32 %v4925_v15, %v3167_v37  ;;  %v3170_v36 = vadd.f32 %v3169_v33, %v3168_v59 }
 0x2cd   : > { %v3337_v14 = vpop.f32.mrb[12].mxu1  ;;  %v3462_v41 = vadd.f32 %v4928_v0, %v3170_v36 }
 0x2ce   : > { %v3457_v4 = vadd.f32 %v3456_v56, %v3337_v14  ;;  %v2452_v40 = vpop.f32.mrb[13].mxu1 }
 0x2cf   : > { %v3460_v44 = vadd.f32 %v3459_v31, %v2452_v40  ;;  %v3338_v55 = vpop.f32.mrb[14].mxu1 }
 0x2d0   : > { %2530 = vst.msk [vmem:[%s4984_s26 + $0xf0] sm:$0xff] %vm2499_vm0, %v3457_v4  ;;  %v3463_v39 = vadd.f32 %v3462_v41, %v3338_v55  ;;  %v2455_v51 = vpop.f32.mrb[15].mxu1 }
 0x2d1   : > { %2528 = vst.msk [vmem:[%s4984_s26 + $0xe0] sm:$0xff] %vm2499_vm0, %v3460_v44  ;;  %v3466_v24 = vadd.f32 %v3465_v3, %v2455_v51 }
 0x2d2   : > { %2531 = vst.msk [vmem:[%s4984_s26 + $0xf8] sm:$0xff] %vm2499_vm0, %v3463_v39 }
 0x2d3   : > { %2529 = vst.msk [vmem:[%s4984_s26 + $0xe8] sm:$0xff] %vm2499_vm0, %v3466_v24 }
 0x2d4 PF: > { %s14_s15 = sadd.s32 1, %s3613_s15  }
 0x2d5   : > { %p11_p4 = scmp.ge.s32.totalorder %s14_s15, 4  }
 0x2d7   :  { %13 = sbr.rel (!%p11_p4) target bundleno = 1 (0x1), region = 75 }

</bundles_post_ra>
